<compile_context>
chip_gen: v7x
topology: tpu7x:2x2x1
jax: 0.10.0
libtpu: 0.0.40
codegen_flags: <defaults>
</compile_context>

<pallas_src>
import functools

import jax
import jax.numpy as jnp
from jax.experimental import pallas as pl
from jax.experimental.pallas import tpu as pltpu

INPUT_DIM = 32 * 32 * 3   # 3072
HIDDEN = 512
LANE = 128


def _round_up(x, m):
    return ((x + m - 1) // m) * m


@functools.lru_cache(maxsize=1)
def _vmem_limit_bytes():
    """Generation-aware VMEM limit with headroom for double-buffered tiles."""
    try:
        cap = pltpu.get_tpu_info().vmem_capacity_bytes
    except Exception:
        cap = 128 << 20
    # 3/4 of physical: 48 MiB on v7x (64 MiB / TC), capped at 64 MiB on v5e/v6e.
    return int(min(64 << 20, cap * 3 // 4))


def _pnn_mlp_kernel(x_ref, w1_ref, b1_ref, w2_ref, b2_ref, w3_ref, b3_ref, o_ref):
    """Fused 3-layer MLP on one (TM, 3072) batch tile.

    Matmuls run with bf16 inputs on the MXU and f32 accumulation; the
    bias-add / ReLU epilogues stay in f32 on the VPU.
    """
    x = x_ref[...]                                   # (TM, 3072) bf16

    # Column layer 1: Linear(3072, 512) + ReLU
    h1 = jnp.dot(x, w1_ref[...], preferred_element_type=jnp.float32)
    h1 = jnp.maximum(h1 + b1_ref[...], 0.0)

    # Column layer 2: Linear(512, 512) + ReLU
    h2 = jnp.dot(h1.astype(w2_ref.dtype), w2_ref[...],
                 preferred_element_type=jnp.float32)
    h2 = jnp.maximum(h2 + b2_ref[...], 0.0)

    # Task head: Linear(512, out_pad) (zero-padded cols), no activation
    out = jnp.dot(h2.astype(w3_ref.dtype), w3_ref[...],
                  preferred_element_type=jnp.float32)
    o_ref[...] = (out + b3_ref[...]).astype(o_ref.dtype)


@jax.jit
def _pnn_forward_pallas(x, w1, b1, w2, b2, w3, b3):
    batch, in_dim = x.shape
    out_pad = w3.shape[1]            # already lane-padded to a multiple of 128

    # Batch tile: 256 (multiple of 256 keeps v6e/v7x MXU passes full); for tiny
    # batches shrink to the next multiple of 8 so we don't DMA padding rows.
    tm = 256 if batch >= 256 else max(8, _round_up(batch, 8))
    padded_batch = _round_up(batch, tm)

    x = x.astype(jnp.bfloat16)
    if padded_batch != batch:
        x = jnp.pad(x, ((0, padded_batch - batch), (0, 0)))

    grid = (padded_batch // tm,)

    # Weights/biases: constant index_map -> resident in VMEM across batch tiles.
    resident = lambda shape: pl.BlockSpec(shape, lambda i: (0,) * len(shape))

    out = pl.pallas_call(
        _pnn_mlp_kernel,
        out_shape=jax.ShapeDtypeStruct((padded_batch, out_pad), jnp.float32),
        grid_spec=pltpu.PrefetchScalarGridSpec(
            num_scalar_prefetch=0,
            grid=grid,
            in_specs=[
                pl.BlockSpec((tm, in_dim), lambda i: (i, 0)),
                resident(w1.shape), resident(b1.shape),
                resident(w2.shape), resident(b2.shape),
                resident(w3.shape), resident(b3.shape),
            ],
            out_specs=pl.BlockSpec((tm, out_pad), lambda i: (i, 0)),
        ),
        compiler_params=pltpu.CompilerParams(
            dimension_semantics=("parallel",),
            vmem_limit_bytes=_vmem_limit_bytes(),
        ),
    )(x, w1, b1, w2, b2, w3, b3)

    return out[:batch]


class ProgressiveNeuralNetworkPallas:
    """JAX/Pallas re-implementation of the PyTorch ProgressiveNeuralNetwork."""

    def __init__(self, input_dim, output_dim, tasks, key):
        assert input_dim == INPUT_DIM, "column hard-codes 32*32*3 input, like the PyTorch module"
        self.output_dim = output_dim
        self.out_pad = _round_up(output_dim, LANE)
        self.tasks = tasks

        def linear_params(key, fan_in, fan_out, pad_to=None):
            # Deterministic init mimicking PyTorch's U(-1/sqrt(fan_in), 1/sqrt(fan_in)).
            kw, kb = jax.random.split(key)
            bound = 1.0 / jnp.sqrt(fan_in)
            w = jax.random.uniform(kw, (fan_in, fan_out), jnp.float32, -bound, bound)
            b = jax.random.uniform(kb, (1, fan_out), jnp.float32, -bound, bound)
            if pad_to is not None and pad_to != fan_out:
                w = jnp.pad(w, ((0, 0), (0, pad_to - fan_out)))
                b = jnp.pad(b, ((0, 0), (0, pad_to - fan_out)))
            # bf16 weights (cast once at init) halve HBM traffic; biases stay f32.
            return w.astype(jnp.bfloat16), b

        k1, k2, *kouts = jax.random.split(key, 2 + tasks)
        # Single column (task_id=0 at construction, matching the PyTorch __init__).
        self.columns = [
            (linear_params(k1, INPUT_DIM, HIDDEN), linear_params(k2, HIDDEN, HIDDEN))
        ]
        # One (lane-padded) output head per task.
        self.output_layers = [
            linear_params(k, HIDDEN, output_dim, pad_to=self.out_pad) for k in kouts
        ]

    def __call__(self, x, task_id):
        (w1, b1), (w2, b2) = self.columns[task_id]
        w3, b3 = self.output_layers[task_id]
        out = _pnn_forward_pallas(x, w1, b1, w2, b2, w3, b3)
        return out[:, :self.output_dim]


def _reference_forward(x, model, task_id):
    """Pure-JAX reference using the exact same bf16-weight / f32-acc math."""
    (w1, b1), (w2, b2) = model.columns[task_id]
    w3, b3 = model.output_layers[task_id]
    xb = x.astype(jnp.bfloat16)
    h1 = jnp.maximum(jnp.dot(xb, w1, preferred_element_type=jnp.float32) + b1, 0.0)
    h2 = jnp.maximum(
        jnp.dot(h1.astype(jnp.bfloat16), w2, preferred_element_type=jnp.float32) + b2, 0.0)
    out = jnp.dot(h2.astype(jnp.bfloat16), w3, preferred_element_type=jnp.float32) + b3
    return out[:, :model.output_dim]


if __name__ == "__main__":
    key = jax.random.PRNGKey(0)
    k_params, k_x = jax.random.split(key)

    batch = 2
    output_dim = 10
    tasks = 2

    model = ProgressiveNeuralNetworkPallas(INPUT_DIM, output_dim, tasks, k_params)

    # x: flattened 32x32x3 images, shape (batch, 3072)
    x = jax.random.normal(k_x, (batch, INPUT_DIM), dtype=jnp.float32)

    task_id = 0  # only column 0 exists, as in the PyTorch constructor
    out = model(x, task_id)
    out = jax.block_until_ready(out)

    ref = _reference_forward(x, model, task_id)
    assert out.shape == (batch, output_dim), out.shape
    assert jnp.allclose(out, ref, atol=2e-2, rtol=2e-2), "Pallas output mismatch vs reference"

    print("KERNEL_OK")
</pallas_src>

<mosaic_0001>
module attributes {stable_mosaic.version = 11 : i64} {
  func.func @_pnn_mlp_kernel(%arg0: i32, %arg1: memref<8x3072xbf16, #tpu.memory_space<vmem>>, %arg2: memref<3072x512xbf16, #tpu.memory_space<vmem>>, %arg3: memref<1x512xf32, #tpu.memory_space<vmem>>, %arg4: memref<512x512xbf16, #tpu.memory_space<vmem>>, %arg5: memref<1x512xf32, #tpu.memory_space<vmem>>, %arg6: memref<512x128xbf16, #tpu.memory_space<vmem>>, %arg7: memref<1x128xf32, #tpu.memory_space<vmem>>, %arg8: memref<8x128xf32, #tpu.memory_space<vmem>>) attributes {dimension_semantics = [#tpu.dimension_semantics<parallel>], iteration_bounds = array<i64: 1>, scalar_prefetch = 0 : i64, scratch_operands = 0 : i64, tpu.core_type = #tpu.core_type<tc>, window_params = [{transform_indices = @transform_0, window_bounds = array<i64: 8, 3072>}, {pipeline_mode = #tpu.pipeline_mode<synchronous>, transform_indices = @transform_1, window_bounds = array<i64: 3072, 512>}, {pipeline_mode = #tpu.pipeline_mode<synchronous>, transform_indices = @transform_2, window_bounds = array<i64: 1, 512>}, {pipeline_mode = #tpu.pipeline_mode<synchronous>, transform_indices = @transform_3, window_bounds = array<i64: 512, 512>}, {pipeline_mode = #tpu.pipeline_mode<synchronous>, transform_indices = @transform_4, window_bounds = array<i64: 1, 512>}, {pipeline_mode = #tpu.pipeline_mode<synchronous>, transform_indices = @transform_5, window_bounds = array<i64: 512, 128>}, {pipeline_mode = #tpu.pipeline_mode<synchronous>, transform_indices = @transform_6, window_bounds = array<i64: 1, 128>}, {transform_indices = @transform_7, window_bounds = array<i64: 8, 128>}]} {
    %c0 = arith.constant 0 : index
    %c0_0 = arith.constant 0 : index
    %0 = vector.load %arg1[%c0, %c0_0] : memref<8x3072xbf16, #tpu.memory_space<vmem>>, vector<8x3072xbf16>
    %c0_1 = arith.constant 0 : index
    %c0_2 = arith.constant 0 : index
    %1 = vector.load %arg2[%c0_1, %c0_2] : memref<3072x512xbf16, #tpu.memory_space<vmem>>, vector<3072x512xbf16>
    %cst = arith.constant dense<0.000000e+00> : vector<8x512xf32>
    %2 = tpu.matmul %0, %1, %cst {dimension_numbers = #tpu.dot_dimension_numbers<[1], [0], [0], [1], [0, 0, 1, 1], [], []>} : vector<8x3072xbf16>, vector<3072x512xbf16>, vector<8x512xf32> -> vector<8x512xf32>
    %c0_3 = arith.constant 0 : index
    %c0_4 = arith.constant 0 : index
    %3 = vector.load %arg3[%c0_3, %c0_4] : memref<1x512xf32, #tpu.memory_space<vmem>>, vector<1x512xf32>
    %4 = vector.broadcast %3 : vector<1x512xf32> to vector<8x512xf32>
    %5 = arith.addf %2, %4 : vector<8x512xf32>
    %cst_5 = arith.constant 0.000000e+00 : f32
    %6 = vector.broadcast %cst_5 : f32 to vector<8x512xf32>
    %7 = arith.maximumf %5, %6 : vector<8x512xf32>
    %8 = arith.truncf %7 : vector<8x512xf32> to vector<8x512xbf16>
    %c0_6 = arith.constant 0 : index
    %c0_7 = arith.constant 0 : index
    %9 = vector.load %arg4[%c0_6, %c0_7] : memref<512x512xbf16, #tpu.memory_space<vmem>>, vector<512x512xbf16>
    %cst_8 = arith.constant dense<0.000000e+00> : vector<8x512xf32>
    %10 = tpu.matmul %8, %9, %cst_8 {dimension_numbers = #tpu.dot_dimension_numbers<[1], [0], [0], [1], [0, 0, 1, 1], [], []>} : vector<8x512xbf16>, vector<512x512xbf16>, vector<8x512xf32> -> vector<8x512xf32>
    %c0_9 = arith.constant 0 : index
    %c0_10 = arith.constant 0 : index
    %11 = vector.load %arg5[%c0_9, %c0_10] : memref<1x512xf32, #tpu.memory_space<vmem>>, vector<1x512xf32>
    %12 = vector.broadcast %11 : vector<1x512xf32> to vector<8x512xf32>
    %13 = arith.addf %10, %12 : vector<8x512xf32>
    %cst_11 = arith.constant 0.000000e+00 : f32
    %14 = vector.broadcast %cst_11 : f32 to vector<8x512xf32>
    %15 = arith.maximumf %13, %14 : vector<8x512xf32>
    %16 = arith.truncf %15 : vector<8x512xf32> to vector<8x512xbf16>
    %c0_12 = arith.constant 0 : index
    %c0_13 = arith.constant 0 : index
    %17 = vector.load %arg6[%c0_12, %c0_13] : memref<512x128xbf16, #tpu.memory_space<vmem>>, vector<512x128xbf16>
    %cst_14 = arith.constant dense<0.000000e+00> : vector<8x128xf32>
    %18 = tpu.matmul %16, %17, %cst_14 {dimension_numbers = #tpu.dot_dimension_numbers<[1], [0], [0], [1], [0, 0, 1, 1], [], []>} : vector<8x512xbf16>, vector<512x128xbf16>, vector<8x128xf32> -> vector<8x128xf32>
    %c0_15 = arith.constant 0 : index
    %c0_16 = arith.constant 0 : index
    %19 = vector.load %arg7[%c0_15, %c0_16] : memref<1x128xf32, #tpu.memory_space<vmem>>, vector<1x128xf32>
    %20 = vector.broadcast %19 : vector<1x128xf32> to vector<8x128xf32>
    %21 = arith.addf %18, %20 : vector<8x128xf32>
    %c0_17 = arith.constant 0 : index
    %c0_18 = arith.constant 0 : index
    %22 = vector.load %arg8[%c0_17, %c0_18] : memref<8x128xf32, #tpu.memory_space<vmem>>, vector<8x128xf32>
    tpu.vector_store %arg8[%c0_17, %c0_18], %21 {strides = array<i32>} : memref<8x128xf32, #tpu.memory_space<vmem>>, vector<8x128xf32>,
    return
  }
  func.func @transform_0(%arg0: i32) -> (i32, i32) {
    %c0_i32 = arith.constant 0 : i32
    %c0_i32_0 = arith.constant 0 : i32
    return %arg0, %c0_i32 : i32, i32
  }
  func.func @transform_1(%arg0: i32) -> (i32, i32) {
    %c0_i32 = arith.constant 0 : i32
    %c0_i32_0 = arith.constant 0 : i32
    %c0_i32_1 = arith.constant 0 : i32
    return %c0_i32, %c0_i32_0 : i32, i32
  }
  func.func @transform_2(%arg0: i32) -> (i32, i32) {
    %c0_i32 = arith.constant 0 : i32
    %c0_i32_0 = arith.constant 0 : i32
    %c0_i32_1 = arith.constant 0 : i32
    return %c0_i32, %c0_i32_0 : i32, i32
  }
  func.func @transform_3(%arg0: i32) -> (i32, i32) {
    %c0_i32 = arith.constant 0 : i32
    %c0_i32_0 = arith.constant 0 : i32
    %c0_i32_1 = arith.constant 0 : i32
    return %c0_i32, %c0_i32_0 : i32, i32
  }
  func.func @transform_4(%arg0: i32) -> (i32, i32) {
    %c0_i32 = arith.constant 0 : i32
    %c0_i32_0 = arith.constant 0 : i32
    %c0_i32_1 = arith.constant 0 : i32
    return %c0_i32, %c0_i32_0 : i32, i32
  }
  func.func @transform_5(%arg0: i32) -> (i32, i32) {
    %c0_i32 = arith.constant 0 : i32
    %c0_i32_0 = arith.constant 0 : i32
    %c0_i32_1 = arith.constant 0 : i32
    return %c0_i32, %c0_i32_0 : i32, i32
  }
  func.func @transform_6(%arg0: i32) -> (i32, i32) {
    %c0_i32 = arith.constant 0 : i32
    %c0_i32_0 = arith.constant 0 : i32
    %c0_i32_1 = arith.constant 0 : i32
    return %c0_i32, %c0_i32_0 : i32, i32
  }
  func.func @transform_7(%arg0: i32) -> (i32, i32) {
    %c0_i32 = arith.constant 0 : i32
    %c0_i32_0 = arith.constant 0 : i32
    return %arg0, %c0_i32 : i32, i32
  }
}

</mosaic_0001>

<bundles_post_ra>
// kernel: _pnn_forward_pallas.1
= control target key start
LH: loop header
LB: loop body
LE: loop exit
PB: predicated region body
PF: predicated region fallthrough
CT: control target
= control target key end

     0   :  { %12 = vsyncpa [#allocation3], 0  ;;  %s10101_s0 = inlined_call_operand.hbm [shape: bf16[8,3072], index: 0, kind: input, shape index: {}]   ;;  %s10102_s1 = inlined_call_operand.hbm [shape: bf16[3072,512], index: 1, kind: input, shape index: {}]   ;;  %s10103_s2 = inlined_call_operand.hbm [shape: f32[1,512], index: 2, kind: input, shape index: {}]   ;;  %s10104_s3 = inlined_call_operand.hbm [shape: bf16[512,512], index: 3, kind: input, shape index: {}]   ;;  %s10105_s4 = inlined_call_operand.hbm [shape: f32[1,512], index: 4, kind: input, shape index: {}]   ;;  %s10106_s5 = inlined_call_operand.hbm [shape: bf16[512,128], index: 5, kind: input, shape index: {}]   ;;  %s10107_s6 = inlined_call_operand.hbm [shape: f32[1,128], index: 6, kind: input, shape index: {}]   ;;  %s10108_s7 = inlined_call_operand.hbm [shape: f32[8,128], index: 7, kind: output, shape index: {}]  }
   0x1   :  { %13 = vsyncpa [#allocation6], 0 }
   0x2   :  { %14 = vsyncpa [#allocation9], 0 }
   0x3   :  { %15 = vsyncpa [#allocation12], 0 }
   0x4   :  { %16 = vsyncpa [#allocation4], 0  ;;  %s9856_s24 = smov [#allocation5]   ;;  %s9670_s28 = scalar_lea.hbm %s10102_s1, 98304 }
   0x5   :  { %s32_s25 = sshll.u32 %s9856_s24, 4  ;;  %p9671_p0 = scmp.ne.s32.totalorder %s10102_s1, %s9670_s28  ;;  %s33_s25 = int_to_ptr.vmem [resolvable:$true] %s32_s25 }
   0x6   :  { %p9674_p1 = scmp.lt.u32.totalorder %s9670_s28, %s10102_s1 }
   0x8   :  { %p9676_p2 = pnand %p9674_p1, %p9671_p0 }
   0xa   :  { %9679 = shalt.err (!%p9676_p2)
}
   0xb   :  { %s9680_s10 = scalar_lea.vmem %s33_s25, 98304  ;;  %p9685_p4 = scmp.lt.s32.totalorder %s33_s25, %s33_s25 }
   0xc   :  { %p9681_p3 = scmp.ne.s32.totalorder %s33_s25, %s9680_s10  ;;  %p9686_p5 = scmp.lt.s32.totalorder %s9680_s10, %s9680_s10 }
   0xe   :  { %p9687_p6 = por %p9686_p5, %p9685_p4 }
  0x10   :  { %p9688_p7 = pnand %p9687_p6, %p9681_p3 }
  0x12   :  { %9691 = shalt.err (!%p9688_p7)
}
  0x13   :  { %s9857_s11 = smov 256   ;;  %s9858_s12 = smov 16  }
  0x14   :  { %38 = dma.hbm_to_vmem [thread:$0]  %s10102_s1, 98304, %s33_s25, [#allocation6], %s9857_s11, %s9857_s11, %s9858_s12  }
  0x15   :  { %s9859_s15 = smov [#allocation8]   ;;  %s9860_s17 = smov [#allocation11]  }
  0x16   :  { %s54_s16 = sshll.u32 %s9859_s15, 4  ;;  %s76_s18 = sshll.u32 %s9860_s17, 4  ;;  %s55_s16 = int_to_ptr.vmem [resolvable:$true] %s54_s16  ;;  %s77_s18 = int_to_ptr.vmem [resolvable:$true] %s76_s18 }
  0x17   :  { %s9692_s21 = scalar_lea.hbm %s10104_s3, 16384 }
  0x18   :  { %p9693_p8 = scmp.ne.s32.totalorder %s10104_s3, %s9692_s21  ;;  %p9696_p9 = scmp.lt.u32.totalorder %s9692_s21, %s10104_s3 }
  0x1a   :  { %p9698_p10 = pnand %p9696_p9, %p9693_p8 }
  0x1c   :  { %9701 = shalt.err (!%p9698_p10)
}
  0x1d   :  { %s9702_s1 = scalar_lea.vmem %s55_s16, 16384  ;;  %p9707_p12 = scmp.lt.s32.totalorder %s55_s16, %s55_s16 }
  0x1e   :  { %p9703_p11 = scmp.ne.s32.totalorder %s55_s16, %s9702_s1  ;;  %p9708_p13 = scmp.lt.s32.totalorder %s9702_s1, %s9702_s1 }
  0x20   :  { %p9709_p0 = por %p9708_p13, %p9707_p12 }
  0x22   :  { %p9710_p1 = pnand %p9709_p0, %p9703_p11 }
  0x24   :  { %9713 = shalt.err (!%p9710_p1)
}
  0x25   :  { %60 = dma.hbm_to_vmem [thread:$0]  %s10104_s3, 16384, %s55_s16, [#allocation9], %s9857_s11, %s9857_s11, %s9858_s12  }
  0x26   :  { %s9714_s30 = scalar_lea.hbm %s10106_s5, 4096 }
  0x27   :  { %p9715_p2 = scmp.ne.s32.totalorder %s10106_s5, %s9714_s30  ;;  %p9718_p3 = scmp.lt.u32.totalorder %s9714_s30, %s10106_s5 }
  0x29   :  { %p9720_p4 = pnand %p9718_p3, %p9715_p2 }
  0x2b   :  { %9723 = shalt.err (!%p9720_p4)
}
  0x2c   :  { %s9724_s14 = scalar_lea.vmem %s77_s18, 4096  ;;  %p9729_p6 = scmp.lt.s32.totalorder %s77_s18, %s77_s18 }
  0x2d   :  { %p9725_p5 = scmp.ne.s32.totalorder %s77_s18, %s9724_s14  ;;  %p9730_p7 = scmp.lt.s32.totalorder %s9724_s14, %s9724_s14 }
  0x2f   :  { %p9731_p8 = por %p9730_p7, %p9729_p6 }
  0x31   :  { %p9732_p9 = pnand %p9731_p8, %p9725_p5 }
  0x33   :  { %9735 = shalt.err (!%p9732_p9)
}
  0x34   :  { %s9861_s3 = smov 64   ;;  %s9862_s11 = smov 4  }
  0x35   :  { %82 = dma.hbm_to_vmem [thread:$0]  %s10106_s5, 4096, %s77_s18, [#allocation12], %s9861_s3, %s9861_s3, %s9862_s11  }
  0x36   :  { %s9863_s16 = smov [#allocation2]   ;;  %s9864_s19 = smov [#allocation7]  }
  0x37   :  { %s23_s17 = sshll.u32 %s9863_s16, 4  ;;  %s45_s20 = sshll.u32 %s9864_s19, 4  ;;  %s24_s17 = int_to_ptr.vmem [resolvable:$true] %s23_s17  ;;  %s46_s20 = int_to_ptr.vmem [resolvable:$true] %s45_s20 }
  0x38   :  { %s9736_s23 = scalar_lea.hbm %s10101_s0, 1536 }
  0x39   :  { %p9737_p10 = scmp.ne.s32.totalorder %s10101_s0, %s9736_s23  ;;  %p9740_p11 = scmp.lt.u32.totalorder %s9736_s23, %s10101_s0 }
  0x3b   :  { %p9742_p12 = pnand %p9740_p11, %p9737_p10 }
  0x3d   :  { %9745 = shalt.err (!%p9742_p12)
}
  0x3e   :  { %s9746_s5 = scalar_lea.vmem %s24_s17, 1536  ;;  %p9751_p0 = scmp.lt.s32.totalorder %s24_s17, %s24_s17 }
  0x3f   :  { %p9747_p13 = scmp.ne.s32.totalorder %s24_s17, %s9746_s5  ;;  %p9752_p1 = scmp.lt.s32.totalorder %s9746_s5, %s9746_s5 }
  0x41   :  { %p9753_p2 = por %p9752_p1, %p9751_p0 }
  0x43   :  { %p9754_p3 = pnand %p9753_p2, %p9747_p13 }
  0x45   :  { %9757 = shalt.err (!%p9754_p3)
}
  0x46   :  { %26 = dma.hbm_to_vmem [thread:$0]  %s10101_s0, 1536, %s24_s17, [#allocation3]  }
  0x47   :  { %s9758_s30 = scalar_lea.hbm %s10103_s2, 64 }
  0x48   :  { %p9759_p4 = scmp.ne.s32.totalorder %s10103_s2, %s9758_s30  ;;  %p9762_p5 = scmp.lt.u32.totalorder %s9758_s30, %s10103_s2 }
  0x4a   :  { %p9764_p6 = pnand %p9762_p5, %p9759_p4 }
  0x4c   :  { %9767 = shalt.err (!%p9764_p6)
}
  0x4d   :  { %s9768_s14 = scalar_lea.vmem %s46_s20, 64  ;;  %p9773_p8 = scmp.lt.s32.totalorder %s46_s20, %s46_s20 }
  0x4e   :  { %p9769_p7 = scmp.ne.s32.totalorder %s46_s20, %s9768_s14  ;;  %p9774_p9 = scmp.lt.s32.totalorder %s9768_s14, %s9768_s14 }
  0x50   :  { %p9775_p10 = por %p9774_p9, %p9773_p8 }
  0x52   :  { %p9776_p11 = pnand %p9775_p10, %p9769_p7 }
  0x54   :  { %9779 = shalt.err (!%p9776_p11)
}
  0x55   :  { %48 = dma.hbm_to_vmem [thread:$0]  %s10103_s2, 64, %s46_s20, [#allocation6]  }
  0x56   :  { %s9865_s11 = smov [#allocation10]   ;;  %s9866_s15 = smov [#allocation13]  }
  0x57   :  { %s67_s12 = sshll.u32 %s9865_s11, 4  ;;  %s89_s16 = sshll.u32 %s9866_s15, 4  ;;  %s68_s12 = int_to_ptr.vmem [resolvable:$true] %s67_s12  ;;  %s90_s16 = int_to_ptr.vmem [resolvable:$true] %s89_s16 }
  0x58   :  { %s9780_s21 = scalar_lea.hbm %s10105_s4, 64 }
  0x59   :  { %p9781_p12 = scmp.ne.s32.totalorder %s10105_s4, %s9780_s21  ;;  %p9784_p13 = scmp.lt.u32.totalorder %s9780_s21, %s10105_s4 }
  0x5b   :  { %p9786_p0 = pnand %p9784_p13, %p9781_p12 }
  0x5d   :  { %9789 = shalt.err (!%p9786_p0)
}
  0x5e   :  { %s9790_s2 = scalar_lea.vmem %s68_s12, 64  ;;  %p9795_p2 = scmp.lt.s32.totalorder %s68_s12, %s68_s12 }
  0x5f   :  { %p9791_p1 = scmp.ne.s32.totalorder %s68_s12, %s9790_s2  ;;  %p9796_p3 = scmp.lt.s32.totalorder %s9790_s2, %s9790_s2 }
  0x61   :  { %p9797_p4 = por %p9796_p3, %p9795_p2 }
  0x63   :  { %p9798_p5 = pnand %p9797_p4, %p9791_p1 }
  0x65   :  { %9801 = shalt.err (!%p9798_p5)
}
  0x66   :  { %70 = dma.hbm_to_vmem [thread:$0]  %s10105_s4, 64, %s68_s12, [#allocation9]  }
  0x67   :  { %s9802_s18 = scalar_lea.hbm %s10107_s6, 16 }
  0x68   :  { %p9803_p6 = scmp.ne.s32.totalorder %s10107_s6, %s9802_s18  ;;  %p9806_p7 = scmp.lt.u32.totalorder %s9802_s18, %s10107_s6 }
  0x6a   :  { %p9808_p8 = pnand %p9806_p7, %p9803_p6 }
  0x6c   :  { %9811 = shalt.err (!%p9808_p8)
}
  0x6d   :  { %s9812_s8 = scalar_lea.vmem %s90_s16, 16  ;;  %s9816_s9 = scalar_lea.vmem %s90_s16, 32 }
  0x6e   :  { %p9813_p9 = scmp.ne.s32.totalorder %s90_s16, %s9812_s8  ;;  %p9817_p10 = scmp.lt.s32.totalorder %s90_s16, %s90_s16 }
  0x6f   :  { %p9818_p11 = scmp.lt.s32.totalorder %s9816_s9, %s9812_s8 }
  0x71   :  { %p9819_p12 = por %p9818_p11, %p9817_p10 }
  0x73   :  { %p9820_p13 = pnand %p9819_p12, %p9813_p9 }
  0x75   :  { %9823 = shalt.err (!%p9820_p13)
}
  0x76   :  { %92 = dma.hbm_to_vmem [thread:$0]  %s10107_s6, 16, %s90_s16, [#allocation12]  }
  0x77   :  { %9846 = dma.done.wait [#allocation3], 1536  }
  0x78   :  { %9847 = vsyncadd [#allocation3], 4294965760 }
  0x79   :  { %9848 = dma.done.wait [#allocation6], 98368  }
  0x7a   :  { %9849 = vsyncadd [#allocation6], 4294868928 }
  0x7b   :  { %9850 = dma.done.wait [#allocation9], 16448  }
  0x7c   :  { %9851 = vsyncadd [#allocation9], 4294950848 }
  0x7d   :  { %9852 = dma.done.wait [#allocation12], 4112  }
  0x7e   :  { %9853 = vsyncadd [#allocation12], 4294963184  ;;  %v8270_v0 = vld [vmem:[#allocation5 + $0x4] ss:$16 sps:$4 sm:$0xff]   ;;  %v8272_v1 = vld [vmem:[#allocation5 + $0xc] ss:$16 sps:$4 sm:$0xff]  }
  0x7f   :  { %4841 = vmatprep.subr.bf16.mxu0 %v8270_v0  ;;  %v8274_v2 = vld [vmem:[#allocation5] ss:$16 sps:$4 sm:$0xff]   ;;  %v8275_v3 = vld [vmem:[#allocation5 + $0x8] ss:$16 sps:$4 sm:$0xff]   ;;  %5333 = vmatprep.subr.bf16.mxu1 %v8272_v1  ;;  %v8276_v4 = vld [vmem:[#allocation5 + $0x24] ss:$16 sps:$4 sm:$0xff]  }
  0x80   :  { %4842 = vmatpush1.bf16.msra.mxu0 %v8274_v2  ;;  %5334 = vmatpush1.bf16.msra.mxu1 %v8275_v3  ;;  %v8278_v5 = vld [vmem:[#allocation5 + $0x2c] ss:$16 sps:$4 sm:$0xff]   ;;  %v8280_v6 = vld [vmem:[#allocation5 + $0x20] ss:$16 sps:$4 sm:$0xff]   ;;  %v8281_v7 = vld [vmem:[#allocation5 + $0x28] ss:$16 sps:$4 sm:$0xff]  }
  0x81   :  { %4843 = vmatprep.subr.bf16.mxu0 %v8276_v4  ;;  %5335 = vmatprep.subr.bf16.mxu1 %v8278_v5  ;;  %v8282_v8 = vld [vmem:[#allocation5 + $0x44] ss:$16 sps:$4 sm:$0xff]   ;;  %v8284_v9 = vld [vmem:[#allocation5 + $0x4c] ss:$16 sps:$4 sm:$0xff]   ;;  %v8286_v10 = vld [vmem:[#allocation5 + $0x40] ss:$16 sps:$4 sm:$0xff]  }
  0x82   :  { %v8287_v11 = vld [vmem:[#allocation5 + $0x48] ss:$16 sps:$4 sm:$0xff]   ;;  %v8288_v12 = vld [vmem:[#allocation5 + $0x64] ss:$16 sps:$4 sm:$0xff]   ;;  %v8290_v13 = vld [vmem:[#allocation5 + $0x6c] ss:$16 sps:$4 sm:$0xff]  }
  0x83   :  { %v8292_v14 = vld [vmem:[#allocation5 + $0x60] ss:$16 sps:$4 sm:$0xff]   ;;  %v8293_v15 = vld [vmem:[#allocation5 + $0x68] ss:$16 sps:$4 sm:$0xff]   ;;  %v8294_v16 = vld [vmem:[#allocation5 + $0x84] ss:$16 sps:$4 sm:$0xff]  }
  0x84   :  { %4844 = vmatpush1.bf16.msra.mxu0 %v8280_v6  ;;  %5336 = vmatpush1.bf16.msra.mxu1 %v8281_v7  ;;  %v8296_v17 = vld [vmem:[#allocation5 + $0x8c] ss:$16 sps:$4 sm:$0xff]   ;;  %v8298_v18 = vld [vmem:[#allocation5 + $0x80] ss:$16 sps:$4 sm:$0xff]   ;;  %v8299_v19 = vld [vmem:[#allocation5 + $0x88] ss:$16 sps:$4 sm:$0xff]  }
  0x85   :  { %4845 = vmatprep.subr.bf16.mxu0 %v8282_v8  ;;  %5337 = vmatprep.subr.bf16.mxu1 %v8284_v9  ;;  %v8300_v20 = vld [vmem:[#allocation5 + $0xa4] ss:$16 sps:$4 sm:$0xff]   ;;  %v8302_v21 = vld [vmem:[#allocation5 + $0xac] ss:$16 sps:$4 sm:$0xff]   ;;  %v8304_v22 = vld [vmem:[#allocation5 + $0xa0] ss:$16 sps:$4 sm:$0xff]  }
  0x86   :  { %v8305_v23 = vld [vmem:[#allocation5 + $0xa8] ss:$16 sps:$4 sm:$0xff]   ;;  %v8306_v24 = vld [vmem:[#allocation5 + $0xc4] ss:$16 sps:$4 sm:$0xff]   ;;  %v8308_v25 = vld [vmem:[#allocation5 + $0xcc] ss:$16 sps:$4 sm:$0xff]  }
  0x87   :  { %v8310_v26 = vld [vmem:[#allocation5 + $0xc0] ss:$16 sps:$4 sm:$0xff]   ;;  %v8311_v27 = vld [vmem:[#allocation5 + $0xc8] ss:$16 sps:$4 sm:$0xff]   ;;  %v8312_v28 = vld [vmem:[#allocation5 + $0xe4] ss:$16 sps:$4 sm:$0xff]  }
  0x88   :  { %4846 = vmatpush1.bf16.msra.mxu0 %v8286_v10  ;;  %5338 = vmatpush1.bf16.msra.mxu1 %v8287_v11  ;;  %v8314_v29 = vld [vmem:[#allocation5 + $0xec] ss:$16 sps:$4 sm:$0xff]   ;;  %v8316_v30 = vld [vmem:[#allocation5 + $0xe0] ss:$16 sps:$4 sm:$0xff]   ;;  %v8317_v31 = vld [vmem:[#allocation5 + $0xe8] ss:$16 sps:$4 sm:$0xff]  }
  0x89   :  { %4847 = vmatprep.subr.bf16.mxu0 %v8288_v12  ;;  %5339 = vmatprep.subr.bf16.mxu1 %v8290_v13  ;;  %v8318_v32 = vld [vmem:[#allocation5 + $0x104] ss:$16 sps:$4 sm:$0xff]   ;;  %v8320_v33 = vld [vmem:[#allocation5 + $0x10c] ss:$16 sps:$4 sm:$0xff]   ;;  %v8322_v34 = vld [vmem:[#allocation5 + $0x100] ss:$16 sps:$4 sm:$0xff]  }
  0x8a   :  { %v8323_v35 = vld [vmem:[#allocation5 + $0x108] ss:$16 sps:$4 sm:$0xff]   ;;  %v8324_v36 = vld [vmem:[#allocation5 + $0x124] ss:$16 sps:$4 sm:$0xff]   ;;  %v8326_v37 = vld [vmem:[#allocation5 + $0x12c] ss:$16 sps:$4 sm:$0xff]  }
  0x8b   :  { %v8328_v38 = vld [vmem:[#allocation5 + $0x120] ss:$16 sps:$4 sm:$0xff]   ;;  %v8329_v39 = vld [vmem:[#allocation5 + $0x128] ss:$16 sps:$4 sm:$0xff]   ;;  %v8330_v40 = vld [vmem:[#allocation5 + $0x144] ss:$16 sps:$4 sm:$0xff]  }
  0x8c   :  { %4848 = vmatpush1.bf16.msra.mxu0 %v8292_v14  ;;  %5340 = vmatpush1.bf16.msra.mxu1 %v8293_v15  ;;  %v8332_v41 = vld [vmem:[#allocation5 + $0x14c] ss:$16 sps:$4 sm:$0xff]   ;;  %v8334_v42 = vld [vmem:[#allocation5 + $0x140] ss:$16 sps:$4 sm:$0xff]   ;;  %v8335_v43 = vld [vmem:[#allocation5 + $0x148] ss:$16 sps:$4 sm:$0xff]  }
  0x8d   :  { %4849 = vmatprep.subr.bf16.mxu0 %v8294_v16  ;;  %5341 = vmatprep.subr.bf16.mxu1 %v8296_v17  ;;  %v8336_v44 = vld [vmem:[#allocation5 + $0x164] ss:$16 sps:$4 sm:$0xff]   ;;  %v8338_v45 = vld [vmem:[#allocation5 + $0x16c] ss:$16 sps:$4 sm:$0xff]   ;;  %v8340_v47 = vld [vmem:[#allocation5 + $0x160] ss:$16 sps:$4 sm:$0xff]  }
  0x8e   :  { %v115_v46 = vld [vmem:[#allocation2] sm:$0xff]  ;;  %v8341_v49 = vld [vmem:[#allocation5 + $0x168] ss:$16 sps:$4 sm:$0xff]   ;;  %v8344_v51 = vld [vmem:[#allocation5 + $0x18c] ss:$16 sps:$4 sm:$0xff]   ;;  %s9867_s6 = smov [#allocation14]  }
  0x8f   :  { %v7158_v48 = vcombine.high %v115_v46, %v115_v46  ;;  %v8342_v50 = vld [vmem:[#allocation5 + $0x184] ss:$16 sps:$4 sm:$0xff]   ;;  %v8346_v52 = vld [vmem:[#allocation5 + $0x180] ss:$16 sps:$4 sm:$0xff]   ;;  %v8347_v53 = vld [vmem:[#allocation5 + $0x188] ss:$16 sps:$4 sm:$0xff]   ;;  %v7157_v4 = vcombine.low %v115_v46, %v115_v46 }
  0x90   :  { %4850 = vmatpush1.bf16.msra.mxu0 %v8298_v18  ;;  %5342 = vmatpush1.bf16.msra.mxu1 %v8299_v19  ;;  %v8348_v54 = vld [vmem:[#allocation5 + $0x1a4] ss:$16 sps:$4 sm:$0xff]   ;;  %v8350_v55 = vld [vmem:[#allocation5 + $0x1ac] ss:$16 sps:$4 sm:$0xff]   ;;  %v8352_v56 = vld [vmem:[#allocation5 + $0x1a0] ss:$16 sps:$4 sm:$0xff]  }
  0x91   :  { %4851 = vmatprep.subr.bf16.mxu0 %v8300_v20  ;;  %5343 = vmatprep.subr.bf16.mxu1 %v8302_v21  ;;  %v8353_v57 = vld [vmem:[#allocation5 + $0x1a8] ss:$16 sps:$4 sm:$0xff]   ;;  %v8354_v58 = vld [vmem:[#allocation5 + $0x1c4] ss:$16 sps:$4 sm:$0xff]   ;;  %v8356_v59 = vld [vmem:[#allocation5 + $0x1cc] ss:$16 sps:$4 sm:$0xff]  }
  0x92   :  { %4873 = vmatprep.mubr.bf16.mxu0 %v7158_v48  ;;  %5365 = vmatprep.mubr.bf16.mxu1 %v7158_v48  ;;  %v8358_v60 = vld [vmem:[#allocation5 + $0x1c0] ss:$16 sps:$4 sm:$0xff]   ;;  %v8359_v61 = vld [vmem:[#allocation5 + $0x1c8] ss:$16 sps:$4 sm:$0xff]   ;;  %v8360_v62 = vld [vmem:[#allocation5 + $0x1e4] ss:$16 sps:$4 sm:$0xff]  }
  0x93   :  { %v8362_v63 = vld [vmem:[#allocation5 + $0x1ec] ss:$16 sps:$4 sm:$0xff]   ;;  %v8364_v0 = vld [vmem:[#allocation5 + $0x1e0] ss:$16 sps:$4 sm:$0xff]   ;;  %v8365_v1 = vld [vmem:[#allocation5 + $0x1e8] ss:$16 sps:$4 sm:$0xff]  }
  0x94   :  { %4852 = vmatpush1.bf16.msra.mxu0 %v8304_v22  ;;  %5344 = vmatpush1.bf16.msra.mxu1 %v8305_v23  ;;  %v8370_v2 = vld [vmem:[#allocation5 + $0x204] ss:$16 sps:$4 sm:$0xff]   ;;  %v8373_v3 = vld [vmem:[#allocation5 + $0x20c] ss:$16 sps:$4 sm:$0xff]   ;;  %v8368_v5 = vld [vmem:[#allocation5 + $0x200] ss:$16 sps:$4 sm:$0xff]  }
  0x95   :  { %4853 = vmatprep.subr.bf16.mxu0 %v8306_v24  ;;  %5345 = vmatprep.subr.bf16.mxu1 %v8308_v25  ;;  %v8371_v6 = vld [vmem:[#allocation5 + $0x208] ss:$16 sps:$4 sm:$0xff]   ;;  %v8376_v7 = vld [vmem:[#allocation5 + $0x224] ss:$16 sps:$4 sm:$0xff]   ;;  %v8379_v8 = vld [vmem:[#allocation5 + $0x22c] ss:$16 sps:$4 sm:$0xff]  }
  0x96   :  { %v8374_v9 = vld [vmem:[#allocation5 + $0x220] ss:$16 sps:$4 sm:$0xff]   ;;  %v8377_v10 = vld [vmem:[#allocation5 + $0x228] ss:$16 sps:$4 sm:$0xff]   ;;  %v8382_v11 = vld [vmem:[#allocation5 + $0x244] ss:$16 sps:$4 sm:$0xff]  }
  0x97   :  { %v8385_v12 = vld [vmem:[#allocation5 + $0x24c] ss:$16 sps:$4 sm:$0xff]   ;;  %v8380_v13 = vld [vmem:[#allocation5 + $0x240] ss:$16 sps:$4 sm:$0xff]   ;;  %v8383_v14 = vld [vmem:[#allocation5 + $0x248] ss:$16 sps:$4 sm:$0xff]  }
  0x98   :  { %4854 = vmatpush1.bf16.msra.mxu0 %v8310_v26  ;;  %5346 = vmatpush1.bf16.msra.mxu1 %v8311_v27  ;;  %v8388_v15 = vld [vmem:[#allocation5 + $0x264] ss:$16 sps:$4 sm:$0xff]   ;;  %v8391_v16 = vld [vmem:[#allocation5 + $0x26c] ss:$16 sps:$4 sm:$0xff]   ;;  %v8386_v17 = vld [vmem:[#allocation5 + $0x260] ss:$16 sps:$4 sm:$0xff]  }
  0x99   :  { %4855 = vmatprep.subr.bf16.mxu0 %v8312_v28  ;;  %5347 = vmatprep.subr.bf16.mxu1 %v8314_v29  ;;  %v8389_v18 = vld [vmem:[#allocation5 + $0x268] ss:$16 sps:$4 sm:$0xff]   ;;  %v8394_v19 = vld [vmem:[#allocation5 + $0x284] ss:$16 sps:$4 sm:$0xff]   ;;  %v8397_v20 = vld [vmem:[#allocation5 + $0x28c] ss:$16 sps:$4 sm:$0xff]  }
  0x9a   :  { %v8392_v21 = vld [vmem:[#allocation5 + $0x280] ss:$16 sps:$4 sm:$0xff]   ;;  %v8395_v22 = vld [vmem:[#allocation5 + $0x288] ss:$16 sps:$4 sm:$0xff]   ;;  %v8400_v23 = vld [vmem:[#allocation5 + $0x2a4] ss:$16 sps:$4 sm:$0xff]  }
  0x9b   :  { %v8403_v24 = vld [vmem:[#allocation5 + $0x2ac] ss:$16 sps:$4 sm:$0xff]   ;;  %v8398_v25 = vld [vmem:[#allocation5 + $0x2a0] ss:$16 sps:$4 sm:$0xff]   ;;  %v8401_v26 = vld [vmem:[#allocation5 + $0x2a8] ss:$16 sps:$4 sm:$0xff]  }
  0x9c   :  { %4856 = vmatpush1.bf16.msra.mxu0 %v8316_v30  ;;  %5348 = vmatpush1.bf16.msra.mxu1 %v8317_v31  ;;  %v8406_v27 = vld [vmem:[#allocation5 + $0x2c4] ss:$16 sps:$4 sm:$0xff]   ;;  %v8409_v28 = vld [vmem:[#allocation5 + $0x2cc] ss:$16 sps:$4 sm:$0xff]   ;;  %v8404_v31 = vld [vmem:[#allocation5 + $0x2c0] ss:$16 sps:$4 sm:$0xff]  }
  0x9d   :  { %4857 = vmatprep.subr.bf16.mxu0 %v8318_v32  ;;  %5349 = vmatprep.subr.bf16.mxu1 %v8320_v33  ;;  %v9992_v29 = vld [vmem:[#allocation2 + $0x8] sm:$0xff]  ;;  %v8412_v33 = vld [vmem:[#allocation5 + $0x2e4] ss:$16 sps:$4 sm:$0xff]   ;;  %s7145_s13 = sshll.u32 %s9867_s6, 4  ;;  %s7146_s13 = int_to_ptr.vmem [resolvable:$true] %s7145_s13 }
  0x9e   :  { %v7160_v30 = vcombine.high %v9992_v29, %v9992_v29  ;;  %v8407_v32 = vld [vmem:[#allocation5 + $0x2c8] ss:$16 sps:$4 sm:$0xff]   ;;  %v8433_v46 = vld [vmem:[#allocation5 + $0x34c] ss:$16 sps:$4 sm:$0xff]   ;;  %s9824_s14 = scalar_lea.vmem %s7146_s13, 128  ;;  %p9829_p1 = scmp.lt.s32.totalorder %s7146_s13, %s7146_s13 }
  0x9f   :  { %v8431_v48 = vld [vmem:[#allocation5 + $0x348] ss:$16 sps:$4 sm:$0xff]   ;;  %p9825_p0 = scmp.ne.s32.totalorder %s7146_s13, %s9824_s14  ;;  %p9830_p2 = scmp.lt.s32.totalorder %s9824_s14, %s9824_s14 }
  0xa0   :  { %4858 = vmatpush1.bf16.msra.mxu0 %v8322_v34  ;;  %5350 = vmatpush1.bf16.msra.mxu1 %v8323_v35  ;;  %v8415_v34 = vld [vmem:[#allocation5 + $0x2ec] ss:$16 sps:$4 sm:$0xff]   ;;  %v8410_v35 = vld [vmem:[#allocation5 + $0x2e0] ss:$16 sps:$4 sm:$0xff]  }
  0xa1   :  { %4859 = vmatprep.subr.bf16.mxu0 %v8324_v36  ;;  %5351 = vmatprep.subr.bf16.mxu1 %v8326_v37  ;;  %v8413_v36 = vld [vmem:[#allocation5 + $0x2e8] ss:$16 sps:$4 sm:$0xff]   ;;  %v8418_v37 = vld [vmem:[#allocation5 + $0x304] ss:$16 sps:$4 sm:$0xff]   ;;  %p9831_p3 = por %p9830_p2, %p9829_p1 }
  0xa3   :  { %p9832_p4 = pnand %p9831_p3, %p9825_p0 }
  0xa4   :  { %4860 = vmatpush1.bf16.msra.mxu0 %v8328_v38  ;;  %5352 = vmatpush1.bf16.msra.mxu1 %v8329_v39  ;;  %v8421_v38 = vld [vmem:[#allocation5 + $0x30c] ss:$16 sps:$4 sm:$0xff]   ;;  %v8416_v39 = vld [vmem:[#allocation5 + $0x300] ss:$16 sps:$4 sm:$0xff]  }
  0xa5   :  { %4861 = vmatprep.subr.bf16.mxu0 %v8330_v40  ;;  %5353 = vmatprep.subr.bf16.mxu1 %v8332_v41  ;;  %v8419_v40 = vld [vmem:[#allocation5 + $0x308] ss:$16 sps:$4 sm:$0xff]   ;;  %v8424_v41 = vld [vmem:[#allocation5 + $0x324] ss:$16 sps:$4 sm:$0xff]  }
  0xa8   :  { %4862 = vmatpush1.bf16.msra.mxu0 %v8334_v42  ;;  %5354 = vmatpush1.bf16.msra.mxu1 %v8335_v43  ;;  %v8427_v42 = vld [vmem:[#allocation5 + $0x32c] ss:$16 sps:$4 sm:$0xff]   ;;  %v8422_v43 = vld [vmem:[#allocation5 + $0x320] ss:$16 sps:$4 sm:$0xff]  }
  0xa9   :  { %4863 = vmatprep.subr.bf16.mxu0 %v8336_v44  ;;  %5355 = vmatprep.subr.bf16.mxu1 %v8338_v45  ;;  %v8425_v44 = vld [vmem:[#allocation5 + $0x328] ss:$16 sps:$4 sm:$0xff]   ;;  %v8430_v45 = vld [vmem:[#allocation5 + $0x344] ss:$16 sps:$4 sm:$0xff]  }
  0xac   :  { %4864 = vmatpush1.bf16.msra.mxu0 %v8340_v47  ;;  %5356 = vmatpush1.bf16.msra.mxu1 %v8341_v49  ;;  %v8428_v47 = vld [vmem:[#allocation5 + $0x340] ss:$16 sps:$4 sm:$0xff]   ;;  %v8436_v49 = vld [vmem:[#allocation5 + $0x364] ss:$16 sps:$4 sm:$0xff]  }
  0xad   :  { %4865 = vmatprep.subr.bf16.mxu0 %v8342_v50  ;;  %5357 = vmatprep.subr.bf16.mxu1 %v8344_v51  ;;  %v8439_v50 = vld [vmem:[#allocation5 + $0x36c] ss:$16 sps:$4 sm:$0xff]   ;;  %v8434_v51 = vld [vmem:[#allocation5 + $0x360] ss:$16 sps:$4 sm:$0xff]  }
  0xb0   :  { %4866 = vmatpush1.bf16.msra.mxu0 %v8346_v52  ;;  %5358 = vmatpush1.bf16.msra.mxu1 %v8347_v53  ;;  %v8437_v52 = vld [vmem:[#allocation5 + $0x368] ss:$16 sps:$4 sm:$0xff]   ;;  %v8442_v53 = vld [vmem:[#allocation5 + $0x384] ss:$16 sps:$4 sm:$0xff]  }
  0xb1   :  { %4867 = vmatprep.subr.bf16.mxu0 %v8348_v54  ;;  %5359 = vmatprep.subr.bf16.mxu1 %v8350_v55  ;;  %v8445_v54 = vld [vmem:[#allocation5 + $0x38c] ss:$16 sps:$4 sm:$0xff]   ;;  %v8440_v55 = vld [vmem:[#allocation5 + $0x380] ss:$16 sps:$4 sm:$0xff]  }
  0xb4   :  { %4868 = vmatpush1.bf16.msra.mxu0 %v8352_v56  ;;  %5360 = vmatpush1.bf16.msra.mxu1 %v8353_v57  ;;  %v8443_v56 = vld [vmem:[#allocation5 + $0x388] ss:$16 sps:$4 sm:$0xff]   ;;  %v8448_v57 = vld [vmem:[#allocation5 + $0x3a4] ss:$16 sps:$4 sm:$0xff]  }
  0xb5   :  { %4869 = vmatprep.subr.bf16.mxu0 %v8354_v58  ;;  %5361 = vmatprep.subr.bf16.mxu1 %v8356_v59  ;;  %v8451_v58 = vld [vmem:[#allocation5 + $0x3ac] ss:$16 sps:$4 sm:$0xff]   ;;  %v8446_v59 = vld [vmem:[#allocation5 + $0x3a0] ss:$16 sps:$4 sm:$0xff]  }
  0xb8   :  { %4870 = vmatpush1.bf16.msra.mxu0 %v8358_v60  ;;  %5362 = vmatpush1.bf16.msra.mxu1 %v8359_v61  ;;  %v8449_v60 = vld [vmem:[#allocation5 + $0x3a8] ss:$16 sps:$4 sm:$0xff]   ;;  %v8454_v61 = vld [vmem:[#allocation5 + $0x3c4] ss:$16 sps:$4 sm:$0xff]  }
  0xb9   :  { %4871 = vmatprep.subr.bf16.mxu0 %v8360_v62  ;;  %5363 = vmatprep.subr.bf16.mxu1 %v8362_v63  ;;  %v8457_v62 = vld [vmem:[#allocation5 + $0x3cc] ss:$16 sps:$4 sm:$0xff]   ;;  %v8452_v63 = vld [vmem:[#allocation5 + $0x3c0] ss:$16 sps:$4 sm:$0xff]  }
  0xbc   :  { %4872 = vmatpush1.bf16.msra.mxu0 %v8364_v0  ;;  %5364 = vmatpush1.bf16.msra.mxu1 %v8365_v1  ;;  %v8455_v0 = vld [vmem:[#allocation5 + $0x3c8] ss:$16 sps:$4 sm:$0xff]   ;;  %v8460_v1 = vld [vmem:[#allocation5 + $0x3e4] ss:$16 sps:$4 sm:$0xff]  }
  0xbd   :  { %4882 = vmatprep.subr.bf16.mxu0 %v8370_v2  ;;  %5374 = vmatprep.subr.bf16.mxu1 %v8373_v3  ;;  %v8463_v2 = vld [vmem:[#allocation5 + $0x3ec] ss:$16 sps:$4 sm:$0xff]   ;;  %v8458_v3 = vld [vmem:[#allocation5 + $0x3e0] ss:$16 sps:$4 sm:$0xff]  }
  0xbf   :  { %4874 = vmatmul.mubr.bf16.vlgmr.msra.gmra.mrb[0].mxu0 %v7157_v4  ;;  %5366 = vmatmul.mubr.bf16.vlgmr.msra.gmra.mrb[0].mxu1 %v7157_v4  ;;  %v8461_v4 = vld [vmem:[#allocation5 + $0x3e8] ss:$16 sps:$4 sm:$0xff]  }
  0xc0   :  { %4883 = vmatpush1.bf16.msra.mxu0 %v8368_v5  ;;  %5375 = vmatpush1.bf16.msra.mxu1 %v8371_v6  ;;  %v8468_v5 = vld [vmem:[#allocation5 + $0x404] ss:$16 sps:$4 sm:$0xff]   ;;  %v8471_v6 = vld [vmem:[#allocation5 + $0x40c] ss:$16 sps:$4 sm:$0xff]  }
  0xc1   :  { %4884 = vmatprep.subr.bf16.mxu0 %v8376_v7  ;;  %5376 = vmatprep.subr.bf16.mxu1 %v8379_v8  ;;  %v7159_v7 = vcombine.low %v9992_v29, %v9992_v29  ;;  %v8466_v8 = vld [vmem:[#allocation5 + $0x400] ss:$16 sps:$4 sm:$0xff]   ;;  %v8501_v29 = vld [vmem:[#allocation5 + $0x4ac] ss:$16 sps:$4 sm:$0xff]  }
  0xc2   :  { %4914 = vmatprep.mubr.bf16.mxu0 %v7160_v30  ;;  %5406 = vmatprep.mubr.bf16.mxu1 %v7160_v30  ;;  %v8496_v30 = vld [vmem:[#allocation5 + $0x4a0] ss:$16 sps:$4 sm:$0xff]  }
  0xc4   :  { %4885 = vmatpush1.bf16.msra.mxu0 %v8374_v9  ;;  %5377 = vmatpush1.bf16.msra.mxu1 %v8377_v10  ;;  %v8469_v9 = vld [vmem:[#allocation5 + $0x408] ss:$16 sps:$4 sm:$0xff]   ;;  %v8474_v10 = vld [vmem:[#allocation5 + $0x424] ss:$16 sps:$4 sm:$0xff]  }
  0xc5   :  { %4886 = vmatprep.subr.bf16.mxu0 %v8382_v11  ;;  %5378 = vmatprep.subr.bf16.mxu1 %v8385_v12  ;;  %v9998_v11 = vld [vmem:[#allocation2 + $0x10] sm:$0xff]  ;;  %v8477_v12 = vld [vmem:[#allocation5 + $0x42c] ss:$16 sps:$4 sm:$0xff]  }
  0xc8   :  { %4887 = vmatpush1.bf16.msra.mxu0 %v8380_v13  ;;  %5379 = vmatpush1.bf16.msra.mxu1 %v8383_v14  ;;  %v7162_v13 = vcombine.high %v9998_v11, %v9998_v11  ;;  %v8472_v14 = vld [vmem:[#allocation5 + $0x420] ss:$16 sps:$4 sm:$0xff]  }
  0xc9   :  { %4888 = vmatprep.subr.bf16.mxu0 %v8388_v15  ;;  %5380 = vmatprep.subr.bf16.mxu1 %v8391_v16  ;;  %v8475_v15 = vld [vmem:[#allocation5 + $0x428] ss:$16 sps:$4 sm:$0xff]   ;;  %v8480_v16 = vld [vmem:[#allocation5 + $0x444] ss:$16 sps:$4 sm:$0xff]  }
  0xcc   :  { %4889 = vmatpush1.bf16.msra.mxu0 %v8386_v17  ;;  %5381 = vmatpush1.bf16.msra.mxu1 %v8389_v18  ;;  %v8483_v17 = vld [vmem:[#allocation5 + $0x44c] ss:$16 sps:$4 sm:$0xff]   ;;  %v8478_v18 = vld [vmem:[#allocation5 + $0x440] ss:$16 sps:$4 sm:$0xff]  }
  0xcd   :  { %4890 = vmatprep.subr.bf16.mxu0 %v8394_v19  ;;  %5382 = vmatprep.subr.bf16.mxu1 %v8397_v20  ;;  %v8481_v19 = vld [vmem:[#allocation5 + $0x448] ss:$16 sps:$4 sm:$0xff]   ;;  %v8486_v20 = vld [vmem:[#allocation5 + $0x464] ss:$16 sps:$4 sm:$0xff]  }
  0xd0   :  { %4891 = vmatpush1.bf16.msra.mxu0 %v8392_v21  ;;  %5383 = vmatpush1.bf16.msra.mxu1 %v8395_v22  ;;  %v8489_v21 = vld [vmem:[#allocation5 + $0x46c] ss:$16 sps:$4 sm:$0xff]   ;;  %v8484_v22 = vld [vmem:[#allocation5 + $0x460] ss:$16 sps:$4 sm:$0xff]  }
  0xd1   :  { %4892 = vmatprep.subr.bf16.mxu0 %v8400_v23  ;;  %5384 = vmatprep.subr.bf16.mxu1 %v8403_v24  ;;  %v8487_v23 = vld [vmem:[#allocation5 + $0x468] ss:$16 sps:$4 sm:$0xff]   ;;  %v8492_v24 = vld [vmem:[#allocation5 + $0x484] ss:$16 sps:$4 sm:$0xff]  }
  0xd4   :  { %4893 = vmatpush1.bf16.msra.mxu0 %v8398_v25  ;;  %5385 = vmatpush1.bf16.msra.mxu1 %v8401_v26  ;;  %v8495_v25 = vld [vmem:[#allocation5 + $0x48c] ss:$16 sps:$4 sm:$0xff]   ;;  %v8490_v26 = vld [vmem:[#allocation5 + $0x480] ss:$16 sps:$4 sm:$0xff]  }
  0xd5   :  { %4894 = vmatprep.subr.bf16.mxu0 %v8406_v27  ;;  %5386 = vmatprep.subr.bf16.mxu1 %v8409_v28  ;;  %v8493_v27 = vld [vmem:[#allocation5 + $0x488] ss:$16 sps:$4 sm:$0xff]   ;;  %v8498_v28 = vld [vmem:[#allocation5 + $0x4a4] ss:$16 sps:$4 sm:$0xff]  }
  0xd8   :  { %4895 = vmatpush1.bf16.msra.mxu0 %v8404_v31  ;;  %5387 = vmatpush1.bf16.msra.mxu1 %v8407_v32  ;;  %v8499_v31 = vld [vmem:[#allocation5 + $0x4a8] ss:$16 sps:$4 sm:$0xff]   ;;  %v8504_v32 = vld [vmem:[#allocation5 + $0x4c4] ss:$16 sps:$4 sm:$0xff]  }
  0xd9   :  { %4896 = vmatprep.subr.bf16.mxu0 %v8412_v33  ;;  %5388 = vmatprep.subr.bf16.mxu1 %v8415_v34  ;;  %v8507_v33 = vld [vmem:[#allocation5 + $0x4cc] ss:$16 sps:$4 sm:$0xff]   ;;  %v8502_v34 = vld [vmem:[#allocation5 + $0x4c0] ss:$16 sps:$4 sm:$0xff]  }
  0xdc   :  { %4897 = vmatpush1.bf16.msra.mxu0 %v8410_v35  ;;  %5389 = vmatpush1.bf16.msra.mxu1 %v8413_v36  ;;  %v8505_v35 = vld [vmem:[#allocation5 + $0x4c8] ss:$16 sps:$4 sm:$0xff]   ;;  %v8510_v36 = vld [vmem:[#allocation5 + $0x4e4] ss:$16 sps:$4 sm:$0xff]  }
  0xdd   :  { %4898 = vmatprep.subr.bf16.mxu0 %v8418_v37  ;;  %5390 = vmatprep.subr.bf16.mxu1 %v8421_v38  ;;  %v8513_v37 = vld [vmem:[#allocation5 + $0x4ec] ss:$16 sps:$4 sm:$0xff]   ;;  %v8508_v38 = vld [vmem:[#allocation5 + $0x4e0] ss:$16 sps:$4 sm:$0xff]  }
  0xe0   :  { %4899 = vmatpush1.bf16.msra.mxu0 %v8416_v39  ;;  %5391 = vmatpush1.bf16.msra.mxu1 %v8419_v40  ;;  %v8511_v39 = vld [vmem:[#allocation5 + $0x4e8] ss:$16 sps:$4 sm:$0xff]   ;;  %v8516_v40 = vld [vmem:[#allocation5 + $0x504] ss:$16 sps:$4 sm:$0xff]  }
  0xe1   :  { %4900 = vmatprep.subr.bf16.mxu0 %v8424_v41  ;;  %5392 = vmatprep.subr.bf16.mxu1 %v8427_v42  ;;  %v8519_v41 = vld [vmem:[#allocation5 + $0x50c] ss:$16 sps:$4 sm:$0xff]   ;;  %v8514_v42 = vld [vmem:[#allocation5 + $0x500] ss:$16 sps:$4 sm:$0xff]  }
  0xe4   :  { %4901 = vmatpush1.bf16.msra.mxu0 %v8422_v43  ;;  %5393 = vmatpush1.bf16.msra.mxu1 %v8425_v44  ;;  %v8517_v43 = vld [vmem:[#allocation5 + $0x508] ss:$16 sps:$4 sm:$0xff]   ;;  %v8522_v44 = vld [vmem:[#allocation5 + $0x524] ss:$16 sps:$4 sm:$0xff]  }
  0xe5   :  { %4902 = vmatprep.subr.bf16.mxu0 %v8430_v45  ;;  %5394 = vmatprep.subr.bf16.mxu1 %v8433_v46  ;;  %v8525_v45 = vld [vmem:[#allocation5 + $0x52c] ss:$16 sps:$4 sm:$0xff]   ;;  %v8520_v46 = vld [vmem:[#allocation5 + $0x520] ss:$16 sps:$4 sm:$0xff]  }
  0xe8   :  { %4903 = vmatpush1.bf16.msra.mxu0 %v8428_v47  ;;  %5395 = vmatpush1.bf16.msra.mxu1 %v8431_v48  ;;  %v8523_v47 = vld [vmem:[#allocation5 + $0x528] ss:$16 sps:$4 sm:$0xff]   ;;  %v8528_v48 = vld [vmem:[#allocation5 + $0x544] ss:$16 sps:$4 sm:$0xff]  }
  0xe9   :  { %4904 = vmatprep.subr.bf16.mxu0 %v8436_v49  ;;  %5396 = vmatprep.subr.bf16.mxu1 %v8439_v50  ;;  %v8531_v49 = vld [vmem:[#allocation5 + $0x54c] ss:$16 sps:$4 sm:$0xff]   ;;  %v8526_v50 = vld [vmem:[#allocation5 + $0x540] ss:$16 sps:$4 sm:$0xff]  }
  0xec   :  { %4905 = vmatpush1.bf16.msra.mxu0 %v8434_v51  ;;  %5397 = vmatpush1.bf16.msra.mxu1 %v8437_v52  ;;  %v8529_v51 = vld [vmem:[#allocation5 + $0x548] ss:$16 sps:$4 sm:$0xff]   ;;  %v8534_v52 = vld [vmem:[#allocation5 + $0x564] ss:$16 sps:$4 sm:$0xff]  }
  0xed   :  { %4906 = vmatprep.subr.bf16.mxu0 %v8442_v53  ;;  %5398 = vmatprep.subr.bf16.mxu1 %v8445_v54  ;;  %v8537_v53 = vld [vmem:[#allocation5 + $0x56c] ss:$16 sps:$4 sm:$0xff]   ;;  %v8532_v54 = vld [vmem:[#allocation5 + $0x560] ss:$16 sps:$4 sm:$0xff]  }
  0xf0   :  { %4907 = vmatpush1.bf16.msra.mxu0 %v8440_v55  ;;  %5399 = vmatpush1.bf16.msra.mxu1 %v8443_v56  ;;  %v8535_v55 = vld [vmem:[#allocation5 + $0x568] ss:$16 sps:$4 sm:$0xff]   ;;  %v8540_v56 = vld [vmem:[#allocation5 + $0x584] ss:$16 sps:$4 sm:$0xff]  }
  0xf1   :  { %4908 = vmatprep.subr.bf16.mxu0 %v8448_v57  ;;  %5400 = vmatprep.subr.bf16.mxu1 %v8451_v58  ;;  %v8543_v57 = vld [vmem:[#allocation5 + $0x58c] ss:$16 sps:$4 sm:$0xff]   ;;  %v8538_v58 = vld [vmem:[#allocation5 + $0x580] ss:$16 sps:$4 sm:$0xff]  }
  0xf4   :  { %4909 = vmatpush1.bf16.msra.mxu0 %v8446_v59  ;;  %5401 = vmatpush1.bf16.msra.mxu1 %v8449_v60  ;;  %v8541_v59 = vld [vmem:[#allocation5 + $0x588] ss:$16 sps:$4 sm:$0xff]   ;;  %v8546_v60 = vld [vmem:[#allocation5 + $0x5a4] ss:$16 sps:$4 sm:$0xff]  }
  0xf5   :  { %4910 = vmatprep.subr.bf16.mxu0 %v8454_v61  ;;  %5402 = vmatprep.subr.bf16.mxu1 %v8457_v62  ;;  %v8549_v61 = vld [vmem:[#allocation5 + $0x5ac] ss:$16 sps:$4 sm:$0xff]   ;;  %v8544_v62 = vld [vmem:[#allocation5 + $0x5a0] ss:$16 sps:$4 sm:$0xff]  }
  0xf8   :  { %4911 = vmatpush1.bf16.msra.mxu0 %v8452_v63  ;;  %5403 = vmatpush1.bf16.msra.mxu1 %v8455_v0  ;;  %v8547_v63 = vld [vmem:[#allocation5 + $0x5a8] ss:$16 sps:$4 sm:$0xff]   ;;  %v8552_v0 = vld [vmem:[#allocation5 + $0x5c4] ss:$16 sps:$4 sm:$0xff]  }
  0xf9   :  { %4912 = vmatprep.subr.bf16.mxu0 %v8460_v1  ;;  %5404 = vmatprep.subr.bf16.mxu1 %v8463_v2  ;;  %v8555_v1 = vld [vmem:[#allocation5 + $0x5cc] ss:$16 sps:$4 sm:$0xff]   ;;  %v8550_v2 = vld [vmem:[#allocation5 + $0x5c0] ss:$16 sps:$4 sm:$0xff]  }
  0xfc   :  { %4913 = vmatpush1.bf16.msra.mxu0 %v8458_v3  ;;  %5405 = vmatpush1.bf16.msra.mxu1 %v8461_v4  ;;  %v8553_v3 = vld [vmem:[#allocation5 + $0x5c8] ss:$16 sps:$4 sm:$0xff]   ;;  %v8558_v4 = vld [vmem:[#allocation5 + $0x5e4] ss:$16 sps:$4 sm:$0xff]  }
  0xfd   :  { %4923 = vmatprep.subr.bf16.mxu0 %v8468_v5  ;;  %5415 = vmatprep.subr.bf16.mxu1 %v8471_v6  ;;  %v8561_v5 = vld [vmem:[#allocation5 + $0x5ec] ss:$16 sps:$4 sm:$0xff]   ;;  %v8556_v6 = vld [vmem:[#allocation5 + $0x5e0] ss:$16 sps:$4 sm:$0xff]  }
  0xff   :  { %4915 = vmatmul.mubr.bf16.vlgmr.msra.gmra.mrb[0].mxu0 %v7159_v7  ;;  %5407 = vmatmul.mubr.bf16.vlgmr.msra.gmra.mrb[0].mxu1 %v7159_v7  ;;  %v8559_v7 = vld [vmem:[#allocation5 + $0x5e8] ss:$16 sps:$4 sm:$0xff]  }
 0x100   :  { %4924 = vmatpush1.bf16.msra.mxu0 %v8466_v8  ;;  %5416 = vmatpush1.bf16.msra.mxu1 %v8469_v9  ;;  %v8566_v8 = vld [vmem:[#allocation5 + $0x604] ss:$16 sps:$4 sm:$0xff]   ;;  %v8569_v9 = vld [vmem:[#allocation5 + $0x60c] ss:$16 sps:$4 sm:$0xff]  }
 0x101   :  { %4925 = vmatprep.subr.bf16.mxu0 %v8474_v10  ;;  %5417 = vmatprep.subr.bf16.mxu1 %v8477_v12  ;;  %v8564_v10 = vld [vmem:[#allocation5 + $0x600] ss:$16 sps:$4 sm:$0xff]   ;;  %v7161_v12 = vcombine.low %v9998_v11, %v9998_v11  ;;  %v8581_v11 = vld [vmem:[#allocation5 + $0x64c] ss:$16 sps:$4 sm:$0xff]  }
 0x102   :  { %4955 = vmatprep.mubr.bf16.mxu0 %v7162_v13  ;;  %5447 = vmatprep.mubr.bf16.mxu1 %v7162_v13  ;;  %v8567_v13 = vld [vmem:[#allocation5 + $0x608] ss:$16 sps:$4 sm:$0xff]  }
 0x104   :  { %4926 = vmatpush1.bf16.msra.mxu0 %v8472_v14  ;;  %5418 = vmatpush1.bf16.msra.mxu1 %v8475_v15  ;;  %v10004_v14 = vld [vmem:[#allocation2 + $0x18] sm:$0xff]  ;;  %v8572_v15 = vld [vmem:[#allocation5 + $0x624] ss:$16 sps:$4 sm:$0xff]  }
 0x105   :  { %4927 = vmatprep.subr.bf16.mxu0 %v8480_v16  ;;  %5419 = vmatprep.subr.bf16.mxu1 %v8483_v17  ;;  %v8575_v16 = vld [vmem:[#allocation5 + $0x62c] ss:$16 sps:$4 sm:$0xff]   ;;  %v7164_v17 = vcombine.high %v10004_v14, %v10004_v14 }
 0x108   :  { %4928 = vmatpush1.bf16.msra.mxu0 %v8478_v18  ;;  %5420 = vmatpush1.bf16.msra.mxu1 %v8481_v19  ;;  %v8570_v18 = vld [vmem:[#allocation5 + $0x620] ss:$16 sps:$4 sm:$0xff]   ;;  %v8573_v19 = vld [vmem:[#allocation5 + $0x628] ss:$16 sps:$4 sm:$0xff]  }
 0x109   :  { %4929 = vmatprep.subr.bf16.mxu0 %v8486_v20  ;;  %5421 = vmatprep.subr.bf16.mxu1 %v8489_v21  ;;  %v8578_v20 = vld [vmem:[#allocation5 + $0x644] ss:$16 sps:$4 sm:$0xff]   ;;  %v8576_v21 = vld [vmem:[#allocation5 + $0x640] ss:$16 sps:$4 sm:$0xff]  }
 0x10c   :  { %4930 = vmatpush1.bf16.msra.mxu0 %v8484_v22  ;;  %5422 = vmatpush1.bf16.msra.mxu1 %v8487_v23  ;;  %v8579_v22 = vld [vmem:[#allocation5 + $0x648] ss:$16 sps:$4 sm:$0xff]   ;;  %v8584_v23 = vld [vmem:[#allocation5 + $0x664] ss:$16 sps:$4 sm:$0xff]  }
 0x10d   :  { %4931 = vmatprep.subr.bf16.mxu0 %v8492_v24  ;;  %5423 = vmatprep.subr.bf16.mxu1 %v8495_v25  ;;  %v8587_v24 = vld [vmem:[#allocation5 + $0x66c] ss:$16 sps:$4 sm:$0xff]   ;;  %v8582_v25 = vld [vmem:[#allocation5 + $0x660] ss:$16 sps:$4 sm:$0xff]  }
 0x110   :  { %4932 = vmatpush1.bf16.msra.mxu0 %v8490_v26  ;;  %5424 = vmatpush1.bf16.msra.mxu1 %v8493_v27  ;;  %v8585_v26 = vld [vmem:[#allocation5 + $0x668] ss:$16 sps:$4 sm:$0xff]   ;;  %v8590_v27 = vld [vmem:[#allocation5 + $0x684] ss:$16 sps:$4 sm:$0xff]  }
 0x111   :  { %4933 = vmatprep.subr.bf16.mxu0 %v8498_v28  ;;  %5425 = vmatprep.subr.bf16.mxu1 %v8501_v29  ;;  %v8593_v28 = vld [vmem:[#allocation5 + $0x68c] ss:$16 sps:$4 sm:$0xff]   ;;  %v8588_v29 = vld [vmem:[#allocation5 + $0x680] ss:$16 sps:$4 sm:$0xff]  }
 0x114   :  { %4934 = vmatpush1.bf16.msra.mxu0 %v8496_v30  ;;  %5426 = vmatpush1.bf16.msra.mxu1 %v8499_v31  ;;  %v8591_v30 = vld [vmem:[#allocation5 + $0x688] ss:$16 sps:$4 sm:$0xff]   ;;  %v8596_v31 = vld [vmem:[#allocation5 + $0x6a4] ss:$16 sps:$4 sm:$0xff]  }
 0x115   :  { %4935 = vmatprep.subr.bf16.mxu0 %v8504_v32  ;;  %5427 = vmatprep.subr.bf16.mxu1 %v8507_v33  ;;  %v8599_v32 = vld [vmem:[#allocation5 + $0x6ac] ss:$16 sps:$4 sm:$0xff]   ;;  %v8594_v33 = vld [vmem:[#allocation5 + $0x6a0] ss:$16 sps:$4 sm:$0xff]  }
 0x118   :  { %4936 = vmatpush1.bf16.msra.mxu0 %v8502_v34  ;;  %5428 = vmatpush1.bf16.msra.mxu1 %v8505_v35  ;;  %v8597_v34 = vld [vmem:[#allocation5 + $0x6a8] ss:$16 sps:$4 sm:$0xff]   ;;  %v8602_v35 = vld [vmem:[#allocation5 + $0x6c4] ss:$16 sps:$4 sm:$0xff]  }
 0x119   :  { %4937 = vmatprep.subr.bf16.mxu0 %v8510_v36  ;;  %5429 = vmatprep.subr.bf16.mxu1 %v8513_v37  ;;  %v8605_v36 = vld [vmem:[#allocation5 + $0x6cc] ss:$16 sps:$4 sm:$0xff]   ;;  %v8600_v37 = vld [vmem:[#allocation5 + $0x6c0] ss:$16 sps:$4 sm:$0xff]  }
 0x11c   :  { %4938 = vmatpush1.bf16.msra.mxu0 %v8508_v38  ;;  %5430 = vmatpush1.bf16.msra.mxu1 %v8511_v39  ;;  %v8603_v38 = vld [vmem:[#allocation5 + $0x6c8] ss:$16 sps:$4 sm:$0xff]   ;;  %v8608_v39 = vld [vmem:[#allocation5 + $0x6e4] ss:$16 sps:$4 sm:$0xff]  }
 0x11d   :  { %4939 = vmatprep.subr.bf16.mxu0 %v8516_v40  ;;  %5431 = vmatprep.subr.bf16.mxu1 %v8519_v41  ;;  %v8611_v40 = vld [vmem:[#allocation5 + $0x6ec] ss:$16 sps:$4 sm:$0xff]   ;;  %v8606_v41 = vld [vmem:[#allocation5 + $0x6e0] ss:$16 sps:$4 sm:$0xff]  }
 0x120   :  { %4940 = vmatpush1.bf16.msra.mxu0 %v8514_v42  ;;  %5432 = vmatpush1.bf16.msra.mxu1 %v8517_v43  ;;  %v8609_v42 = vld [vmem:[#allocation5 + $0x6e8] ss:$16 sps:$4 sm:$0xff]   ;;  %v8614_v43 = vld [vmem:[#allocation5 + $0x704] ss:$16 sps:$4 sm:$0xff]  }
 0x121   :  { %4941 = vmatprep.subr.bf16.mxu0 %v8522_v44  ;;  %5433 = vmatprep.subr.bf16.mxu1 %v8525_v45  ;;  %v8617_v44 = vld [vmem:[#allocation5 + $0x70c] ss:$16 sps:$4 sm:$0xff]   ;;  %v8612_v45 = vld [vmem:[#allocation5 + $0x700] ss:$16 sps:$4 sm:$0xff]  }
 0x124   :  { %4942 = vmatpush1.bf16.msra.mxu0 %v8520_v46  ;;  %5434 = vmatpush1.bf16.msra.mxu1 %v8523_v47  ;;  %v8615_v46 = vld [vmem:[#allocation5 + $0x708] ss:$16 sps:$4 sm:$0xff]   ;;  %v8620_v47 = vld [vmem:[#allocation5 + $0x724] ss:$16 sps:$4 sm:$0xff]  }
 0x125   :  { %4943 = vmatprep.subr.bf16.mxu0 %v8528_v48  ;;  %5435 = vmatprep.subr.bf16.mxu1 %v8531_v49  ;;  %v8623_v48 = vld [vmem:[#allocation5 + $0x72c] ss:$16 sps:$4 sm:$0xff]   ;;  %v8618_v49 = vld [vmem:[#allocation5 + $0x720] ss:$16 sps:$4 sm:$0xff]  }
 0x128   :  { %4944 = vmatpush1.bf16.msra.mxu0 %v8526_v50  ;;  %5436 = vmatpush1.bf16.msra.mxu1 %v8529_v51  ;;  %v8621_v50 = vld [vmem:[#allocation5 + $0x728] ss:$16 sps:$4 sm:$0xff]   ;;  %v8626_v51 = vld [vmem:[#allocation5 + $0x744] ss:$16 sps:$4 sm:$0xff]  }
 0x129   :  { %4945 = vmatprep.subr.bf16.mxu0 %v8534_v52  ;;  %5437 = vmatprep.subr.bf16.mxu1 %v8537_v53  ;;  %v8629_v52 = vld [vmem:[#allocation5 + $0x74c] ss:$16 sps:$4 sm:$0xff]   ;;  %v8624_v53 = vld [vmem:[#allocation5 + $0x740] ss:$16 sps:$4 sm:$0xff]  }
 0x12c   :  { %4946 = vmatpush1.bf16.msra.mxu0 %v8532_v54  ;;  %5438 = vmatpush1.bf16.msra.mxu1 %v8535_v55  ;;  %v8627_v54 = vld [vmem:[#allocation5 + $0x748] ss:$16 sps:$4 sm:$0xff]   ;;  %v8632_v55 = vld [vmem:[#allocation5 + $0x764] ss:$16 sps:$4 sm:$0xff]  }
 0x12d   :  { %4947 = vmatprep.subr.bf16.mxu0 %v8540_v56  ;;  %5439 = vmatprep.subr.bf16.mxu1 %v8543_v57  ;;  %v8635_v56 = vld [vmem:[#allocation5 + $0x76c] ss:$16 sps:$4 sm:$0xff]   ;;  %v8630_v57 = vld [vmem:[#allocation5 + $0x760] ss:$16 sps:$4 sm:$0xff]  }
 0x130   :  { %4948 = vmatpush1.bf16.msra.mxu0 %v8538_v58  ;;  %5440 = vmatpush1.bf16.msra.mxu1 %v8541_v59  ;;  %v8633_v58 = vld [vmem:[#allocation5 + $0x768] ss:$16 sps:$4 sm:$0xff]   ;;  %v8638_v59 = vld [vmem:[#allocation5 + $0x784] ss:$16 sps:$4 sm:$0xff]  }
 0x131   :  { %4949 = vmatprep.subr.bf16.mxu0 %v8546_v60  ;;  %5441 = vmatprep.subr.bf16.mxu1 %v8549_v61  ;;  %v8641_v60 = vld [vmem:[#allocation5 + $0x78c] ss:$16 sps:$4 sm:$0xff]   ;;  %v8636_v61 = vld [vmem:[#allocation5 + $0x780] ss:$16 sps:$4 sm:$0xff]  }
 0x134   :  { %4950 = vmatpush1.bf16.msra.mxu0 %v8544_v62  ;;  %5442 = vmatpush1.bf16.msra.mxu1 %v8547_v63  ;;  %v8639_v62 = vld [vmem:[#allocation5 + $0x788] ss:$16 sps:$4 sm:$0xff]   ;;  %v8644_v63 = vld [vmem:[#allocation5 + $0x7a4] ss:$16 sps:$4 sm:$0xff]  }
 0x135   :  { %4951 = vmatprep.subr.bf16.mxu0 %v8552_v0  ;;  %5443 = vmatprep.subr.bf16.mxu1 %v8555_v1  ;;  %v8647_v0 = vld [vmem:[#allocation5 + $0x7ac] ss:$16 sps:$4 sm:$0xff]   ;;  %v8642_v1 = vld [vmem:[#allocation5 + $0x7a0] ss:$16 sps:$4 sm:$0xff]  }
 0x138   :  { %4952 = vmatpush1.bf16.msra.mxu0 %v8550_v2  ;;  %5444 = vmatpush1.bf16.msra.mxu1 %v8553_v3  ;;  %v8645_v2 = vld [vmem:[#allocation5 + $0x7a8] ss:$16 sps:$4 sm:$0xff]   ;;  %v8650_v3 = vld [vmem:[#allocation5 + $0x7c4] ss:$16 sps:$4 sm:$0xff]  }
 0x139   :  { %4953 = vmatprep.subr.bf16.mxu0 %v8558_v4  ;;  %5445 = vmatprep.subr.bf16.mxu1 %v8561_v5  ;;  %v8653_v4 = vld [vmem:[#allocation5 + $0x7cc] ss:$16 sps:$4 sm:$0xff]   ;;  %v8648_v5 = vld [vmem:[#allocation5 + $0x7c0] ss:$16 sps:$4 sm:$0xff]  }
 0x13c   :  { %4954 = vmatpush1.bf16.msra.mxu0 %v8556_v6  ;;  %5446 = vmatpush1.bf16.msra.mxu1 %v8559_v7  ;;  %v8651_v6 = vld [vmem:[#allocation5 + $0x7c8] ss:$16 sps:$4 sm:$0xff]   ;;  %v8656_v7 = vld [vmem:[#allocation5 + $0x7e4] ss:$16 sps:$4 sm:$0xff]  }
 0x13d   :  { %4964 = vmatprep.subr.bf16.mxu0 %v8566_v8  ;;  %5456 = vmatprep.subr.bf16.mxu1 %v8569_v9  ;;  %v8659_v8 = vld [vmem:[#allocation5 + $0x7ec] ss:$16 sps:$4 sm:$0xff]   ;;  %v8654_v9 = vld [vmem:[#allocation5 + $0x7e0] ss:$16 sps:$4 sm:$0xff]  }
 0x13f   :  { %4956 = vmatmul.mubr.bf16.vlgmr.msra.gmra.mrb[0].mxu0 %v7161_v12  ;;  %5448 = vmatmul.mubr.bf16.vlgmr.msra.gmra.mrb[0].mxu1 %v7161_v12  ;;  %v8664_v12 = vld [vmem:[#allocation5 + $0x804] ss:$16 sps:$4 sm:$0xff]  }
 0x140   :  { %4965 = vmatpush1.bf16.msra.mxu0 %v8564_v10  ;;  %5457 = vmatpush1.bf16.msra.mxu1 %v8567_v13  ;;  %v8657_v10 = vld [vmem:[#allocation5 + $0x7e8] ss:$16 sps:$4 sm:$0xff]   ;;  %v8667_v13 = vld [vmem:[#allocation5 + $0x80c] ss:$16 sps:$4 sm:$0xff]  }
 0x141   :  { %4966 = vmatprep.subr.bf16.mxu0 %v8572_v15  ;;  %5458 = vmatprep.subr.bf16.mxu1 %v8575_v16  ;;  %v8662_v15 = vld [vmem:[#allocation5 + $0x800] ss:$16 sps:$4 sm:$0xff]   ;;  %v7163_v16 = vcombine.low %v10004_v14, %v10004_v14  ;;  %v8676_v14 = vld [vmem:[#allocation5 + $0x844] ss:$16 sps:$4 sm:$0xff]  }
 0x142   :  { %4996 = vmatprep.mubr.bf16.mxu0 %v7164_v17  ;;  %5488 = vmatprep.mubr.bf16.mxu1 %v7164_v17  ;;  %v10010_v17 = vld [vmem:[#allocation2 + $0x20] sm:$0xff] }
 0x144   :  { %4967 = vmatpush1.bf16.msra.mxu0 %v8570_v18  ;;  %5459 = vmatpush1.bf16.msra.mxu1 %v8573_v19  ;;  %v8665_v18 = vld [vmem:[#allocation5 + $0x808] ss:$16 sps:$4 sm:$0xff]   ;;  %v8670_v19 = vld [vmem:[#allocation5 + $0x824] ss:$16 sps:$4 sm:$0xff]  }
 0x145   :  { %4968 = vmatprep.subr.bf16.mxu0 %v8578_v20  ;;  %5460 = vmatprep.subr.bf16.mxu1 %v8581_v11  ;;  %v8673_v20 = vld [vmem:[#allocation5 + $0x82c] ss:$16 sps:$4 sm:$0xff]   ;;  %v7166_v11 = vcombine.high %v10010_v17, %v10010_v17 }
 0x148   :  { %4969 = vmatpush1.bf16.msra.mxu0 %v8576_v21  ;;  %5461 = vmatpush1.bf16.msra.mxu1 %v8579_v22  ;;  %v8668_v21 = vld [vmem:[#allocation5 + $0x820] ss:$16 sps:$4 sm:$0xff]   ;;  %v8671_v22 = vld [vmem:[#allocation5 + $0x828] ss:$16 sps:$4 sm:$0xff]  }
 0x149   :  { %4970 = vmatprep.subr.bf16.mxu0 %v8584_v23  ;;  %5462 = vmatprep.subr.bf16.mxu1 %v8587_v24  ;;  %v8679_v23 = vld [vmem:[#allocation5 + $0x84c] ss:$16 sps:$4 sm:$0xff]   ;;  %v8674_v24 = vld [vmem:[#allocation5 + $0x840] ss:$16 sps:$4 sm:$0xff]  }
 0x14c   :  { %4971 = vmatpush1.bf16.msra.mxu0 %v8582_v25  ;;  %5463 = vmatpush1.bf16.msra.mxu1 %v8585_v26  ;;  %v8677_v25 = vld [vmem:[#allocation5 + $0x848] ss:$16 sps:$4 sm:$0xff]   ;;  %v8682_v26 = vld [vmem:[#allocation5 + $0x864] ss:$16 sps:$4 sm:$0xff]  }
 0x14d   :  { %4972 = vmatprep.subr.bf16.mxu0 %v8590_v27  ;;  %5464 = vmatprep.subr.bf16.mxu1 %v8593_v28  ;;  %v8685_v27 = vld [vmem:[#allocation5 + $0x86c] ss:$16 sps:$4 sm:$0xff]   ;;  %v8680_v28 = vld [vmem:[#allocation5 + $0x860] ss:$16 sps:$4 sm:$0xff]  }
 0x150   :  { %4973 = vmatpush1.bf16.msra.mxu0 %v8588_v29  ;;  %5465 = vmatpush1.bf16.msra.mxu1 %v8591_v30  ;;  %v8683_v29 = vld [vmem:[#allocation5 + $0x868] ss:$16 sps:$4 sm:$0xff]   ;;  %v8688_v30 = vld [vmem:[#allocation5 + $0x884] ss:$16 sps:$4 sm:$0xff]  }
 0x151   :  { %4974 = vmatprep.subr.bf16.mxu0 %v8596_v31  ;;  %5466 = vmatprep.subr.bf16.mxu1 %v8599_v32  ;;  %v8691_v31 = vld [vmem:[#allocation5 + $0x88c] ss:$16 sps:$4 sm:$0xff]   ;;  %v8686_v32 = vld [vmem:[#allocation5 + $0x880] ss:$16 sps:$4 sm:$0xff]  }
 0x154   :  { %4975 = vmatpush1.bf16.msra.mxu0 %v8594_v33  ;;  %5467 = vmatpush1.bf16.msra.mxu1 %v8597_v34  ;;  %v8689_v33 = vld [vmem:[#allocation5 + $0x888] ss:$16 sps:$4 sm:$0xff]   ;;  %v8694_v34 = vld [vmem:[#allocation5 + $0x8a4] ss:$16 sps:$4 sm:$0xff]  }
 0x155   :  { %4976 = vmatprep.subr.bf16.mxu0 %v8602_v35  ;;  %5468 = vmatprep.subr.bf16.mxu1 %v8605_v36  ;;  %v8697_v35 = vld [vmem:[#allocation5 + $0x8ac] ss:$16 sps:$4 sm:$0xff]   ;;  %v8692_v36 = vld [vmem:[#allocation5 + $0x8a0] ss:$16 sps:$4 sm:$0xff]  }
 0x158   :  { %4977 = vmatpush1.bf16.msra.mxu0 %v8600_v37  ;;  %5469 = vmatpush1.bf16.msra.mxu1 %v8603_v38  ;;  %v8695_v37 = vld [vmem:[#allocation5 + $0x8a8] ss:$16 sps:$4 sm:$0xff]   ;;  %v8700_v38 = vld [vmem:[#allocation5 + $0x8c4] ss:$16 sps:$4 sm:$0xff]  }
 0x159   :  { %4978 = vmatprep.subr.bf16.mxu0 %v8608_v39  ;;  %5470 = vmatprep.subr.bf16.mxu1 %v8611_v40  ;;  %v8703_v39 = vld [vmem:[#allocation5 + $0x8cc] ss:$16 sps:$4 sm:$0xff]   ;;  %v8698_v40 = vld [vmem:[#allocation5 + $0x8c0] ss:$16 sps:$4 sm:$0xff]  }
 0x15c   :  { %4979 = vmatpush1.bf16.msra.mxu0 %v8606_v41  ;;  %5471 = vmatpush1.bf16.msra.mxu1 %v8609_v42  ;;  %v8701_v41 = vld [vmem:[#allocation5 + $0x8c8] ss:$16 sps:$4 sm:$0xff]   ;;  %v8706_v42 = vld [vmem:[#allocation5 + $0x8e4] ss:$16 sps:$4 sm:$0xff]  }
 0x15d   :  { %4980 = vmatprep.subr.bf16.mxu0 %v8614_v43  ;;  %5472 = vmatprep.subr.bf16.mxu1 %v8617_v44  ;;  %v8709_v43 = vld [vmem:[#allocation5 + $0x8ec] ss:$16 sps:$4 sm:$0xff]   ;;  %v8704_v44 = vld [vmem:[#allocation5 + $0x8e0] ss:$16 sps:$4 sm:$0xff]  }
 0x160   :  { %4981 = vmatpush1.bf16.msra.mxu0 %v8612_v45  ;;  %5473 = vmatpush1.bf16.msra.mxu1 %v8615_v46  ;;  %v8707_v45 = vld [vmem:[#allocation5 + $0x8e8] ss:$16 sps:$4 sm:$0xff]   ;;  %v8712_v46 = vld [vmem:[#allocation5 + $0x904] ss:$16 sps:$4 sm:$0xff]  }
 0x161   :  { %4982 = vmatprep.subr.bf16.mxu0 %v8620_v47  ;;  %5474 = vmatprep.subr.bf16.mxu1 %v8623_v48  ;;  %v8715_v47 = vld [vmem:[#allocation5 + $0x90c] ss:$16 sps:$4 sm:$0xff]   ;;  %v8710_v48 = vld [vmem:[#allocation5 + $0x900] ss:$16 sps:$4 sm:$0xff]  }
 0x164   :  { %4983 = vmatpush1.bf16.msra.mxu0 %v8618_v49  ;;  %5475 = vmatpush1.bf16.msra.mxu1 %v8621_v50  ;;  %v8713_v49 = vld [vmem:[#allocation5 + $0x908] ss:$16 sps:$4 sm:$0xff]   ;;  %v8718_v50 = vld [vmem:[#allocation5 + $0x924] ss:$16 sps:$4 sm:$0xff]  }
 0x165   :  { %4984 = vmatprep.subr.bf16.mxu0 %v8626_v51  ;;  %5476 = vmatprep.subr.bf16.mxu1 %v8629_v52  ;;  %v8721_v51 = vld [vmem:[#allocation5 + $0x92c] ss:$16 sps:$4 sm:$0xff]   ;;  %v8716_v52 = vld [vmem:[#allocation5 + $0x920] ss:$16 sps:$4 sm:$0xff]  }
 0x168   :  { %4985 = vmatpush1.bf16.msra.mxu0 %v8624_v53  ;;  %5477 = vmatpush1.bf16.msra.mxu1 %v8627_v54  ;;  %v8719_v53 = vld [vmem:[#allocation5 + $0x928] ss:$16 sps:$4 sm:$0xff]   ;;  %v8724_v54 = vld [vmem:[#allocation5 + $0x944] ss:$16 sps:$4 sm:$0xff]  }
 0x169   :  { %4986 = vmatprep.subr.bf16.mxu0 %v8632_v55  ;;  %5478 = vmatprep.subr.bf16.mxu1 %v8635_v56  ;;  %v8727_v55 = vld [vmem:[#allocation5 + $0x94c] ss:$16 sps:$4 sm:$0xff]   ;;  %v8722_v56 = vld [vmem:[#allocation5 + $0x940] ss:$16 sps:$4 sm:$0xff]  }
 0x16c   :  { %4987 = vmatpush1.bf16.msra.mxu0 %v8630_v57  ;;  %5479 = vmatpush1.bf16.msra.mxu1 %v8633_v58  ;;  %v8725_v57 = vld [vmem:[#allocation5 + $0x948] ss:$16 sps:$4 sm:$0xff]   ;;  %v8730_v58 = vld [vmem:[#allocation5 + $0x964] ss:$16 sps:$4 sm:$0xff]  }
 0x16d   :  { %4988 = vmatprep.subr.bf16.mxu0 %v8638_v59  ;;  %5480 = vmatprep.subr.bf16.mxu1 %v8641_v60  ;;  %v8733_v59 = vld [vmem:[#allocation5 + $0x96c] ss:$16 sps:$4 sm:$0xff]   ;;  %v8728_v60 = vld [vmem:[#allocation5 + $0x960] ss:$16 sps:$4 sm:$0xff]  }
 0x170   :  { %4989 = vmatpush1.bf16.msra.mxu0 %v8636_v61  ;;  %5481 = vmatpush1.bf16.msra.mxu1 %v8639_v62  ;;  %v8731_v61 = vld [vmem:[#allocation5 + $0x968] ss:$16 sps:$4 sm:$0xff]   ;;  %v8736_v62 = vld [vmem:[#allocation5 + $0x984] ss:$16 sps:$4 sm:$0xff]  }
 0x171   :  { %4990 = vmatprep.subr.bf16.mxu0 %v8644_v63  ;;  %5482 = vmatprep.subr.bf16.mxu1 %v8647_v0  ;;  %v8739_v63 = vld [vmem:[#allocation5 + $0x98c] ss:$16 sps:$4 sm:$0xff]   ;;  %v8734_v0 = vld [vmem:[#allocation5 + $0x980] ss:$16 sps:$4 sm:$0xff]  }
 0x174   :  { %4991 = vmatpush1.bf16.msra.mxu0 %v8642_v1  ;;  %5483 = vmatpush1.bf16.msra.mxu1 %v8645_v2  ;;  %v8737_v1 = vld [vmem:[#allocation5 + $0x988] ss:$16 sps:$4 sm:$0xff]   ;;  %v8742_v2 = vld [vmem:[#allocation5 + $0x9a4] ss:$16 sps:$4 sm:$0xff]  }
 0x175   :  { %4992 = vmatprep.subr.bf16.mxu0 %v8650_v3  ;;  %5484 = vmatprep.subr.bf16.mxu1 %v8653_v4  ;;  %v8745_v3 = vld [vmem:[#allocation5 + $0x9ac] ss:$16 sps:$4 sm:$0xff]   ;;  %v8740_v4 = vld [vmem:[#allocation5 + $0x9a0] ss:$16 sps:$4 sm:$0xff]  }
 0x178   :  { %4993 = vmatpush1.bf16.msra.mxu0 %v8648_v5  ;;  %5485 = vmatpush1.bf16.msra.mxu1 %v8651_v6  ;;  %v8743_v5 = vld [vmem:[#allocation5 + $0x9a8] ss:$16 sps:$4 sm:$0xff]   ;;  %v8748_v6 = vld [vmem:[#allocation5 + $0x9c4] ss:$16 sps:$4 sm:$0xff]  }
 0x179   :  { %4994 = vmatprep.subr.bf16.mxu0 %v8656_v7  ;;  %5486 = vmatprep.subr.bf16.mxu1 %v8659_v8  ;;  %v8751_v7 = vld [vmem:[#allocation5 + $0x9cc] ss:$16 sps:$4 sm:$0xff]   ;;  %v8746_v8 = vld [vmem:[#allocation5 + $0x9c0] ss:$16 sps:$4 sm:$0xff]  }
 0x17c   :  { %4995 = vmatpush1.bf16.msra.mxu0 %v8654_v9  ;;  %5487 = vmatpush1.bf16.msra.mxu1 %v8657_v10  ;;  %v8749_v9 = vld [vmem:[#allocation5 + $0x9c8] ss:$16 sps:$4 sm:$0xff]   ;;  %v8754_v10 = vld [vmem:[#allocation5 + $0x9e4] ss:$16 sps:$4 sm:$0xff]  }
 0x17d   :  { %5005 = vmatprep.subr.bf16.mxu0 %v8664_v12  ;;  %5497 = vmatprep.subr.bf16.mxu1 %v8667_v13  ;;  %v8757_v12 = vld [vmem:[#allocation5 + $0x9ec] ss:$16 sps:$4 sm:$0xff]   ;;  %v8752_v13 = vld [vmem:[#allocation5 + $0x9e0] ss:$16 sps:$4 sm:$0xff]  }
 0x17f   :  { %4997 = vmatmul.mubr.bf16.vlgmr.msra.gmra.mrb[0].mxu0 %v7163_v16  ;;  %5489 = vmatmul.mubr.bf16.vlgmr.msra.gmra.mrb[0].mxu1 %v7163_v16  ;;  %v8762_v16 = vld [vmem:[#allocation5 + $0xa04] ss:$16 sps:$4 sm:$0xff]  }
 0x180   :  { %5006 = vmatpush1.bf16.msra.mxu0 %v8662_v15  ;;  %5498 = vmatpush1.bf16.msra.mxu1 %v8665_v18  ;;  %v8755_v15 = vld [vmem:[#allocation5 + $0x9e8] ss:$16 sps:$4 sm:$0xff]   ;;  %v8765_v18 = vld [vmem:[#allocation5 + $0xa0c] ss:$16 sps:$4 sm:$0xff]  }
 0x181   :  { %5007 = vmatprep.subr.bf16.mxu0 %v8670_v19  ;;  %5499 = vmatprep.subr.bf16.mxu1 %v8673_v20  ;;  %v10014_v19 = vld [vmem:[#allocation2 + $0x28] sm:$0xff]  ;;  %v7165_v20 = vcombine.low %v10010_v17, %v10010_v17  ;;  %v8774_v17 = vld [vmem:[#allocation5 + $0xa44] ss:$16 sps:$4 sm:$0xff]  }
 0x182   :  { %5037 = vmatprep.mubr.bf16.mxu0 %v7166_v11  ;;  %5529 = vmatprep.mubr.bf16.mxu1 %v7166_v11  ;;  %v8760_v11 = vld [vmem:[#allocation5 + $0xa00] ss:$16 sps:$4 sm:$0xff]  }
 0x184   :  { %5008 = vmatpush1.bf16.msra.mxu0 %v8668_v21  ;;  %5500 = vmatpush1.bf16.msra.mxu1 %v8671_v22  ;;  %v8763_v21 = vld [vmem:[#allocation5 + $0xa08] ss:$16 sps:$4 sm:$0xff]   ;;  %v8768_v22 = vld [vmem:[#allocation5 + $0xa24] ss:$16 sps:$4 sm:$0xff]  }
 0x185   :  { %5009 = vmatprep.subr.bf16.mxu0 %v8676_v14  ;;  %5501 = vmatprep.subr.bf16.mxu1 %v8679_v23  ;;  %v8771_v14 = vld [vmem:[#allocation5 + $0xa2c] ss:$16 sps:$4 sm:$0xff]   ;;  %v7168_v23 = vcombine.high %v10014_v19, %v10014_v19 }
 0x188   :  { %5010 = vmatpush1.bf16.msra.mxu0 %v8674_v24  ;;  %5502 = vmatpush1.bf16.msra.mxu1 %v8677_v25  ;;  %v8766_v24 = vld [vmem:[#allocation5 + $0xa20] ss:$16 sps:$4 sm:$0xff]   ;;  %v8769_v25 = vld [vmem:[#allocation5 + $0xa28] ss:$16 sps:$4 sm:$0xff]  }
 0x189   :  { %5011 = vmatprep.subr.bf16.mxu0 %v8682_v26  ;;  %5503 = vmatprep.subr.bf16.mxu1 %v8685_v27  ;;  %v8777_v26 = vld [vmem:[#allocation5 + $0xa4c] ss:$16 sps:$4 sm:$0xff]   ;;  %v8772_v27 = vld [vmem:[#allocation5 + $0xa40] ss:$16 sps:$4 sm:$0xff]  }
 0x18c   :  { %5012 = vmatpush1.bf16.msra.mxu0 %v8680_v28  ;;  %5504 = vmatpush1.bf16.msra.mxu1 %v8683_v29  ;;  %v8775_v28 = vld [vmem:[#allocation5 + $0xa48] ss:$16 sps:$4 sm:$0xff]   ;;  %v8780_v29 = vld [vmem:[#allocation5 + $0xa64] ss:$16 sps:$4 sm:$0xff]  }
 0x18d   :  { %5013 = vmatprep.subr.bf16.mxu0 %v8688_v30  ;;  %5505 = vmatprep.subr.bf16.mxu1 %v8691_v31  ;;  %v8783_v30 = vld [vmem:[#allocation5 + $0xa6c] ss:$16 sps:$4 sm:$0xff]   ;;  %v8778_v31 = vld [vmem:[#allocation5 + $0xa60] ss:$16 sps:$4 sm:$0xff]  }
 0x190   :  { %5014 = vmatpush1.bf16.msra.mxu0 %v8686_v32  ;;  %5506 = vmatpush1.bf16.msra.mxu1 %v8689_v33  ;;  %v8781_v32 = vld [vmem:[#allocation5 + $0xa68] ss:$16 sps:$4 sm:$0xff]   ;;  %v8786_v33 = vld [vmem:[#allocation5 + $0xa84] ss:$16 sps:$4 sm:$0xff]  }
 0x191   :  { %5015 = vmatprep.subr.bf16.mxu0 %v8694_v34  ;;  %5507 = vmatprep.subr.bf16.mxu1 %v8697_v35  ;;  %v8789_v34 = vld [vmem:[#allocation5 + $0xa8c] ss:$16 sps:$4 sm:$0xff]   ;;  %v8784_v35 = vld [vmem:[#allocation5 + $0xa80] ss:$16 sps:$4 sm:$0xff]  }
 0x194   :  { %5016 = vmatpush1.bf16.msra.mxu0 %v8692_v36  ;;  %5508 = vmatpush1.bf16.msra.mxu1 %v8695_v37  ;;  %v8787_v36 = vld [vmem:[#allocation5 + $0xa88] ss:$16 sps:$4 sm:$0xff]   ;;  %v8792_v37 = vld [vmem:[#allocation5 + $0xaa4] ss:$16 sps:$4 sm:$0xff]  }
 0x195   :  { %5017 = vmatprep.subr.bf16.mxu0 %v8700_v38  ;;  %5509 = vmatprep.subr.bf16.mxu1 %v8703_v39  ;;  %v8795_v38 = vld [vmem:[#allocation5 + $0xaac] ss:$16 sps:$4 sm:$0xff]   ;;  %v8790_v39 = vld [vmem:[#allocation5 + $0xaa0] ss:$16 sps:$4 sm:$0xff]  }
 0x198   :  { %5018 = vmatpush1.bf16.msra.mxu0 %v8698_v40  ;;  %5510 = vmatpush1.bf16.msra.mxu1 %v8701_v41  ;;  %v8793_v40 = vld [vmem:[#allocation5 + $0xaa8] ss:$16 sps:$4 sm:$0xff]   ;;  %v8798_v41 = vld [vmem:[#allocation5 + $0xac4] ss:$16 sps:$4 sm:$0xff]  }
 0x199   :  { %5019 = vmatprep.subr.bf16.mxu0 %v8706_v42  ;;  %5511 = vmatprep.subr.bf16.mxu1 %v8709_v43  ;;  %v8801_v42 = vld [vmem:[#allocation5 + $0xacc] ss:$16 sps:$4 sm:$0xff]   ;;  %v8796_v43 = vld [vmem:[#allocation5 + $0xac0] ss:$16 sps:$4 sm:$0xff]  }
 0x19c   :  { %5020 = vmatpush1.bf16.msra.mxu0 %v8704_v44  ;;  %5512 = vmatpush1.bf16.msra.mxu1 %v8707_v45  ;;  %v8799_v44 = vld [vmem:[#allocation5 + $0xac8] ss:$16 sps:$4 sm:$0xff]   ;;  %v8804_v45 = vld [vmem:[#allocation5 + $0xae4] ss:$16 sps:$4 sm:$0xff]  }
 0x19d   :  { %5021 = vmatprep.subr.bf16.mxu0 %v8712_v46  ;;  %5513 = vmatprep.subr.bf16.mxu1 %v8715_v47  ;;  %v8807_v46 = vld [vmem:[#allocation5 + $0xaec] ss:$16 sps:$4 sm:$0xff]   ;;  %v8802_v47 = vld [vmem:[#allocation5 + $0xae0] ss:$16 sps:$4 sm:$0xff]  }
 0x1a0   :  { %5022 = vmatpush1.bf16.msra.mxu0 %v8710_v48  ;;  %5514 = vmatpush1.bf16.msra.mxu1 %v8713_v49  ;;  %v8805_v48 = vld [vmem:[#allocation5 + $0xae8] ss:$16 sps:$4 sm:$0xff]   ;;  %v8810_v49 = vld [vmem:[#allocation5 + $0xb04] ss:$16 sps:$4 sm:$0xff]  }
 0x1a1   :  { %5023 = vmatprep.subr.bf16.mxu0 %v8718_v50  ;;  %5515 = vmatprep.subr.bf16.mxu1 %v8721_v51  ;;  %v8813_v50 = vld [vmem:[#allocation5 + $0xb0c] ss:$16 sps:$4 sm:$0xff]   ;;  %v8808_v51 = vld [vmem:[#allocation5 + $0xb00] ss:$16 sps:$4 sm:$0xff]  }
 0x1a4   :  { %5024 = vmatpush1.bf16.msra.mxu0 %v8716_v52  ;;  %5516 = vmatpush1.bf16.msra.mxu1 %v8719_v53  ;;  %v8811_v52 = vld [vmem:[#allocation5 + $0xb08] ss:$16 sps:$4 sm:$0xff]   ;;  %v8816_v53 = vld [vmem:[#allocation5 + $0xb24] ss:$16 sps:$4 sm:$0xff]  }
 0x1a5   :  { %5025 = vmatprep.subr.bf16.mxu0 %v8724_v54  ;;  %5517 = vmatprep.subr.bf16.mxu1 %v8727_v55  ;;  %v8819_v54 = vld [vmem:[#allocation5 + $0xb2c] ss:$16 sps:$4 sm:$0xff]   ;;  %v8814_v55 = vld [vmem:[#allocation5 + $0xb20] ss:$16 sps:$4 sm:$0xff]  }
 0x1a8   :  { %5026 = vmatpush1.bf16.msra.mxu0 %v8722_v56  ;;  %5518 = vmatpush1.bf16.msra.mxu1 %v8725_v57  ;;  %v8817_v56 = vld [vmem:[#allocation5 + $0xb28] ss:$16 sps:$4 sm:$0xff]   ;;  %v8822_v57 = vld [vmem:[#allocation5 + $0xb44] ss:$16 sps:$4 sm:$0xff]  }
 0x1a9   :  { %5027 = vmatprep.subr.bf16.mxu0 %v8730_v58  ;;  %5519 = vmatprep.subr.bf16.mxu1 %v8733_v59  ;;  %v8825_v58 = vld [vmem:[#allocation5 + $0xb4c] ss:$16 sps:$4 sm:$0xff]   ;;  %v8820_v59 = vld [vmem:[#allocation5 + $0xb40] ss:$16 sps:$4 sm:$0xff]  }
 0x1ac   :  { %5028 = vmatpush1.bf16.msra.mxu0 %v8728_v60  ;;  %5520 = vmatpush1.bf16.msra.mxu1 %v8731_v61  ;;  %v8823_v60 = vld [vmem:[#allocation5 + $0xb48] ss:$16 sps:$4 sm:$0xff]   ;;  %v8828_v61 = vld [vmem:[#allocation5 + $0xb64] ss:$16 sps:$4 sm:$0xff]  }
 0x1ad   :  { %5029 = vmatprep.subr.bf16.mxu0 %v8736_v62  ;;  %5521 = vmatprep.subr.bf16.mxu1 %v8739_v63  ;;  %v8831_v62 = vld [vmem:[#allocation5 + $0xb6c] ss:$16 sps:$4 sm:$0xff]   ;;  %v8826_v63 = vld [vmem:[#allocation5 + $0xb60] ss:$16 sps:$4 sm:$0xff]  }
 0x1b0   :  { %5030 = vmatpush1.bf16.msra.mxu0 %v8734_v0  ;;  %5522 = vmatpush1.bf16.msra.mxu1 %v8737_v1  ;;  %v8829_v0 = vld [vmem:[#allocation5 + $0xb68] ss:$16 sps:$4 sm:$0xff]   ;;  %v8834_v1 = vld [vmem:[#allocation5 + $0xb84] ss:$16 sps:$4 sm:$0xff]  }
 0x1b1   :  { %5031 = vmatprep.subr.bf16.mxu0 %v8742_v2  ;;  %5523 = vmatprep.subr.bf16.mxu1 %v8745_v3  ;;  %v8837_v2 = vld [vmem:[#allocation5 + $0xb8c] ss:$16 sps:$4 sm:$0xff]   ;;  %v8832_v3 = vld [vmem:[#allocation5 + $0xb80] ss:$16 sps:$4 sm:$0xff]  }
 0x1b4   :  { %5032 = vmatpush1.bf16.msra.mxu0 %v8740_v4  ;;  %5524 = vmatpush1.bf16.msra.mxu1 %v8743_v5  ;;  %v8835_v4 = vld [vmem:[#allocation5 + $0xb88] ss:$16 sps:$4 sm:$0xff]   ;;  %v8840_v5 = vld [vmem:[#allocation5 + $0xba4] ss:$16 sps:$4 sm:$0xff]  }
 0x1b5   :  { %5033 = vmatprep.subr.bf16.mxu0 %v8748_v6  ;;  %5525 = vmatprep.subr.bf16.mxu1 %v8751_v7  ;;  %v8843_v6 = vld [vmem:[#allocation5 + $0xbac] ss:$16 sps:$4 sm:$0xff]   ;;  %v8838_v7 = vld [vmem:[#allocation5 + $0xba0] ss:$16 sps:$4 sm:$0xff]  }
 0x1b8   :  { %5034 = vmatpush1.bf16.msra.mxu0 %v8746_v8  ;;  %5526 = vmatpush1.bf16.msra.mxu1 %v8749_v9  ;;  %v8841_v8 = vld [vmem:[#allocation5 + $0xba8] ss:$16 sps:$4 sm:$0xff]   ;;  %v8846_v9 = vld [vmem:[#allocation5 + $0xbc4] ss:$16 sps:$4 sm:$0xff]  }
 0x1b9   :  { %5035 = vmatprep.subr.bf16.mxu0 %v8754_v10  ;;  %5527 = vmatprep.subr.bf16.mxu1 %v8757_v12  ;;  %v8849_v10 = vld [vmem:[#allocation5 + $0xbcc] ss:$16 sps:$4 sm:$0xff]   ;;  %v8844_v12 = vld [vmem:[#allocation5 + $0xbc0] ss:$16 sps:$4 sm:$0xff]  }
 0x1bc   :  { %5036 = vmatpush1.bf16.msra.mxu0 %v8752_v13  ;;  %5528 = vmatpush1.bf16.msra.mxu1 %v8755_v15  ;;  %v8847_v13 = vld [vmem:[#allocation5 + $0xbc8] ss:$16 sps:$4 sm:$0xff]   ;;  %v8852_v15 = vld [vmem:[#allocation5 + $0xbe4] ss:$16 sps:$4 sm:$0xff]  }
 0x1bd   :  { %5046 = vmatprep.subr.bf16.mxu0 %v8762_v16  ;;  %5538 = vmatprep.subr.bf16.mxu1 %v8765_v18  ;;  %v8855_v16 = vld [vmem:[#allocation5 + $0xbec] ss:$16 sps:$4 sm:$0xff]   ;;  %v8850_v18 = vld [vmem:[#allocation5 + $0xbe0] ss:$16 sps:$4 sm:$0xff]  }
 0x1bf   :  { %5038 = vmatmul.mubr.bf16.vlgmr.msra.gmra.mrb[0].mxu0 %v7165_v20  ;;  %5530 = vmatmul.mubr.bf16.vlgmr.msra.gmra.mrb[0].mxu1 %v7165_v20  ;;  %v8853_v20 = vld [vmem:[#allocation5 + $0xbe8] ss:$16 sps:$4 sm:$0xff]  }
 0x1c0   :  { %5047 = vmatpush1.bf16.msra.mxu0 %v8760_v11  ;;  %5539 = vmatpush1.bf16.msra.mxu1 %v8763_v21  ;;  %v8860_v11 = vld [vmem:[#allocation5 + $0xc04] ss:$16 sps:$4 sm:$0xff]   ;;  %v8863_v21 = vld [vmem:[#allocation5 + $0xc0c] ss:$16 sps:$4 sm:$0xff]  }
 0x1c1   :  { %5048 = vmatprep.subr.bf16.mxu0 %v8768_v22  ;;  %5540 = vmatprep.subr.bf16.mxu1 %v8771_v14  ;;  %v10020_v22 = vld [vmem:[#allocation2 + $0x30] sm:$0xff]  ;;  %v7167_v14 = vcombine.low %v10014_v19, %v10014_v19 }
 0x1c2   :  { %5078 = vmatprep.mubr.bf16.mxu0 %v7168_v23  ;;  %5570 = vmatprep.mubr.bf16.mxu1 %v7168_v23  ;;  %v8858_v23 = vld [vmem:[#allocation5 + $0xc00] ss:$16 sps:$4 sm:$0xff]   ;;  %v8872_v19 = vld [vmem:[#allocation5 + $0xc44] ss:$16 sps:$4 sm:$0xff]  }
 0x1c4   :  { %5049 = vmatpush1.bf16.msra.mxu0 %v8766_v24  ;;  %5541 = vmatpush1.bf16.msra.mxu1 %v8769_v25  ;;  %v8861_v24 = vld [vmem:[#allocation5 + $0xc08] ss:$16 sps:$4 sm:$0xff]   ;;  %v8866_v25 = vld [vmem:[#allocation5 + $0xc24] ss:$16 sps:$4 sm:$0xff]  }
 0x1c5   :  { %5050 = vmatprep.subr.bf16.mxu0 %v8774_v17  ;;  %5542 = vmatprep.subr.bf16.mxu1 %v8777_v26  ;;  %v8869_v17 = vld [vmem:[#allocation5 + $0xc2c] ss:$16 sps:$4 sm:$0xff]   ;;  %v7170_v26 = vcombine.high %v10020_v22, %v10020_v22 }
 0x1c8   :  { %5051 = vmatpush1.bf16.msra.mxu0 %v8772_v27  ;;  %5543 = vmatpush1.bf16.msra.mxu1 %v8775_v28  ;;  %v8864_v27 = vld [vmem:[#allocation5 + $0xc20] ss:$16 sps:$4 sm:$0xff]   ;;  %v8867_v28 = vld [vmem:[#allocation5 + $0xc28] ss:$16 sps:$4 sm:$0xff]  }
 0x1c9   :  { %5052 = vmatprep.subr.bf16.mxu0 %v8780_v29  ;;  %5544 = vmatprep.subr.bf16.mxu1 %v8783_v30  ;;  %v8875_v29 = vld [vmem:[#allocation5 + $0xc4c] ss:$16 sps:$4 sm:$0xff]   ;;  %v8870_v30 = vld [vmem:[#allocation5 + $0xc40] ss:$16 sps:$4 sm:$0xff]  }
 0x1cc   :  { %5053 = vmatpush1.bf16.msra.mxu0 %v8778_v31  ;;  %5545 = vmatpush1.bf16.msra.mxu1 %v8781_v32  ;;  %v8873_v31 = vld [vmem:[#allocation5 + $0xc48] ss:$16 sps:$4 sm:$0xff]   ;;  %v8878_v32 = vld [vmem:[#allocation5 + $0xc64] ss:$16 sps:$4 sm:$0xff]  }
 0x1cd   :  { %5054 = vmatprep.subr.bf16.mxu0 %v8786_v33  ;;  %5546 = vmatprep.subr.bf16.mxu1 %v8789_v34  ;;  %v8881_v33 = vld [vmem:[#allocation5 + $0xc6c] ss:$16 sps:$4 sm:$0xff]   ;;  %v8876_v34 = vld [vmem:[#allocation5 + $0xc60] ss:$16 sps:$4 sm:$0xff]  }
 0x1d0   :  { %5055 = vmatpush1.bf16.msra.mxu0 %v8784_v35  ;;  %5547 = vmatpush1.bf16.msra.mxu1 %v8787_v36  ;;  %v8879_v35 = vld [vmem:[#allocation5 + $0xc68] ss:$16 sps:$4 sm:$0xff]   ;;  %v8884_v36 = vld [vmem:[#allocation5 + $0xc84] ss:$16 sps:$4 sm:$0xff]  }
 0x1d1   :  { %5056 = vmatprep.subr.bf16.mxu0 %v8792_v37  ;;  %5548 = vmatprep.subr.bf16.mxu1 %v8795_v38  ;;  %v8887_v37 = vld [vmem:[#allocation5 + $0xc8c] ss:$16 sps:$4 sm:$0xff]   ;;  %v8882_v38 = vld [vmem:[#allocation5 + $0xc80] ss:$16 sps:$4 sm:$0xff]  }
 0x1d4   :  { %5057 = vmatpush1.bf16.msra.mxu0 %v8790_v39  ;;  %5549 = vmatpush1.bf16.msra.mxu1 %v8793_v40  ;;  %v8885_v39 = vld [vmem:[#allocation5 + $0xc88] ss:$16 sps:$4 sm:$0xff]   ;;  %v8890_v40 = vld [vmem:[#allocation5 + $0xca4] ss:$16 sps:$4 sm:$0xff]  }
 0x1d5   :  { %5058 = vmatprep.subr.bf16.mxu0 %v8798_v41  ;;  %5550 = vmatprep.subr.bf16.mxu1 %v8801_v42  ;;  %v8893_v41 = vld [vmem:[#allocation5 + $0xcac] ss:$16 sps:$4 sm:$0xff]   ;;  %v8888_v42 = vld [vmem:[#allocation5 + $0xca0] ss:$16 sps:$4 sm:$0xff]  }
 0x1d8   :  { %5059 = vmatpush1.bf16.msra.mxu0 %v8796_v43  ;;  %5551 = vmatpush1.bf16.msra.mxu1 %v8799_v44  ;;  %v8891_v43 = vld [vmem:[#allocation5 + $0xca8] ss:$16 sps:$4 sm:$0xff]   ;;  %v8896_v44 = vld [vmem:[#allocation5 + $0xcc4] ss:$16 sps:$4 sm:$0xff]  }
 0x1d9   :  { %5060 = vmatprep.subr.bf16.mxu0 %v8804_v45  ;;  %5552 = vmatprep.subr.bf16.mxu1 %v8807_v46  ;;  %v8899_v45 = vld [vmem:[#allocation5 + $0xccc] ss:$16 sps:$4 sm:$0xff]   ;;  %v8894_v46 = vld [vmem:[#allocation5 + $0xcc0] ss:$16 sps:$4 sm:$0xff]  }
 0x1dc   :  { %5061 = vmatpush1.bf16.msra.mxu0 %v8802_v47  ;;  %5553 = vmatpush1.bf16.msra.mxu1 %v8805_v48  ;;  %v8897_v47 = vld [vmem:[#allocation5 + $0xcc8] ss:$16 sps:$4 sm:$0xff]   ;;  %v8902_v48 = vld [vmem:[#allocation5 + $0xce4] ss:$16 sps:$4 sm:$0xff]  }
 0x1dd   :  { %5062 = vmatprep.subr.bf16.mxu0 %v8810_v49  ;;  %5554 = vmatprep.subr.bf16.mxu1 %v8813_v50  ;;  %v8905_v49 = vld [vmem:[#allocation5 + $0xcec] ss:$16 sps:$4 sm:$0xff]   ;;  %v8900_v50 = vld [vmem:[#allocation5 + $0xce0] ss:$16 sps:$4 sm:$0xff]  }
 0x1e0   :  { %5063 = vmatpush1.bf16.msra.mxu0 %v8808_v51  ;;  %5555 = vmatpush1.bf16.msra.mxu1 %v8811_v52  ;;  %v8903_v51 = vld [vmem:[#allocation5 + $0xce8] ss:$16 sps:$4 sm:$0xff]   ;;  %v8908_v52 = vld [vmem:[#allocation5 + $0xd04] ss:$16 sps:$4 sm:$0xff]  }
 0x1e1   :  { %5064 = vmatprep.subr.bf16.mxu0 %v8816_v53  ;;  %5556 = vmatprep.subr.bf16.mxu1 %v8819_v54  ;;  %v8911_v53 = vld [vmem:[#allocation5 + $0xd0c] ss:$16 sps:$4 sm:$0xff]   ;;  %v8906_v54 = vld [vmem:[#allocation5 + $0xd00] ss:$16 sps:$4 sm:$0xff]  }
 0x1e4   :  { %5065 = vmatpush1.bf16.msra.mxu0 %v8814_v55  ;;  %5557 = vmatpush1.bf16.msra.mxu1 %v8817_v56  ;;  %v8909_v55 = vld [vmem:[#allocation5 + $0xd08] ss:$16 sps:$4 sm:$0xff]   ;;  %v8914_v56 = vld [vmem:[#allocation5 + $0xd24] ss:$16 sps:$4 sm:$0xff]  }
 0x1e5   :  { %5066 = vmatprep.subr.bf16.mxu0 %v8822_v57  ;;  %5558 = vmatprep.subr.bf16.mxu1 %v8825_v58  ;;  %v8917_v57 = vld [vmem:[#allocation5 + $0xd2c] ss:$16 sps:$4 sm:$0xff]   ;;  %v8912_v58 = vld [vmem:[#allocation5 + $0xd20] ss:$16 sps:$4 sm:$0xff]  }
 0x1e8   :  { %5067 = vmatpush1.bf16.msra.mxu0 %v8820_v59  ;;  %5559 = vmatpush1.bf16.msra.mxu1 %v8823_v60  ;;  %v8915_v59 = vld [vmem:[#allocation5 + $0xd28] ss:$16 sps:$4 sm:$0xff]   ;;  %v8920_v60 = vld [vmem:[#allocation5 + $0xd44] ss:$16 sps:$4 sm:$0xff]  }
 0x1e9   :  { %5068 = vmatprep.subr.bf16.mxu0 %v8828_v61  ;;  %5560 = vmatprep.subr.bf16.mxu1 %v8831_v62  ;;  %v8923_v61 = vld [vmem:[#allocation5 + $0xd4c] ss:$16 sps:$4 sm:$0xff]   ;;  %v8918_v62 = vld [vmem:[#allocation5 + $0xd40] ss:$16 sps:$4 sm:$0xff]  }
 0x1ec   :  { %5069 = vmatpush1.bf16.msra.mxu0 %v8826_v63  ;;  %5561 = vmatpush1.bf16.msra.mxu1 %v8829_v0  ;;  %v8921_v63 = vld [vmem:[#allocation5 + $0xd48] ss:$16 sps:$4 sm:$0xff]   ;;  %v8926_v0 = vld [vmem:[#allocation5 + $0xd64] ss:$16 sps:$4 sm:$0xff]  }
 0x1ed   :  { %5070 = vmatprep.subr.bf16.mxu0 %v8834_v1  ;;  %5562 = vmatprep.subr.bf16.mxu1 %v8837_v2  ;;  %v8929_v1 = vld [vmem:[#allocation5 + $0xd6c] ss:$16 sps:$4 sm:$0xff]   ;;  %v8924_v2 = vld [vmem:[#allocation5 + $0xd60] ss:$16 sps:$4 sm:$0xff]  }
 0x1f0   :  { %5071 = vmatpush1.bf16.msra.mxu0 %v8832_v3  ;;  %5563 = vmatpush1.bf16.msra.mxu1 %v8835_v4  ;;  %v8927_v3 = vld [vmem:[#allocation5 + $0xd68] ss:$16 sps:$4 sm:$0xff]   ;;  %v8932_v4 = vld [vmem:[#allocation5 + $0xd84] ss:$16 sps:$4 sm:$0xff]  }
 0x1f1   :  { %5072 = vmatprep.subr.bf16.mxu0 %v8840_v5  ;;  %5564 = vmatprep.subr.bf16.mxu1 %v8843_v6  ;;  %v8935_v5 = vld [vmem:[#allocation5 + $0xd8c] ss:$16 sps:$4 sm:$0xff]   ;;  %v8930_v6 = vld [vmem:[#allocation5 + $0xd80] ss:$16 sps:$4 sm:$0xff]  }
 0x1f4   :  { %5073 = vmatpush1.bf16.msra.mxu0 %v8838_v7  ;;  %5565 = vmatpush1.bf16.msra.mxu1 %v8841_v8  ;;  %v8933_v7 = vld [vmem:[#allocation5 + $0xd88] ss:$16 sps:$4 sm:$0xff]   ;;  %v8938_v8 = vld [vmem:[#allocation5 + $0xda4] ss:$16 sps:$4 sm:$0xff]  }
 0x1f5   :  { %5074 = vmatprep.subr.bf16.mxu0 %v8846_v9  ;;  %5566 = vmatprep.subr.bf16.mxu1 %v8849_v10  ;;  %v8941_v9 = vld [vmem:[#allocation5 + $0xdac] ss:$16 sps:$4 sm:$0xff]   ;;  %v8936_v10 = vld [vmem:[#allocation5 + $0xda0] ss:$16 sps:$4 sm:$0xff]  }
 0x1f8   :  { %5075 = vmatpush1.bf16.msra.mxu0 %v8844_v12  ;;  %5567 = vmatpush1.bf16.msra.mxu1 %v8847_v13  ;;  %v8939_v12 = vld [vmem:[#allocation5 + $0xda8] ss:$16 sps:$4 sm:$0xff]   ;;  %v8944_v13 = vld [vmem:[#allocation5 + $0xdc4] ss:$16 sps:$4 sm:$0xff]  }
 0x1f9   :  { %5076 = vmatprep.subr.bf16.mxu0 %v8852_v15  ;;  %5568 = vmatprep.subr.bf16.mxu1 %v8855_v16  ;;  %v8947_v15 = vld [vmem:[#allocation5 + $0xdcc] ss:$16 sps:$4 sm:$0xff]   ;;  %v8942_v16 = vld [vmem:[#allocation5 + $0xdc0] ss:$16 sps:$4 sm:$0xff]  }
 0x1fc   :  { %5077 = vmatpush1.bf16.msra.mxu0 %v8850_v18  ;;  %5569 = vmatpush1.bf16.msra.mxu1 %v8853_v20  ;;  %v8945_v18 = vld [vmem:[#allocation5 + $0xdc8] ss:$16 sps:$4 sm:$0xff]   ;;  %v8950_v20 = vld [vmem:[#allocation5 + $0xde4] ss:$16 sps:$4 sm:$0xff]  }
 0x1fd   :  { %5087 = vmatprep.subr.bf16.mxu0 %v8860_v11  ;;  %5579 = vmatprep.subr.bf16.mxu1 %v8863_v21  ;;  %v8953_v11 = vld [vmem:[#allocation5 + $0xdec] ss:$16 sps:$4 sm:$0xff]   ;;  %v8948_v21 = vld [vmem:[#allocation5 + $0xde0] ss:$16 sps:$4 sm:$0xff]  }
 0x1ff   :  { %5079 = vmatmul.mubr.bf16.vlgmr.msra.gmra.mrb[0].mxu0 %v7167_v14  ;;  %5571 = vmatmul.mubr.bf16.vlgmr.msra.gmra.mrb[0].mxu1 %v7167_v14  ;;  %v8951_v14 = vld [vmem:[#allocation5 + $0xde8] ss:$16 sps:$4 sm:$0xff]  }
 0x200   :  { %5088 = vmatpush1.bf16.msra.mxu0 %v8858_v23  ;;  %5580 = vmatpush1.bf16.msra.mxu1 %v8861_v24  ;;  %v8958_v23 = vld [vmem:[#allocation5 + $0xe04] ss:$16 sps:$4 sm:$0xff]   ;;  %v8961_v24 = vld [vmem:[#allocation5 + $0xe0c] ss:$16 sps:$4 sm:$0xff]  }
 0x201   :  { %5089 = vmatprep.subr.bf16.mxu0 %v8866_v25  ;;  %5581 = vmatprep.subr.bf16.mxu1 %v8869_v17  ;;  %v10026_v25 = vld [vmem:[#allocation2 + $0x38] sm:$0xff]  ;;  %v7169_v17 = vcombine.low %v10020_v22, %v10020_v22  ;;  %v8970_v22 = vld [vmem:[#allocation5 + $0xe44] ss:$16 sps:$4 sm:$0xff]  }
 0x202   :  { %5119 = vmatprep.mubr.bf16.mxu0 %v7170_v26  ;;  %5611 = vmatprep.mubr.bf16.mxu1 %v7170_v26  ;;  %v8956_v26 = vld [vmem:[#allocation5 + $0xe00] ss:$16 sps:$4 sm:$0xff]  }
 0x204   :  { %5090 = vmatpush1.bf16.msra.mxu0 %v8864_v27  ;;  %5582 = vmatpush1.bf16.msra.mxu1 %v8867_v28  ;;  %v8959_v27 = vld [vmem:[#allocation5 + $0xe08] ss:$16 sps:$4 sm:$0xff]   ;;  %v8964_v28 = vld [vmem:[#allocation5 + $0xe24] ss:$16 sps:$4 sm:$0xff]  }
 0x205   :  { %5091 = vmatprep.subr.bf16.mxu0 %v8872_v19  ;;  %5583 = vmatprep.subr.bf16.mxu1 %v8875_v29  ;;  %v8967_v19 = vld [vmem:[#allocation5 + $0xe2c] ss:$16 sps:$4 sm:$0xff]   ;;  %v7172_v29 = vcombine.high %v10026_v25, %v10026_v25 }
 0x208   :  { %5092 = vmatpush1.bf16.msra.mxu0 %v8870_v30  ;;  %5584 = vmatpush1.bf16.msra.mxu1 %v8873_v31  ;;  %v8962_v30 = vld [vmem:[#allocation5 + $0xe20] ss:$16 sps:$4 sm:$0xff]   ;;  %v8965_v31 = vld [vmem:[#allocation5 + $0xe28] ss:$16 sps:$4 sm:$0xff]  }
 0x209   :  { %5093 = vmatprep.subr.bf16.mxu0 %v8878_v32  ;;  %5585 = vmatprep.subr.bf16.mxu1 %v8881_v33  ;;  %v8973_v32 = vld [vmem:[#allocation5 + $0xe4c] ss:$16 sps:$4 sm:$0xff]   ;;  %v8968_v33 = vld [vmem:[#allocation5 + $0xe40] ss:$16 sps:$4 sm:$0xff]  }
 0x20c   :  { %5094 = vmatpush1.bf16.msra.mxu0 %v8876_v34  ;;  %5586 = vmatpush1.bf16.msra.mxu1 %v8879_v35  ;;  %v8971_v34 = vld [vmem:[#allocation5 + $0xe48] ss:$16 sps:$4 sm:$0xff]   ;;  %v8976_v35 = vld [vmem:[#allocation5 + $0xe64] ss:$16 sps:$4 sm:$0xff]  }
 0x20d   :  { %5095 = vmatprep.subr.bf16.mxu0 %v8884_v36  ;;  %5587 = vmatprep.subr.bf16.mxu1 %v8887_v37  ;;  %v8979_v36 = vld [vmem:[#allocation5 + $0xe6c] ss:$16 sps:$4 sm:$0xff]   ;;  %v8974_v37 = vld [vmem:[#allocation5 + $0xe60] ss:$16 sps:$4 sm:$0xff]  }
 0x210   :  { %5096 = vmatpush1.bf16.msra.mxu0 %v8882_v38  ;;  %5588 = vmatpush1.bf16.msra.mxu1 %v8885_v39  ;;  %v8977_v38 = vld [vmem:[#allocation5 + $0xe68] ss:$16 sps:$4 sm:$0xff]   ;;  %v8982_v39 = vld [vmem:[#allocation5 + $0xe84] ss:$16 sps:$4 sm:$0xff]  }
 0x211   :  { %5097 = vmatprep.subr.bf16.mxu0 %v8890_v40  ;;  %5589 = vmatprep.subr.bf16.mxu1 %v8893_v41  ;;  %v8985_v40 = vld [vmem:[#allocation5 + $0xe8c] ss:$16 sps:$4 sm:$0xff]   ;;  %v8980_v41 = vld [vmem:[#allocation5 + $0xe80] ss:$16 sps:$4 sm:$0xff]  }
 0x214   :  { %5098 = vmatpush1.bf16.msra.mxu0 %v8888_v42  ;;  %5590 = vmatpush1.bf16.msra.mxu1 %v8891_v43  ;;  %v8983_v42 = vld [vmem:[#allocation5 + $0xe88] ss:$16 sps:$4 sm:$0xff]   ;;  %v8988_v43 = vld [vmem:[#allocation5 + $0xea4] ss:$16 sps:$4 sm:$0xff]  }
 0x215   :  { %5099 = vmatprep.subr.bf16.mxu0 %v8896_v44  ;;  %5591 = vmatprep.subr.bf16.mxu1 %v8899_v45  ;;  %v8991_v44 = vld [vmem:[#allocation5 + $0xeac] ss:$16 sps:$4 sm:$0xff]   ;;  %v8986_v45 = vld [vmem:[#allocation5 + $0xea0] ss:$16 sps:$4 sm:$0xff]  }
 0x218   :  { %5100 = vmatpush1.bf16.msra.mxu0 %v8894_v46  ;;  %5592 = vmatpush1.bf16.msra.mxu1 %v8897_v47  ;;  %v8989_v46 = vld [vmem:[#allocation5 + $0xea8] ss:$16 sps:$4 sm:$0xff]   ;;  %v8994_v47 = vld [vmem:[#allocation5 + $0xec4] ss:$16 sps:$4 sm:$0xff]  }
 0x219   :  { %5101 = vmatprep.subr.bf16.mxu0 %v8902_v48  ;;  %5593 = vmatprep.subr.bf16.mxu1 %v8905_v49  ;;  %v8997_v48 = vld [vmem:[#allocation5 + $0xecc] ss:$16 sps:$4 sm:$0xff]   ;;  %v8992_v49 = vld [vmem:[#allocation5 + $0xec0] ss:$16 sps:$4 sm:$0xff]  }
 0x21c   :  { %5102 = vmatpush1.bf16.msra.mxu0 %v8900_v50  ;;  %5594 = vmatpush1.bf16.msra.mxu1 %v8903_v51  ;;  %v8995_v50 = vld [vmem:[#allocation5 + $0xec8] ss:$16 sps:$4 sm:$0xff]   ;;  %v9000_v51 = vld [vmem:[#allocation5 + $0xee4] ss:$16 sps:$4 sm:$0xff]  }
 0x21d   :  { %5103 = vmatprep.subr.bf16.mxu0 %v8908_v52  ;;  %5595 = vmatprep.subr.bf16.mxu1 %v8911_v53  ;;  %v9003_v52 = vld [vmem:[#allocation5 + $0xeec] ss:$16 sps:$4 sm:$0xff]   ;;  %v8998_v53 = vld [vmem:[#allocation5 + $0xee0] ss:$16 sps:$4 sm:$0xff]  }
 0x220   :  { %5104 = vmatpush1.bf16.msra.mxu0 %v8906_v54  ;;  %5596 = vmatpush1.bf16.msra.mxu1 %v8909_v55  ;;  %v9001_v54 = vld [vmem:[#allocation5 + $0xee8] ss:$16 sps:$4 sm:$0xff]   ;;  %v9006_v55 = vld [vmem:[#allocation5 + $0xf04] ss:$16 sps:$4 sm:$0xff]  }
 0x221   :  { %5105 = vmatprep.subr.bf16.mxu0 %v8914_v56  ;;  %5597 = vmatprep.subr.bf16.mxu1 %v8917_v57  ;;  %v9009_v56 = vld [vmem:[#allocation5 + $0xf0c] ss:$16 sps:$4 sm:$0xff]   ;;  %v9004_v57 = vld [vmem:[#allocation5 + $0xf00] ss:$16 sps:$4 sm:$0xff]  }
 0x224   :  { %5106 = vmatpush1.bf16.msra.mxu0 %v8912_v58  ;;  %5598 = vmatpush1.bf16.msra.mxu1 %v8915_v59  ;;  %v9007_v58 = vld [vmem:[#allocation5 + $0xf08] ss:$16 sps:$4 sm:$0xff]   ;;  %v9012_v59 = vld [vmem:[#allocation5 + $0xf24] ss:$16 sps:$4 sm:$0xff]  }
 0x225   :  { %5107 = vmatprep.subr.bf16.mxu0 %v8920_v60  ;;  %5599 = vmatprep.subr.bf16.mxu1 %v8923_v61  ;;  %v9015_v60 = vld [vmem:[#allocation5 + $0xf2c] ss:$16 sps:$4 sm:$0xff]   ;;  %v9010_v61 = vld [vmem:[#allocation5 + $0xf20] ss:$16 sps:$4 sm:$0xff]  }
 0x228   :  { %5108 = vmatpush1.bf16.msra.mxu0 %v8918_v62  ;;  %5600 = vmatpush1.bf16.msra.mxu1 %v8921_v63  ;;  %v9013_v62 = vld [vmem:[#allocation5 + $0xf28] ss:$16 sps:$4 sm:$0xff]   ;;  %v9018_v63 = vld [vmem:[#allocation5 + $0xf44] ss:$16 sps:$4 sm:$0xff]  }
 0x229   :  { %5109 = vmatprep.subr.bf16.mxu0 %v8926_v0  ;;  %5601 = vmatprep.subr.bf16.mxu1 %v8929_v1  ;;  %v9021_v0 = vld [vmem:[#allocation5 + $0xf4c] ss:$16 sps:$4 sm:$0xff]   ;;  %v9016_v1 = vld [vmem:[#allocation5 + $0xf40] ss:$16 sps:$4 sm:$0xff]  }
 0x22c   :  { %5110 = vmatpush1.bf16.msra.mxu0 %v8924_v2  ;;  %5602 = vmatpush1.bf16.msra.mxu1 %v8927_v3  ;;  %v9019_v2 = vld [vmem:[#allocation5 + $0xf48] ss:$16 sps:$4 sm:$0xff]   ;;  %v9024_v3 = vld [vmem:[#allocation5 + $0xf64] ss:$16 sps:$4 sm:$0xff]  }
 0x22d   :  { %5111 = vmatprep.subr.bf16.mxu0 %v8932_v4  ;;  %5603 = vmatprep.subr.bf16.mxu1 %v8935_v5  ;;  %v9027_v4 = vld [vmem:[#allocation5 + $0xf6c] ss:$16 sps:$4 sm:$0xff]   ;;  %v9022_v5 = vld [vmem:[#allocation5 + $0xf60] ss:$16 sps:$4 sm:$0xff]  }
 0x230   :  { %5112 = vmatpush1.bf16.msra.mxu0 %v8930_v6  ;;  %5604 = vmatpush1.bf16.msra.mxu1 %v8933_v7  ;;  %v9025_v6 = vld [vmem:[#allocation5 + $0xf68] ss:$16 sps:$4 sm:$0xff]   ;;  %v9030_v7 = vld [vmem:[#allocation5 + $0xf84] ss:$16 sps:$4 sm:$0xff]  }
 0x231   :  { %5113 = vmatprep.subr.bf16.mxu0 %v8938_v8  ;;  %5605 = vmatprep.subr.bf16.mxu1 %v8941_v9  ;;  %v9033_v8 = vld [vmem:[#allocation5 + $0xf8c] ss:$16 sps:$4 sm:$0xff]   ;;  %v9028_v9 = vld [vmem:[#allocation5 + $0xf80] ss:$16 sps:$4 sm:$0xff]  }
 0x234   :  { %5114 = vmatpush1.bf16.msra.mxu0 %v8936_v10  ;;  %5606 = vmatpush1.bf16.msra.mxu1 %v8939_v12  ;;  %v9031_v10 = vld [vmem:[#allocation5 + $0xf88] ss:$16 sps:$4 sm:$0xff]   ;;  %v9036_v12 = vld [vmem:[#allocation5 + $0xfa4] ss:$16 sps:$4 sm:$0xff]  }
 0x235   :  { %5115 = vmatprep.subr.bf16.mxu0 %v8944_v13  ;;  %5607 = vmatprep.subr.bf16.mxu1 %v8947_v15  ;;  %v9039_v13 = vld [vmem:[#allocation5 + $0xfac] ss:$16 sps:$4 sm:$0xff]   ;;  %v9034_v15 = vld [vmem:[#allocation5 + $0xfa0] ss:$16 sps:$4 sm:$0xff]  }
 0x238   :  { %5116 = vmatpush1.bf16.msra.mxu0 %v8942_v16  ;;  %5608 = vmatpush1.bf16.msra.mxu1 %v8945_v18  ;;  %v9037_v16 = vld [vmem:[#allocation5 + $0xfa8] ss:$16 sps:$4 sm:$0xff]   ;;  %v9042_v18 = vld [vmem:[#allocation5 + $0xfc4] ss:$16 sps:$4 sm:$0xff]  }
 0x239   :  { %5117 = vmatprep.subr.bf16.mxu0 %v8950_v20  ;;  %5609 = vmatprep.subr.bf16.mxu1 %v8953_v11  ;;  %v9045_v20 = vld [vmem:[#allocation5 + $0xfcc] ss:$16 sps:$4 sm:$0xff]   ;;  %v9040_v11 = vld [vmem:[#allocation5 + $0xfc0] ss:$16 sps:$4 sm:$0xff]  }
 0x23c   :  { %5118 = vmatpush1.bf16.msra.mxu0 %v8948_v21  ;;  %5610 = vmatpush1.bf16.msra.mxu1 %v8951_v14  ;;  %v9043_v21 = vld [vmem:[#allocation5 + $0xfc8] ss:$16 sps:$4 sm:$0xff]   ;;  %v9048_v14 = vld [vmem:[#allocation5 + $0xfe4] ss:$16 sps:$4 sm:$0xff]  }
 0x23d   :  { %5128 = vmatprep.subr.bf16.mxu0 %v8958_v23  ;;  %5620 = vmatprep.subr.bf16.mxu1 %v8961_v24  ;;  %v9051_v23 = vld [vmem:[#allocation5 + $0xfec] ss:$16 sps:$4 sm:$0xff]   ;;  %v9046_v24 = vld [vmem:[#allocation5 + $0xfe0] ss:$16 sps:$4 sm:$0xff]  }
 0x23f   :  { %5120 = vmatmul.mubr.bf16.vlgmr.msra.gmra.mrb[0].mxu0 %v7169_v17  ;;  %5612 = vmatmul.mubr.bf16.vlgmr.msra.gmra.mrb[0].mxu1 %v7169_v17  ;;  %v9049_v17 = vld [vmem:[#allocation5 + $0xfe8] ss:$16 sps:$4 sm:$0xff]  }
 0x240   :  { %5129 = vmatpush1.bf16.msra.mxu0 %v8956_v26  ;;  %5621 = vmatpush1.bf16.msra.mxu1 %v8959_v27  ;;  %v9056_v26 = vld [vmem:[#allocation5 + $0x1004] ss:$16 sps:$4 sm:$0xff]   ;;  %v9059_v27 = vld [vmem:[#allocation5 + $0x100c] ss:$16 sps:$4 sm:$0xff]  }
 0x241   :  { %5130 = vmatprep.subr.bf16.mxu0 %v8964_v28  ;;  %5622 = vmatprep.subr.bf16.mxu1 %v8967_v19  ;;  %v10032_v28 = vld [vmem:[#allocation2 + $0x40] sm:$0xff]  ;;  %v7171_v19 = vcombine.low %v10026_v25, %v10026_v25 }
 0x242   :  { %5160 = vmatprep.mubr.bf16.mxu0 %v7172_v29  ;;  %5652 = vmatprep.mubr.bf16.mxu1 %v7172_v29  ;;  %v9054_v29 = vld [vmem:[#allocation5 + $0x1000] ss:$16 sps:$4 sm:$0xff]   ;;  %v9068_v25 = vld [vmem:[#allocation5 + $0x1044] ss:$16 sps:$4 sm:$0xff]  }
 0x244   :  { %5131 = vmatpush1.bf16.msra.mxu0 %v8962_v30  ;;  %5623 = vmatpush1.bf16.msra.mxu1 %v8965_v31  ;;  %v9057_v30 = vld [vmem:[#allocation5 + $0x1008] ss:$16 sps:$4 sm:$0xff]   ;;  %v9062_v31 = vld [vmem:[#allocation5 + $0x1024] ss:$16 sps:$4 sm:$0xff]  }
 0x245   :  { %5132 = vmatprep.subr.bf16.mxu0 %v8970_v22  ;;  %5624 = vmatprep.subr.bf16.mxu1 %v8973_v32  ;;  %v9065_v22 = vld [vmem:[#allocation5 + $0x102c] ss:$16 sps:$4 sm:$0xff]   ;;  %v7174_v32 = vcombine.high %v10032_v28, %v10032_v28 }
 0x248   :  { %5133 = vmatpush1.bf16.msra.mxu0 %v8968_v33  ;;  %5625 = vmatpush1.bf16.msra.mxu1 %v8971_v34  ;;  %v9060_v33 = vld [vmem:[#allocation5 + $0x1020] ss:$16 sps:$4 sm:$0xff]   ;;  %v9063_v34 = vld [vmem:[#allocation5 + $0x1028] ss:$16 sps:$4 sm:$0xff]  }
 0x249   :  { %5134 = vmatprep.subr.bf16.mxu0 %v8976_v35  ;;  %5626 = vmatprep.subr.bf16.mxu1 %v8979_v36  ;;  %v9071_v35 = vld [vmem:[#allocation5 + $0x104c] ss:$16 sps:$4 sm:$0xff]   ;;  %v9066_v36 = vld [vmem:[#allocation5 + $0x1040] ss:$16 sps:$4 sm:$0xff]  }
 0x24c   :  { %5135 = vmatpush1.bf16.msra.mxu0 %v8974_v37  ;;  %5627 = vmatpush1.bf16.msra.mxu1 %v8977_v38  ;;  %v9069_v37 = vld [vmem:[#allocation5 + $0x1048] ss:$16 sps:$4 sm:$0xff]   ;;  %v9074_v38 = vld [vmem:[#allocation5 + $0x1064] ss:$16 sps:$4 sm:$0xff]  }
 0x24d   :  { %5136 = vmatprep.subr.bf16.mxu0 %v8982_v39  ;;  %5628 = vmatprep.subr.bf16.mxu1 %v8985_v40  ;;  %v9077_v39 = vld [vmem:[#allocation5 + $0x106c] ss:$16 sps:$4 sm:$0xff]   ;;  %v9072_v40 = vld [vmem:[#allocation5 + $0x1060] ss:$16 sps:$4 sm:$0xff]  }
 0x250   :  { %5137 = vmatpush1.bf16.msra.mxu0 %v8980_v41  ;;  %5629 = vmatpush1.bf16.msra.mxu1 %v8983_v42  ;;  %v9075_v41 = vld [vmem:[#allocation5 + $0x1068] ss:$16 sps:$4 sm:$0xff]   ;;  %v9080_v42 = vld [vmem:[#allocation5 + $0x1084] ss:$16 sps:$4 sm:$0xff]  }
 0x251   :  { %5138 = vmatprep.subr.bf16.mxu0 %v8988_v43  ;;  %5630 = vmatprep.subr.bf16.mxu1 %v8991_v44  ;;  %v9083_v43 = vld [vmem:[#allocation5 + $0x108c] ss:$16 sps:$4 sm:$0xff]   ;;  %v9078_v44 = vld [vmem:[#allocation5 + $0x1080] ss:$16 sps:$4 sm:$0xff]  }
 0x254   :  { %5139 = vmatpush1.bf16.msra.mxu0 %v8986_v45  ;;  %5631 = vmatpush1.bf16.msra.mxu1 %v8989_v46  ;;  %v9081_v45 = vld [vmem:[#allocation5 + $0x1088] ss:$16 sps:$4 sm:$0xff]   ;;  %v9086_v46 = vld [vmem:[#allocation5 + $0x10a4] ss:$16 sps:$4 sm:$0xff]  }
 0x255   :  { %5140 = vmatprep.subr.bf16.mxu0 %v8994_v47  ;;  %5632 = vmatprep.subr.bf16.mxu1 %v8997_v48  ;;  %v9089_v47 = vld [vmem:[#allocation5 + $0x10ac] ss:$16 sps:$4 sm:$0xff]   ;;  %v9084_v48 = vld [vmem:[#allocation5 + $0x10a0] ss:$16 sps:$4 sm:$0xff]  }
 0x258   :  { %5141 = vmatpush1.bf16.msra.mxu0 %v8992_v49  ;;  %5633 = vmatpush1.bf16.msra.mxu1 %v8995_v50  ;;  %v9087_v49 = vld [vmem:[#allocation5 + $0x10a8] ss:$16 sps:$4 sm:$0xff]   ;;  %v9092_v50 = vld [vmem:[#allocation5 + $0x10c4] ss:$16 sps:$4 sm:$0xff]  }
 0x259   :  { %5142 = vmatprep.subr.bf16.mxu0 %v9000_v51  ;;  %5634 = vmatprep.subr.bf16.mxu1 %v9003_v52  ;;  %v9095_v51 = vld [vmem:[#allocation5 + $0x10cc] ss:$16 sps:$4 sm:$0xff]   ;;  %v9090_v52 = vld [vmem:[#allocation5 + $0x10c0] ss:$16 sps:$4 sm:$0xff]  }
 0x25c   :  { %5143 = vmatpush1.bf16.msra.mxu0 %v8998_v53  ;;  %5635 = vmatpush1.bf16.msra.mxu1 %v9001_v54  ;;  %v9093_v53 = vld [vmem:[#allocation5 + $0x10c8] ss:$16 sps:$4 sm:$0xff]   ;;  %v9098_v54 = vld [vmem:[#allocation5 + $0x10e4] ss:$16 sps:$4 sm:$0xff]  }
 0x25d   :  { %5144 = vmatprep.subr.bf16.mxu0 %v9006_v55  ;;  %5636 = vmatprep.subr.bf16.mxu1 %v9009_v56  ;;  %v9101_v55 = vld [vmem:[#allocation5 + $0x10ec] ss:$16 sps:$4 sm:$0xff]   ;;  %v9096_v56 = vld [vmem:[#allocation5 + $0x10e0] ss:$16 sps:$4 sm:$0xff]  }
 0x260   :  { %5145 = vmatpush1.bf16.msra.mxu0 %v9004_v57  ;;  %5637 = vmatpush1.bf16.msra.mxu1 %v9007_v58  ;;  %v9099_v57 = vld [vmem:[#allocation5 + $0x10e8] ss:$16 sps:$4 sm:$0xff]   ;;  %v9104_v58 = vld [vmem:[#allocation5 + $0x1104] ss:$16 sps:$4 sm:$0xff]  }
 0x261   :  { %5146 = vmatprep.subr.bf16.mxu0 %v9012_v59  ;;  %5638 = vmatprep.subr.bf16.mxu1 %v9015_v60  ;;  %v9107_v59 = vld [vmem:[#allocation5 + $0x110c] ss:$16 sps:$4 sm:$0xff]   ;;  %v9102_v60 = vld [vmem:[#allocation5 + $0x1100] ss:$16 sps:$4 sm:$0xff]  }
 0x264   :  { %5147 = vmatpush1.bf16.msra.mxu0 %v9010_v61  ;;  %5639 = vmatpush1.bf16.msra.mxu1 %v9013_v62  ;;  %v9105_v61 = vld [vmem:[#allocation5 + $0x1108] ss:$16 sps:$4 sm:$0xff]   ;;  %v9110_v62 = vld [vmem:[#allocation5 + $0x1124] ss:$16 sps:$4 sm:$0xff]  }
 0x265   :  { %5148 = vmatprep.subr.bf16.mxu0 %v9018_v63  ;;  %5640 = vmatprep.subr.bf16.mxu1 %v9021_v0  ;;  %v9113_v63 = vld [vmem:[#allocation5 + $0x112c] ss:$16 sps:$4 sm:$0xff]   ;;  %v9108_v0 = vld [vmem:[#allocation5 + $0x1120] ss:$16 sps:$4 sm:$0xff]  }
 0x268   :  { %5149 = vmatpush1.bf16.msra.mxu0 %v9016_v1  ;;  %5641 = vmatpush1.bf16.msra.mxu1 %v9019_v2  ;;  %v9111_v1 = vld [vmem:[#allocation5 + $0x1128] ss:$16 sps:$4 sm:$0xff]   ;;  %v9116_v2 = vld [vmem:[#allocation5 + $0x1144] ss:$16 sps:$4 sm:$0xff]  }
 0x269   :  { %5150 = vmatprep.subr.bf16.mxu0 %v9024_v3  ;;  %5642 = vmatprep.subr.bf16.mxu1 %v9027_v4  ;;  %v9119_v3 = vld [vmem:[#allocation5 + $0x114c] ss:$16 sps:$4 sm:$0xff]   ;;  %v9114_v4 = vld [vmem:[#allocation5 + $0x1140] ss:$16 sps:$4 sm:$0xff]  }
 0x26c   :  { %5151 = vmatpush1.bf16.msra.mxu0 %v9022_v5  ;;  %5643 = vmatpush1.bf16.msra.mxu1 %v9025_v6  ;;  %v9117_v5 = vld [vmem:[#allocation5 + $0x1148] ss:$16 sps:$4 sm:$0xff]   ;;  %v9122_v6 = vld [vmem:[#allocation5 + $0x1164] ss:$16 sps:$4 sm:$0xff]  }
 0x26d   :  { %5152 = vmatprep.subr.bf16.mxu0 %v9030_v7  ;;  %5644 = vmatprep.subr.bf16.mxu1 %v9033_v8  ;;  %v9125_v7 = vld [vmem:[#allocation5 + $0x116c] ss:$16 sps:$4 sm:$0xff]   ;;  %v9120_v8 = vld [vmem:[#allocation5 + $0x1160] ss:$16 sps:$4 sm:$0xff]  }
 0x270   :  { %5153 = vmatpush1.bf16.msra.mxu0 %v9028_v9  ;;  %5645 = vmatpush1.bf16.msra.mxu1 %v9031_v10  ;;  %v9123_v9 = vld [vmem:[#allocation5 + $0x1168] ss:$16 sps:$4 sm:$0xff]   ;;  %v9128_v10 = vld [vmem:[#allocation5 + $0x1184] ss:$16 sps:$4 sm:$0xff]  }
 0x271   :  { %5154 = vmatprep.subr.bf16.mxu0 %v9036_v12  ;;  %5646 = vmatprep.subr.bf16.mxu1 %v9039_v13  ;;  %v9131_v12 = vld [vmem:[#allocation5 + $0x118c] ss:$16 sps:$4 sm:$0xff]   ;;  %v9126_v13 = vld [vmem:[#allocation5 + $0x1180] ss:$16 sps:$4 sm:$0xff]  }
 0x274   :  { %5155 = vmatpush1.bf16.msra.mxu0 %v9034_v15  ;;  %5647 = vmatpush1.bf16.msra.mxu1 %v9037_v16  ;;  %v9129_v15 = vld [vmem:[#allocation5 + $0x1188] ss:$16 sps:$4 sm:$0xff]   ;;  %v9134_v16 = vld [vmem:[#allocation5 + $0x11a4] ss:$16 sps:$4 sm:$0xff]  }
 0x275   :  { %5156 = vmatprep.subr.bf16.mxu0 %v9042_v18  ;;  %5648 = vmatprep.subr.bf16.mxu1 %v9045_v20  ;;  %v9137_v18 = vld [vmem:[#allocation5 + $0x11ac] ss:$16 sps:$4 sm:$0xff]   ;;  %v9132_v20 = vld [vmem:[#allocation5 + $0x11a0] ss:$16 sps:$4 sm:$0xff]  }
 0x278   :  { %5157 = vmatpush1.bf16.msra.mxu0 %v9040_v11  ;;  %5649 = vmatpush1.bf16.msra.mxu1 %v9043_v21  ;;  %v9135_v11 = vld [vmem:[#allocation5 + $0x11a8] ss:$16 sps:$4 sm:$0xff]   ;;  %v9140_v21 = vld [vmem:[#allocation5 + $0x11c4] ss:$16 sps:$4 sm:$0xff]  }
 0x279   :  { %5158 = vmatprep.subr.bf16.mxu0 %v9048_v14  ;;  %5650 = vmatprep.subr.bf16.mxu1 %v9051_v23  ;;  %v9143_v14 = vld [vmem:[#allocation5 + $0x11cc] ss:$16 sps:$4 sm:$0xff]   ;;  %v9138_v23 = vld [vmem:[#allocation5 + $0x11c0] ss:$16 sps:$4 sm:$0xff]  }
 0x27c   :  { %5159 = vmatpush1.bf16.msra.mxu0 %v9046_v24  ;;  %5651 = vmatpush1.bf16.msra.mxu1 %v9049_v17  ;;  %v9141_v24 = vld [vmem:[#allocation5 + $0x11c8] ss:$16 sps:$4 sm:$0xff]   ;;  %v9146_v17 = vld [vmem:[#allocation5 + $0x11e4] ss:$16 sps:$4 sm:$0xff]  }
 0x27d   :  { %5169 = vmatprep.subr.bf16.mxu0 %v9056_v26  ;;  %5661 = vmatprep.subr.bf16.mxu1 %v9059_v27  ;;  %v9149_v26 = vld [vmem:[#allocation5 + $0x11ec] ss:$16 sps:$4 sm:$0xff]   ;;  %v9144_v27 = vld [vmem:[#allocation5 + $0x11e0] ss:$16 sps:$4 sm:$0xff]  }
 0x27f   :  { %5161 = vmatmul.mubr.bf16.vlgmr.msra.gmra.mrb[0].mxu0 %v7171_v19  ;;  %5653 = vmatmul.mubr.bf16.vlgmr.msra.gmra.mrb[0].mxu1 %v7171_v19  ;;  %v9147_v19 = vld [vmem:[#allocation5 + $0x11e8] ss:$16 sps:$4 sm:$0xff]  }
 0x280   :  { %5170 = vmatpush1.bf16.msra.mxu0 %v9054_v29  ;;  %5662 = vmatpush1.bf16.msra.mxu1 %v9057_v30  ;;  %v9154_v29 = vld [vmem:[#allocation5 + $0x1204] ss:$16 sps:$4 sm:$0xff]   ;;  %v9157_v30 = vld [vmem:[#allocation5 + $0x120c] ss:$16 sps:$4 sm:$0xff]  }
 0x281   :  { %5171 = vmatprep.subr.bf16.mxu0 %v9062_v31  ;;  %5663 = vmatprep.subr.bf16.mxu1 %v9065_v22  ;;  %v7173_v31 = vcombine.low %v10032_v28, %v10032_v28  ;;  %v10040_v22 = vld [vmem:[#allocation2 + $0x48] sm:$0xff]  ;;  %v9166_v28 = vld [vmem:[#allocation5 + $0x1244] ss:$16 sps:$4 sm:$0xff]  }
 0x282   :  { %5201 = vmatprep.mubr.bf16.mxu0 %v7174_v32  ;;  %5693 = vmatprep.mubr.bf16.mxu1 %v7174_v32  ;;  %v9152_v32 = vld [vmem:[#allocation5 + $0x1200] ss:$16 sps:$4 sm:$0xff]  }
 0x284   :  { %5172 = vmatpush1.bf16.msra.mxu0 %v9060_v33  ;;  %5664 = vmatpush1.bf16.msra.mxu1 %v9063_v34  ;;  %v9155_v33 = vld [vmem:[#allocation5 + $0x1208] ss:$16 sps:$4 sm:$0xff]   ;;  %v9160_v34 = vld [vmem:[#allocation5 + $0x1224] ss:$16 sps:$4 sm:$0xff]  }
 0x285   :  { %5173 = vmatprep.subr.bf16.mxu0 %v9068_v25  ;;  %5665 = vmatprep.subr.bf16.mxu1 %v9071_v35  ;;  %v9163_v25 = vld [vmem:[#allocation5 + $0x122c] ss:$16 sps:$4 sm:$0xff]   ;;  %v7176_v35 = vcombine.high %v10040_v22, %v10040_v22 }
 0x288   :  { %5174 = vmatpush1.bf16.msra.mxu0 %v9066_v36  ;;  %5666 = vmatpush1.bf16.msra.mxu1 %v9069_v37  ;;  %v9158_v36 = vld [vmem:[#allocation5 + $0x1220] ss:$16 sps:$4 sm:$0xff]   ;;  %v9161_v37 = vld [vmem:[#allocation5 + $0x1228] ss:$16 sps:$4 sm:$0xff]  }
 0x289   :  { %5175 = vmatprep.subr.bf16.mxu0 %v9074_v38  ;;  %5667 = vmatprep.subr.bf16.mxu1 %v9077_v39  ;;  %v9169_v38 = vld [vmem:[#allocation5 + $0x124c] ss:$16 sps:$4 sm:$0xff]   ;;  %v9164_v39 = vld [vmem:[#allocation5 + $0x1240] ss:$16 sps:$4 sm:$0xff]  }
 0x28c   :  { %5176 = vmatpush1.bf16.msra.mxu0 %v9072_v40  ;;  %5668 = vmatpush1.bf16.msra.mxu1 %v9075_v41  ;;  %v9167_v40 = vld [vmem:[#allocation5 + $0x1248] ss:$16 sps:$4 sm:$0xff]   ;;  %v9172_v41 = vld [vmem:[#allocation5 + $0x1264] ss:$16 sps:$4 sm:$0xff]  }
 0x28d   :  { %5177 = vmatprep.subr.bf16.mxu0 %v9080_v42  ;;  %5669 = vmatprep.subr.bf16.mxu1 %v9083_v43  ;;  %v9175_v42 = vld [vmem:[#allocation5 + $0x126c] ss:$16 sps:$4 sm:$0xff]   ;;  %v9170_v43 = vld [vmem:[#allocation5 + $0x1260] ss:$16 sps:$4 sm:$0xff]  }
 0x290   :  { %5178 = vmatpush1.bf16.msra.mxu0 %v9078_v44  ;;  %5670 = vmatpush1.bf16.msra.mxu1 %v9081_v45  ;;  %v9173_v44 = vld [vmem:[#allocation5 + $0x1268] ss:$16 sps:$4 sm:$0xff]   ;;  %v9178_v45 = vld [vmem:[#allocation5 + $0x1284] ss:$16 sps:$4 sm:$0xff]  }
 0x291   :  { %5179 = vmatprep.subr.bf16.mxu0 %v9086_v46  ;;  %5671 = vmatprep.subr.bf16.mxu1 %v9089_v47  ;;  %v9181_v46 = vld [vmem:[#allocation5 + $0x128c] ss:$16 sps:$4 sm:$0xff]   ;;  %v9176_v47 = vld [vmem:[#allocation5 + $0x1280] ss:$16 sps:$4 sm:$0xff]  }
 0x294   :  { %5180 = vmatpush1.bf16.msra.mxu0 %v9084_v48  ;;  %5672 = vmatpush1.bf16.msra.mxu1 %v9087_v49  ;;  %v9179_v48 = vld [vmem:[#allocation5 + $0x1288] ss:$16 sps:$4 sm:$0xff]   ;;  %v9184_v49 = vld [vmem:[#allocation5 + $0x12a4] ss:$16 sps:$4 sm:$0xff]  }
 0x295   :  { %5181 = vmatprep.subr.bf16.mxu0 %v9092_v50  ;;  %5673 = vmatprep.subr.bf16.mxu1 %v9095_v51  ;;  %v9187_v50 = vld [vmem:[#allocation5 + $0x12ac] ss:$16 sps:$4 sm:$0xff]   ;;  %v9182_v51 = vld [vmem:[#allocation5 + $0x12a0] ss:$16 sps:$4 sm:$0xff]  }
 0x298   :  { %5182 = vmatpush1.bf16.msra.mxu0 %v9090_v52  ;;  %5674 = vmatpush1.bf16.msra.mxu1 %v9093_v53  ;;  %v9185_v52 = vld [vmem:[#allocation5 + $0x12a8] ss:$16 sps:$4 sm:$0xff]   ;;  %v9190_v53 = vld [vmem:[#allocation5 + $0x12c4] ss:$16 sps:$4 sm:$0xff]  }
 0x299   :  { %5183 = vmatprep.subr.bf16.mxu0 %v9098_v54  ;;  %5675 = vmatprep.subr.bf16.mxu1 %v9101_v55  ;;  %v9193_v54 = vld [vmem:[#allocation5 + $0x12cc] ss:$16 sps:$4 sm:$0xff]   ;;  %v9188_v55 = vld [vmem:[#allocation5 + $0x12c0] ss:$16 sps:$4 sm:$0xff]  }
 0x29c   :  { %5184 = vmatpush1.bf16.msra.mxu0 %v9096_v56  ;;  %5676 = vmatpush1.bf16.msra.mxu1 %v9099_v57  ;;  %v9191_v56 = vld [vmem:[#allocation5 + $0x12c8] ss:$16 sps:$4 sm:$0xff]   ;;  %v9196_v57 = vld [vmem:[#allocation5 + $0x12e4] ss:$16 sps:$4 sm:$0xff]  }
 0x29d   :  { %5185 = vmatprep.subr.bf16.mxu0 %v9104_v58  ;;  %5677 = vmatprep.subr.bf16.mxu1 %v9107_v59  ;;  %v9199_v58 = vld [vmem:[#allocation5 + $0x12ec] ss:$16 sps:$4 sm:$0xff]   ;;  %v9194_v59 = vld [vmem:[#allocation5 + $0x12e0] ss:$16 sps:$4 sm:$0xff]  }
 0x2a0   :  { %5186 = vmatpush1.bf16.msra.mxu0 %v9102_v60  ;;  %5678 = vmatpush1.bf16.msra.mxu1 %v9105_v61  ;;  %v9197_v60 = vld [vmem:[#allocation5 + $0x12e8] ss:$16 sps:$4 sm:$0xff]   ;;  %v9202_v61 = vld [vmem:[#allocation5 + $0x1304] ss:$16 sps:$4 sm:$0xff]  }
 0x2a1   :  { %5187 = vmatprep.subr.bf16.mxu0 %v9110_v62  ;;  %5679 = vmatprep.subr.bf16.mxu1 %v9113_v63  ;;  %v9205_v62 = vld [vmem:[#allocation5 + $0x130c] ss:$16 sps:$4 sm:$0xff]   ;;  %v9200_v63 = vld [vmem:[#allocation5 + $0x1300] ss:$16 sps:$4 sm:$0xff]  }
 0x2a4   :  { %5188 = vmatpush1.bf16.msra.mxu0 %v9108_v0  ;;  %5680 = vmatpush1.bf16.msra.mxu1 %v9111_v1  ;;  %v9203_v0 = vld [vmem:[#allocation5 + $0x1308] ss:$16 sps:$4 sm:$0xff]   ;;  %v9208_v1 = vld [vmem:[#allocation5 + $0x1324] ss:$16 sps:$4 sm:$0xff]  }
 0x2a5   :  { %5189 = vmatprep.subr.bf16.mxu0 %v9116_v2  ;;  %5681 = vmatprep.subr.bf16.mxu1 %v9119_v3  ;;  %v9211_v2 = vld [vmem:[#allocation5 + $0x132c] ss:$16 sps:$4 sm:$0xff]   ;;  %v9206_v3 = vld [vmem:[#allocation5 + $0x1320] ss:$16 sps:$4 sm:$0xff]  }
 0x2a8   :  { %5190 = vmatpush1.bf16.msra.mxu0 %v9114_v4  ;;  %5682 = vmatpush1.bf16.msra.mxu1 %v9117_v5  ;;  %v9209_v4 = vld [vmem:[#allocation5 + $0x1328] ss:$16 sps:$4 sm:$0xff]   ;;  %v9214_v5 = vld [vmem:[#allocation5 + $0x1344] ss:$16 sps:$4 sm:$0xff]  }
 0x2a9   :  { %5191 = vmatprep.subr.bf16.mxu0 %v9122_v6  ;;  %5683 = vmatprep.subr.bf16.mxu1 %v9125_v7  ;;  %v9217_v6 = vld [vmem:[#allocation5 + $0x134c] ss:$16 sps:$4 sm:$0xff]   ;;  %v9212_v7 = vld [vmem:[#allocation5 + $0x1340] ss:$16 sps:$4 sm:$0xff]  }
 0x2ac   :  { %5192 = vmatpush1.bf16.msra.mxu0 %v9120_v8  ;;  %5684 = vmatpush1.bf16.msra.mxu1 %v9123_v9  ;;  %v9215_v8 = vld [vmem:[#allocation5 + $0x1348] ss:$16 sps:$4 sm:$0xff]   ;;  %v9220_v9 = vld [vmem:[#allocation5 + $0x1364] ss:$16 sps:$4 sm:$0xff]  }
 0x2ad   :  { %5193 = vmatprep.subr.bf16.mxu0 %v9128_v10  ;;  %5685 = vmatprep.subr.bf16.mxu1 %v9131_v12  ;;  %v9223_v10 = vld [vmem:[#allocation5 + $0x136c] ss:$16 sps:$4 sm:$0xff]   ;;  %v9218_v12 = vld [vmem:[#allocation5 + $0x1360] ss:$16 sps:$4 sm:$0xff]  }
 0x2b0   :  { %5194 = vmatpush1.bf16.msra.mxu0 %v9126_v13  ;;  %5686 = vmatpush1.bf16.msra.mxu1 %v9129_v15  ;;  %v9221_v13 = vld [vmem:[#allocation5 + $0x1368] ss:$16 sps:$4 sm:$0xff]   ;;  %v9226_v15 = vld [vmem:[#allocation5 + $0x1384] ss:$16 sps:$4 sm:$0xff]  }
 0x2b1   :  { %5195 = vmatprep.subr.bf16.mxu0 %v9134_v16  ;;  %5687 = vmatprep.subr.bf16.mxu1 %v9137_v18  ;;  %v9229_v16 = vld [vmem:[#allocation5 + $0x138c] ss:$16 sps:$4 sm:$0xff]   ;;  %v9224_v18 = vld [vmem:[#allocation5 + $0x1380] ss:$16 sps:$4 sm:$0xff]  }
 0x2b4   :  { %5196 = vmatpush1.bf16.msra.mxu0 %v9132_v20  ;;  %5688 = vmatpush1.bf16.msra.mxu1 %v9135_v11  ;;  %v9227_v20 = vld [vmem:[#allocation5 + $0x1388] ss:$16 sps:$4 sm:$0xff]   ;;  %v9232_v11 = vld [vmem:[#allocation5 + $0x13a4] ss:$16 sps:$4 sm:$0xff]  }
 0x2b5   :  { %5197 = vmatprep.subr.bf16.mxu0 %v9140_v21  ;;  %5689 = vmatprep.subr.bf16.mxu1 %v9143_v14  ;;  %v9235_v21 = vld [vmem:[#allocation5 + $0x13ac] ss:$16 sps:$4 sm:$0xff]   ;;  %v9230_v14 = vld [vmem:[#allocation5 + $0x13a0] ss:$16 sps:$4 sm:$0xff]  }
 0x2b8   :  { %5198 = vmatpush1.bf16.msra.mxu0 %v9138_v23  ;;  %5690 = vmatpush1.bf16.msra.mxu1 %v9141_v24  ;;  %v9233_v23 = vld [vmem:[#allocation5 + $0x13a8] ss:$16 sps:$4 sm:$0xff]   ;;  %v9238_v24 = vld [vmem:[#allocation5 + $0x13c4] ss:$16 sps:$4 sm:$0xff]  }
 0x2b9   :  { %5199 = vmatprep.subr.bf16.mxu0 %v9146_v17  ;;  %5691 = vmatprep.subr.bf16.mxu1 %v9149_v26  ;;  %v9241_v17 = vld [vmem:[#allocation5 + $0x13cc] ss:$16 sps:$4 sm:$0xff]   ;;  %v9236_v26 = vld [vmem:[#allocation5 + $0x13c0] ss:$16 sps:$4 sm:$0xff]  }
 0x2bc   :  { %5200 = vmatpush1.bf16.msra.mxu0 %v9144_v27  ;;  %5692 = vmatpush1.bf16.msra.mxu1 %v9147_v19  ;;  %v9239_v27 = vld [vmem:[#allocation5 + $0x13c8] ss:$16 sps:$4 sm:$0xff]   ;;  %v9244_v19 = vld [vmem:[#allocation5 + $0x13e4] ss:$16 sps:$4 sm:$0xff]  }
 0x2bd   :  { %5210 = vmatprep.subr.bf16.mxu0 %v9154_v29  ;;  %5702 = vmatprep.subr.bf16.mxu1 %v9157_v30  ;;  %v9247_v29 = vld [vmem:[#allocation5 + $0x13ec] ss:$16 sps:$4 sm:$0xff]   ;;  %v9242_v30 = vld [vmem:[#allocation5 + $0x13e0] ss:$16 sps:$4 sm:$0xff]  }
 0x2bf   :  { %5202 = vmatmul.mubr.bf16.vlgmr.msra.gmra.mrb[0].mxu0 %v7173_v31  ;;  %5694 = vmatmul.mubr.bf16.vlgmr.msra.gmra.mrb[0].mxu1 %v7173_v31  ;;  %v9245_v31 = vld [vmem:[#allocation5 + $0x13e8] ss:$16 sps:$4 sm:$0xff]  }
 0x2c0   :  { %5211 = vmatpush1.bf16.msra.mxu0 %v9152_v32  ;;  %5703 = vmatpush1.bf16.msra.mxu1 %v9155_v33  ;;  %v9252_v32 = vld [vmem:[#allocation5 + $0x1404] ss:$16 sps:$4 sm:$0xff]   ;;  %v9255_v33 = vld [vmem:[#allocation5 + $0x140c] ss:$16 sps:$4 sm:$0xff]  }
 0x2c1   :  { %5212 = vmatprep.subr.bf16.mxu0 %v9160_v34  ;;  %5704 = vmatprep.subr.bf16.mxu1 %v9163_v25  ;;  %v7175_v34 = vcombine.low %v10040_v22, %v10040_v22  ;;  %v10046_v25 = vld [vmem:[#allocation2 + $0x50] sm:$0xff] }
 0x2c2   :  { %5242 = vmatprep.mubr.bf16.mxu0 %v7176_v35  ;;  %5734 = vmatprep.mubr.bf16.mxu1 %v7176_v35  ;;  %v9250_v35 = vld [vmem:[#allocation5 + $0x1400] ss:$16 sps:$4 sm:$0xff]   ;;  %v9264_v22 = vld [vmem:[#allocation5 + $0x1444] ss:$16 sps:$4 sm:$0xff]  }
 0x2c4   :  { %5213 = vmatpush1.bf16.msra.mxu0 %v9158_v36  ;;  %5705 = vmatpush1.bf16.msra.mxu1 %v9161_v37  ;;  %v9253_v36 = vld [vmem:[#allocation5 + $0x1408] ss:$16 sps:$4 sm:$0xff]   ;;  %v9258_v37 = vld [vmem:[#allocation5 + $0x1424] ss:$16 sps:$4 sm:$0xff]  }
 0x2c5   :  { %5214 = vmatprep.subr.bf16.mxu0 %v9166_v28  ;;  %5706 = vmatprep.subr.bf16.mxu1 %v9169_v38  ;;  %v9261_v28 = vld [vmem:[#allocation5 + $0x142c] ss:$16 sps:$4 sm:$0xff]   ;;  %v7178_v38 = vcombine.high %v10046_v25, %v10046_v25 }
 0x2c8   :  { %5215 = vmatpush1.bf16.msra.mxu0 %v9164_v39  ;;  %5707 = vmatpush1.bf16.msra.mxu1 %v9167_v40  ;;  %v9256_v39 = vld [vmem:[#allocation5 + $0x1420] ss:$16 sps:$4 sm:$0xff]   ;;  %v9259_v40 = vld [vmem:[#allocation5 + $0x1428] ss:$16 sps:$4 sm:$0xff]  }
 0x2c9   :  { %5216 = vmatprep.subr.bf16.mxu0 %v9172_v41  ;;  %5708 = vmatprep.subr.bf16.mxu1 %v9175_v42  ;;  %v9267_v41 = vld [vmem:[#allocation5 + $0x144c] ss:$16 sps:$4 sm:$0xff]   ;;  %v9262_v42 = vld [vmem:[#allocation5 + $0x1440] ss:$16 sps:$4 sm:$0xff]  }
 0x2cc   :  { %5217 = vmatpush1.bf16.msra.mxu0 %v9170_v43  ;;  %5709 = vmatpush1.bf16.msra.mxu1 %v9173_v44  ;;  %v9265_v43 = vld [vmem:[#allocation5 + $0x1448] ss:$16 sps:$4 sm:$0xff]   ;;  %v9270_v44 = vld [vmem:[#allocation5 + $0x1464] ss:$16 sps:$4 sm:$0xff]  }
 0x2cd   :  { %5218 = vmatprep.subr.bf16.mxu0 %v9178_v45  ;;  %5710 = vmatprep.subr.bf16.mxu1 %v9181_v46  ;;  %v9273_v45 = vld [vmem:[#allocation5 + $0x146c] ss:$16 sps:$4 sm:$0xff]   ;;  %v9268_v46 = vld [vmem:[#allocation5 + $0x1460] ss:$16 sps:$4 sm:$0xff]  }
 0x2d0   :  { %5219 = vmatpush1.bf16.msra.mxu0 %v9176_v47  ;;  %5711 = vmatpush1.bf16.msra.mxu1 %v9179_v48  ;;  %v9271_v47 = vld [vmem:[#allocation5 + $0x1468] ss:$16 sps:$4 sm:$0xff]   ;;  %v9276_v48 = vld [vmem:[#allocation5 + $0x1484] ss:$16 sps:$4 sm:$0xff]  }
 0x2d1   :  { %5220 = vmatprep.subr.bf16.mxu0 %v9184_v49  ;;  %5712 = vmatprep.subr.bf16.mxu1 %v9187_v50  ;;  %v9279_v49 = vld [vmem:[#allocation5 + $0x148c] ss:$16 sps:$4 sm:$0xff]   ;;  %v9274_v50 = vld [vmem:[#allocation5 + $0x1480] ss:$16 sps:$4 sm:$0xff]  }
 0x2d4   :  { %5221 = vmatpush1.bf16.msra.mxu0 %v9182_v51  ;;  %5713 = vmatpush1.bf16.msra.mxu1 %v9185_v52  ;;  %v9277_v51 = vld [vmem:[#allocation5 + $0x1488] ss:$16 sps:$4 sm:$0xff]   ;;  %v9282_v52 = vld [vmem:[#allocation5 + $0x14a4] ss:$16 sps:$4 sm:$0xff]  }
 0x2d5   :  { %5222 = vmatprep.subr.bf16.mxu0 %v9190_v53  ;;  %5714 = vmatprep.subr.bf16.mxu1 %v9193_v54  ;;  %v9285_v53 = vld [vmem:[#allocation5 + $0x14ac] ss:$16 sps:$4 sm:$0xff]   ;;  %v9280_v54 = vld [vmem:[#allocation5 + $0x14a0] ss:$16 sps:$4 sm:$0xff]  }
 0x2d8   :  { %5223 = vmatpush1.bf16.msra.mxu0 %v9188_v55  ;;  %5715 = vmatpush1.bf16.msra.mxu1 %v9191_v56  ;;  %v9283_v55 = vld [vmem:[#allocation5 + $0x14a8] ss:$16 sps:$4 sm:$0xff]   ;;  %v9288_v56 = vld [vmem:[#allocation5 + $0x14c4] ss:$16 sps:$4 sm:$0xff]  }
 0x2d9   :  { %5224 = vmatprep.subr.bf16.mxu0 %v9196_v57  ;;  %5716 = vmatprep.subr.bf16.mxu1 %v9199_v58  ;;  %v9291_v57 = vld [vmem:[#allocation5 + $0x14cc] ss:$16 sps:$4 sm:$0xff]   ;;  %v9286_v58 = vld [vmem:[#allocation5 + $0x14c0] ss:$16 sps:$4 sm:$0xff]  }
 0x2dc   :  { %5225 = vmatpush1.bf16.msra.mxu0 %v9194_v59  ;;  %5717 = vmatpush1.bf16.msra.mxu1 %v9197_v60  ;;  %v9289_v59 = vld [vmem:[#allocation5 + $0x14c8] ss:$16 sps:$4 sm:$0xff]   ;;  %v9294_v60 = vld [vmem:[#allocation5 + $0x14e4] ss:$16 sps:$4 sm:$0xff]  }
 0x2dd   :  { %5226 = vmatprep.subr.bf16.mxu0 %v9202_v61  ;;  %5718 = vmatprep.subr.bf16.mxu1 %v9205_v62  ;;  %v9297_v61 = vld [vmem:[#allocation5 + $0x14ec] ss:$16 sps:$4 sm:$0xff]   ;;  %v9292_v62 = vld [vmem:[#allocation5 + $0x14e0] ss:$16 sps:$4 sm:$0xff]  }
 0x2e0   :  { %5227 = vmatpush1.bf16.msra.mxu0 %v9200_v63  ;;  %5719 = vmatpush1.bf16.msra.mxu1 %v9203_v0  ;;  %v9295_v63 = vld [vmem:[#allocation5 + $0x14e8] ss:$16 sps:$4 sm:$0xff]   ;;  %v9300_v0 = vld [vmem:[#allocation5 + $0x1504] ss:$16 sps:$4 sm:$0xff]  }
 0x2e1   :  { %5228 = vmatprep.subr.bf16.mxu0 %v9208_v1  ;;  %5720 = vmatprep.subr.bf16.mxu1 %v9211_v2  ;;  %v9303_v1 = vld [vmem:[#allocation5 + $0x150c] ss:$16 sps:$4 sm:$0xff]   ;;  %v9298_v2 = vld [vmem:[#allocation5 + $0x1500] ss:$16 sps:$4 sm:$0xff]  }
 0x2e4   :  { %5229 = vmatpush1.bf16.msra.mxu0 %v9206_v3  ;;  %5721 = vmatpush1.bf16.msra.mxu1 %v9209_v4  ;;  %v9301_v3 = vld [vmem:[#allocation5 + $0x1508] ss:$16 sps:$4 sm:$0xff]   ;;  %v9306_v4 = vld [vmem:[#allocation5 + $0x1524] ss:$16 sps:$4 sm:$0xff]  }
 0x2e5   :  { %5230 = vmatprep.subr.bf16.mxu0 %v9214_v5  ;;  %5722 = vmatprep.subr.bf16.mxu1 %v9217_v6  ;;  %v9309_v5 = vld [vmem:[#allocation5 + $0x152c] ss:$16 sps:$4 sm:$0xff]   ;;  %v9304_v6 = vld [vmem:[#allocation5 + $0x1520] ss:$16 sps:$4 sm:$0xff]  }
 0x2e8   :  { %5231 = vmatpush1.bf16.msra.mxu0 %v9212_v7  ;;  %5723 = vmatpush1.bf16.msra.mxu1 %v9215_v8  ;;  %v9307_v7 = vld [vmem:[#allocation5 + $0x1528] ss:$16 sps:$4 sm:$0xff]   ;;  %v9312_v8 = vld [vmem:[#allocation5 + $0x1544] ss:$16 sps:$4 sm:$0xff]  }
 0x2e9   :  { %5232 = vmatprep.subr.bf16.mxu0 %v9220_v9  ;;  %5724 = vmatprep.subr.bf16.mxu1 %v9223_v10  ;;  %v9315_v9 = vld [vmem:[#allocation5 + $0x154c] ss:$16 sps:$4 sm:$0xff]   ;;  %v9310_v10 = vld [vmem:[#allocation5 + $0x1540] ss:$16 sps:$4 sm:$0xff]  }
 0x2ec   :  { %5233 = vmatpush1.bf16.msra.mxu0 %v9218_v12  ;;  %5725 = vmatpush1.bf16.msra.mxu1 %v9221_v13  ;;  %v9313_v12 = vld [vmem:[#allocation5 + $0x1548] ss:$16 sps:$4 sm:$0xff]   ;;  %v9318_v13 = vld [vmem:[#allocation5 + $0x1564] ss:$16 sps:$4 sm:$0xff]  }
 0x2ed   :  { %5234 = vmatprep.subr.bf16.mxu0 %v9226_v15  ;;  %5726 = vmatprep.subr.bf16.mxu1 %v9229_v16  ;;  %v9321_v15 = vld [vmem:[#allocation5 + $0x156c] ss:$16 sps:$4 sm:$0xff]   ;;  %v9316_v16 = vld [vmem:[#allocation5 + $0x1560] ss:$16 sps:$4 sm:$0xff]  }
 0x2f0   :  { %5235 = vmatpush1.bf16.msra.mxu0 %v9224_v18  ;;  %5727 = vmatpush1.bf16.msra.mxu1 %v9227_v20  ;;  %v9319_v18 = vld [vmem:[#allocation5 + $0x1568] ss:$16 sps:$4 sm:$0xff]   ;;  %v9324_v20 = vld [vmem:[#allocation5 + $0x1584] ss:$16 sps:$4 sm:$0xff]  }
 0x2f1   :  { %5236 = vmatprep.subr.bf16.mxu0 %v9232_v11  ;;  %5728 = vmatprep.subr.bf16.mxu1 %v9235_v21  ;;  %v9327_v11 = vld [vmem:[#allocation5 + $0x158c] ss:$16 sps:$4 sm:$0xff]   ;;  %v9322_v21 = vld [vmem:[#allocation5 + $0x1580] ss:$16 sps:$4 sm:$0xff]  }
 0x2f4   :  { %5237 = vmatpush1.bf16.msra.mxu0 %v9230_v14  ;;  %5729 = vmatpush1.bf16.msra.mxu1 %v9233_v23  ;;  %v9325_v14 = vld [vmem:[#allocation5 + $0x1588] ss:$16 sps:$4 sm:$0xff]   ;;  %v9330_v23 = vld [vmem:[#allocation5 + $0x15a4] ss:$16 sps:$4 sm:$0xff]  }
 0x2f5   :  { %5238 = vmatprep.subr.bf16.mxu0 %v9238_v24  ;;  %5730 = vmatprep.subr.bf16.mxu1 %v9241_v17  ;;  %v9333_v24 = vld [vmem:[#allocation5 + $0x15ac] ss:$16 sps:$4 sm:$0xff]   ;;  %v9328_v17 = vld [vmem:[#allocation5 + $0x15a0] ss:$16 sps:$4 sm:$0xff]  }
 0x2f8   :  { %5239 = vmatpush1.bf16.msra.mxu0 %v9236_v26  ;;  %5731 = vmatpush1.bf16.msra.mxu1 %v9239_v27  ;;  %v9331_v26 = vld [vmem:[#allocation5 + $0x15a8] ss:$16 sps:$4 sm:$0xff]   ;;  %v9336_v27 = vld [vmem:[#allocation5 + $0x15c4] ss:$16 sps:$4 sm:$0xff]  }
 0x2f9   :  { %5240 = vmatprep.subr.bf16.mxu0 %v9244_v19  ;;  %5732 = vmatprep.subr.bf16.mxu1 %v9247_v29  ;;  %v9339_v19 = vld [vmem:[#allocation5 + $0x15cc] ss:$16 sps:$4 sm:$0xff]   ;;  %v9334_v29 = vld [vmem:[#allocation5 + $0x15c0] ss:$16 sps:$4 sm:$0xff]  }
 0x2fc   :  { %5241 = vmatpush1.bf16.msra.mxu0 %v9242_v30  ;;  %5733 = vmatpush1.bf16.msra.mxu1 %v9245_v31  ;;  %v9337_v30 = vld [vmem:[#allocation5 + $0x15c8] ss:$16 sps:$4 sm:$0xff]   ;;  %v9342_v31 = vld [vmem:[#allocation5 + $0x15e4] ss:$16 sps:$4 sm:$0xff]  }
 0x2fd   :  { %5251 = vmatprep.subr.bf16.mxu0 %v9252_v32  ;;  %5743 = vmatprep.subr.bf16.mxu1 %v9255_v33  ;;  %v9345_v32 = vld [vmem:[#allocation5 + $0x15ec] ss:$16 sps:$4 sm:$0xff]   ;;  %v9340_v33 = vld [vmem:[#allocation5 + $0x15e0] ss:$16 sps:$4 sm:$0xff]  }
 0x2ff   :  { %5243 = vmatmul.mubr.bf16.vlgmr.msra.gmra.mrb[0].mxu0 %v7175_v34  ;;  %5735 = vmatmul.mubr.bf16.vlgmr.msra.gmra.mrb[0].mxu1 %v7175_v34  ;;  %v9343_v34 = vld [vmem:[#allocation5 + $0x15e8] ss:$16 sps:$4 sm:$0xff]  }
 0x300   :  { %5252 = vmatpush1.bf16.msra.mxu0 %v9250_v35  ;;  %5744 = vmatpush1.bf16.msra.mxu1 %v9253_v36  ;;  %v9350_v35 = vld [vmem:[#allocation5 + $0x1604] ss:$16 sps:$4 sm:$0xff]   ;;  %v9353_v36 = vld [vmem:[#allocation5 + $0x160c] ss:$16 sps:$4 sm:$0xff]  }
 0x301   :  { %5253 = vmatprep.subr.bf16.mxu0 %v9258_v37  ;;  %5745 = vmatprep.subr.bf16.mxu1 %v9261_v28  ;;  %v7177_v37 = vcombine.low %v10046_v25, %v10046_v25  ;;  %v10052_v28 = vld [vmem:[#allocation2 + $0x58] sm:$0xff]  ;;  %v9362_v25 = vld [vmem:[#allocation5 + $0x1644] ss:$16 sps:$4 sm:$0xff]  }
 0x302   :  { %5283 = vmatprep.mubr.bf16.mxu0 %v7178_v38  ;;  %5775 = vmatprep.mubr.bf16.mxu1 %v7178_v38  ;;  %v9348_v38 = vld [vmem:[#allocation5 + $0x1600] ss:$16 sps:$4 sm:$0xff]  }
 0x304   :  { %5254 = vmatpush1.bf16.msra.mxu0 %v9256_v39  ;;  %5746 = vmatpush1.bf16.msra.mxu1 %v9259_v40  ;;  %v9351_v39 = vld [vmem:[#allocation5 + $0x1608] ss:$16 sps:$4 sm:$0xff]   ;;  %v9356_v40 = vld [vmem:[#allocation5 + $0x1624] ss:$16 sps:$4 sm:$0xff]  }
 0x305   :  { %5255 = vmatprep.subr.bf16.mxu0 %v9264_v22  ;;  %5747 = vmatprep.subr.bf16.mxu1 %v9267_v41  ;;  %v9359_v22 = vld [vmem:[#allocation5 + $0x162c] ss:$16 sps:$4 sm:$0xff]   ;;  %v7180_v41 = vcombine.high %v10052_v28, %v10052_v28 }
 0x308   :  { %5256 = vmatpush1.bf16.msra.mxu0 %v9262_v42  ;;  %5748 = vmatpush1.bf16.msra.mxu1 %v9265_v43  ;;  %v9354_v42 = vld [vmem:[#allocation5 + $0x1620] ss:$16 sps:$4 sm:$0xff]   ;;  %v9357_v43 = vld [vmem:[#allocation5 + $0x1628] ss:$16 sps:$4 sm:$0xff]  }
 0x309   :  { %5257 = vmatprep.subr.bf16.mxu0 %v9270_v44  ;;  %5749 = vmatprep.subr.bf16.mxu1 %v9273_v45  ;;  %v9365_v44 = vld [vmem:[#allocation5 + $0x164c] ss:$16 sps:$4 sm:$0xff]   ;;  %v9360_v45 = vld [vmem:[#allocation5 + $0x1640] ss:$16 sps:$4 sm:$0xff]  }
 0x30c   :  { %5258 = vmatpush1.bf16.msra.mxu0 %v9268_v46  ;;  %5750 = vmatpush1.bf16.msra.mxu1 %v9271_v47  ;;  %v9363_v46 = vld [vmem:[#allocation5 + $0x1648] ss:$16 sps:$4 sm:$0xff]   ;;  %v9368_v47 = vld [vmem:[#allocation5 + $0x1664] ss:$16 sps:$4 sm:$0xff]  }
 0x30d   :  { %5259 = vmatprep.subr.bf16.mxu0 %v9276_v48  ;;  %5751 = vmatprep.subr.bf16.mxu1 %v9279_v49  ;;  %v9371_v48 = vld [vmem:[#allocation5 + $0x166c] ss:$16 sps:$4 sm:$0xff]   ;;  %v9366_v49 = vld [vmem:[#allocation5 + $0x1660] ss:$16 sps:$4 sm:$0xff]  }
 0x310   :  { %5260 = vmatpush1.bf16.msra.mxu0 %v9274_v50  ;;  %5752 = vmatpush1.bf16.msra.mxu1 %v9277_v51  ;;  %v9369_v50 = vld [vmem:[#allocation5 + $0x1668] ss:$16 sps:$4 sm:$0xff]   ;;  %v9374_v51 = vld [vmem:[#allocation5 + $0x1684] ss:$16 sps:$4 sm:$0xff]  }
 0x311   :  { %5261 = vmatprep.subr.bf16.mxu0 %v9282_v52  ;;  %5753 = vmatprep.subr.bf16.mxu1 %v9285_v53  ;;  %v9377_v52 = vld [vmem:[#allocation5 + $0x168c] ss:$16 sps:$4 sm:$0xff]   ;;  %v9372_v53 = vld [vmem:[#allocation5 + $0x1680] ss:$16 sps:$4 sm:$0xff]  }
 0x314   :  { %5262 = vmatpush1.bf16.msra.mxu0 %v9280_v54  ;;  %5754 = vmatpush1.bf16.msra.mxu1 %v9283_v55  ;;  %v9375_v54 = vld [vmem:[#allocation5 + $0x1688] ss:$16 sps:$4 sm:$0xff]   ;;  %v9380_v55 = vld [vmem:[#allocation5 + $0x16a4] ss:$16 sps:$4 sm:$0xff]  }
 0x315   :  { %5263 = vmatprep.subr.bf16.mxu0 %v9288_v56  ;;  %5755 = vmatprep.subr.bf16.mxu1 %v9291_v57  ;;  %v9383_v56 = vld [vmem:[#allocation5 + $0x16ac] ss:$16 sps:$4 sm:$0xff]   ;;  %v9378_v57 = vld [vmem:[#allocation5 + $0x16a0] ss:$16 sps:$4 sm:$0xff]  }
 0x318   :  { %5264 = vmatpush1.bf16.msra.mxu0 %v9286_v58  ;;  %5756 = vmatpush1.bf16.msra.mxu1 %v9289_v59  ;;  %v9381_v58 = vld [vmem:[#allocation5 + $0x16a8] ss:$16 sps:$4 sm:$0xff]   ;;  %v9386_v59 = vld [vmem:[#allocation5 + $0x16c4] ss:$16 sps:$4 sm:$0xff]  }
 0x319   :  { %5265 = vmatprep.subr.bf16.mxu0 %v9294_v60  ;;  %5757 = vmatprep.subr.bf16.mxu1 %v9297_v61  ;;  %v9389_v60 = vld [vmem:[#allocation5 + $0x16cc] ss:$16 sps:$4 sm:$0xff]   ;;  %v9384_v61 = vld [vmem:[#allocation5 + $0x16c0] ss:$16 sps:$4 sm:$0xff]  }
 0x31c   :  { %5266 = vmatpush1.bf16.msra.mxu0 %v9292_v62  ;;  %5758 = vmatpush1.bf16.msra.mxu1 %v9295_v63  ;;  %v9387_v62 = vld [vmem:[#allocation5 + $0x16c8] ss:$16 sps:$4 sm:$0xff]   ;;  %v9392_v63 = vld [vmem:[#allocation5 + $0x16e4] ss:$16 sps:$4 sm:$0xff]  }
 0x31d   :  { %5267 = vmatprep.subr.bf16.mxu0 %v9300_v0  ;;  %5759 = vmatprep.subr.bf16.mxu1 %v9303_v1  ;;  %v9395_v0 = vld [vmem:[#allocation5 + $0x16ec] ss:$16 sps:$4 sm:$0xff]   ;;  %v9390_v1 = vld [vmem:[#allocation5 + $0x16e0] ss:$16 sps:$4 sm:$0xff]  }
 0x320   :  { %5268 = vmatpush1.bf16.msra.mxu0 %v9298_v2  ;;  %5760 = vmatpush1.bf16.msra.mxu1 %v9301_v3  ;;  %v9393_v2 = vld [vmem:[#allocation5 + $0x16e8] ss:$16 sps:$4 sm:$0xff]   ;;  %v9398_v3 = vld [vmem:[#allocation5 + $0x1704] ss:$16 sps:$4 sm:$0xff]  }
 0x321   :  { %5269 = vmatprep.subr.bf16.mxu0 %v9306_v4  ;;  %5761 = vmatprep.subr.bf16.mxu1 %v9309_v5  ;;  %v9401_v4 = vld [vmem:[#allocation5 + $0x170c] ss:$16 sps:$4 sm:$0xff]   ;;  %v9396_v5 = vld [vmem:[#allocation5 + $0x1700] ss:$16 sps:$4 sm:$0xff]  }
 0x324   :  { %5270 = vmatpush1.bf16.msra.mxu0 %v9304_v6  ;;  %5762 = vmatpush1.bf16.msra.mxu1 %v9307_v7  ;;  %v9399_v6 = vld [vmem:[#allocation5 + $0x1708] ss:$16 sps:$4 sm:$0xff]   ;;  %v9404_v7 = vld [vmem:[#allocation5 + $0x1724] ss:$16 sps:$4 sm:$0xff]  }
 0x325   :  { %5271 = vmatprep.subr.bf16.mxu0 %v9312_v8  ;;  %5763 = vmatprep.subr.bf16.mxu1 %v9315_v9  ;;  %v9407_v8 = vld [vmem:[#allocation5 + $0x172c] ss:$16 sps:$4 sm:$0xff]   ;;  %v9402_v9 = vld [vmem:[#allocation5 + $0x1720] ss:$16 sps:$4 sm:$0xff]  }
 0x328   :  { %5272 = vmatpush1.bf16.msra.mxu0 %v9310_v10  ;;  %5764 = vmatpush1.bf16.msra.mxu1 %v9313_v12  ;;  %v9405_v10 = vld [vmem:[#allocation5 + $0x1728] ss:$16 sps:$4 sm:$0xff]   ;;  %v9410_v12 = vld [vmem:[#allocation5 + $0x1744] ss:$16 sps:$4 sm:$0xff]  }
 0x329   :  { %5273 = vmatprep.subr.bf16.mxu0 %v9318_v13  ;;  %5765 = vmatprep.subr.bf16.mxu1 %v9321_v15  ;;  %v9413_v13 = vld [vmem:[#allocation5 + $0x174c] ss:$16 sps:$4 sm:$0xff]   ;;  %v9408_v15 = vld [vmem:[#allocation5 + $0x1740] ss:$16 sps:$4 sm:$0xff]  }
 0x32c   :  { %5274 = vmatpush1.bf16.msra.mxu0 %v9316_v16  ;;  %5766 = vmatpush1.bf16.msra.mxu1 %v9319_v18  ;;  %v9411_v16 = vld [vmem:[#allocation5 + $0x1748] ss:$16 sps:$4 sm:$0xff]   ;;  %v9416_v18 = vld [vmem:[#allocation5 + $0x1764] ss:$16 sps:$4 sm:$0xff]  }
 0x32d   :  { %5275 = vmatprep.subr.bf16.mxu0 %v9324_v20  ;;  %5767 = vmatprep.subr.bf16.mxu1 %v9327_v11  ;;  %v9419_v20 = vld [vmem:[#allocation5 + $0x176c] ss:$16 sps:$4 sm:$0xff]   ;;  %v9414_v11 = vld [vmem:[#allocation5 + $0x1760] ss:$16 sps:$4 sm:$0xff]  }
 0x330   :  { %5276 = vmatpush1.bf16.msra.mxu0 %v9322_v21  ;;  %5768 = vmatpush1.bf16.msra.mxu1 %v9325_v14  ;;  %v9417_v21 = vld [vmem:[#allocation5 + $0x1768] ss:$16 sps:$4 sm:$0xff]   ;;  %v9422_v14 = vld [vmem:[#allocation5 + $0x1784] ss:$16 sps:$4 sm:$0xff]  }
 0x331   :  { %5277 = vmatprep.subr.bf16.mxu0 %v9330_v23  ;;  %5769 = vmatprep.subr.bf16.mxu1 %v9333_v24  ;;  %v9425_v23 = vld [vmem:[#allocation5 + $0x178c] ss:$16 sps:$4 sm:$0xff]   ;;  %v9420_v24 = vld [vmem:[#allocation5 + $0x1780] ss:$16 sps:$4 sm:$0xff]  }
 0x334   :  { %5278 = vmatpush1.bf16.msra.mxu0 %v9328_v17  ;;  %5770 = vmatpush1.bf16.msra.mxu1 %v9331_v26  ;;  %v9423_v17 = vld [vmem:[#allocation5 + $0x1788] ss:$16 sps:$4 sm:$0xff]   ;;  %v9428_v26 = vld [vmem:[#allocation5 + $0x17a4] ss:$16 sps:$4 sm:$0xff]  }
 0x335   :  { %5279 = vmatprep.subr.bf16.mxu0 %v9336_v27  ;;  %5771 = vmatprep.subr.bf16.mxu1 %v9339_v19  ;;  %v9431_v27 = vld [vmem:[#allocation5 + $0x17ac] ss:$16 sps:$4 sm:$0xff]   ;;  %v9426_v19 = vld [vmem:[#allocation5 + $0x17a0] ss:$16 sps:$4 sm:$0xff]  }
 0x338   :  { %5280 = vmatpush1.bf16.msra.mxu0 %v9334_v29  ;;  %5772 = vmatpush1.bf16.msra.mxu1 %v9337_v30  ;;  %v9429_v29 = vld [vmem:[#allocation5 + $0x17a8] ss:$16 sps:$4 sm:$0xff]   ;;  %v9434_v30 = vld [vmem:[#allocation5 + $0x17c4] ss:$16 sps:$4 sm:$0xff]  }
 0x339   :  { %5281 = vmatprep.subr.bf16.mxu0 %v9342_v31  ;;  %5773 = vmatprep.subr.bf16.mxu1 %v9345_v32  ;;  %v9437_v31 = vld [vmem:[#allocation5 + $0x17cc] ss:$16 sps:$4 sm:$0xff]   ;;  %v9432_v32 = vld [vmem:[#allocation5 + $0x17c0] ss:$16 sps:$4 sm:$0xff]  }
 0x33c   :  { %5282 = vmatpush1.bf16.msra.mxu0 %v9340_v33  ;;  %5774 = vmatpush1.bf16.msra.mxu1 %v9343_v34  ;;  %v9435_v33 = vld [vmem:[#allocation5 + $0x17c8] ss:$16 sps:$4 sm:$0xff]   ;;  %v9440_v34 = vld [vmem:[#allocation5 + $0x17e4] ss:$16 sps:$4 sm:$0xff]  }
 0x33d   :  { %5292 = vmatprep.subr.bf16.mxu0 %v9350_v35  ;;  %5784 = vmatprep.subr.bf16.mxu1 %v9353_v36  ;;  %v9443_v35 = vld [vmem:[#allocation5 + $0x17ec] ss:$16 sps:$4 sm:$0xff]   ;;  %v9438_v36 = vld [vmem:[#allocation5 + $0x17e0] ss:$16 sps:$4 sm:$0xff]  }
 0x33f   :  { %5284 = vmatmul.mubr.bf16.vlgmr.msra.gmra.mrb[0].mxu0 %v7177_v37  ;;  %5776 = vmatmul.mubr.bf16.vlgmr.msra.gmra.mrb[0].mxu1 %v7177_v37  ;;  %v9441_v37 = vld [vmem:[#allocation5 + $0x17e8] ss:$16 sps:$4 sm:$0xff]  }
 0x340   :  { %5293 = vmatpush1.bf16.msra.mxu0 %v9348_v38  ;;  %5785 = vmatpush1.bf16.msra.mxu1 %v9351_v39  ;;  %v9448_v38 = vld [vmem:[#allocation8 + $0x4] ss:$16 sps:$4 sm:$0xff]   ;;  %v9451_v39 = vld [vmem:[#allocation8 + $0xc] ss:$16 sps:$4 sm:$0xff]  }
 0x341   :  { %5294 = vmatprep.subr.bf16.mxu0 %v9356_v40  ;;  %5786 = vmatprep.subr.bf16.mxu1 %v9359_v22  ;;  %v7179_v40 = vcombine.low %v10052_v28, %v10052_v28  ;;  %v9446_v22 = vld [vmem:[#allocation8] ss:$16 sps:$4 sm:$0xff]  }
 0x342   :  { %5324 = vmatprep.mubr.bf16.mxu0 %v7180_v41  ;;  %5816 = vmatprep.mubr.bf16.mxu1 %v7180_v41  ;;  %v9449_v41 = vld [vmem:[#allocation8 + $0x8] ss:$16 sps:$4 sm:$0xff]   ;;  %v9458_v28 = vld [vmem:[#allocation8 + $0x40] ss:$16 sps:$4 sm:$0xff]  }
 0x344   :  { %5295 = vmatpush1.bf16.msra.mxu0 %v9354_v42  ;;  %5787 = vmatpush1.bf16.msra.mxu1 %v9357_v43  ;;  %v9454_v42 = vld [vmem:[#allocation8 + $0x24] ss:$16 sps:$4 sm:$0xff]   ;;  %v9457_v43 = vld [vmem:[#allocation8 + $0x2c] ss:$16 sps:$4 sm:$0xff]  }
 0x345   :  { %5296 = vmatprep.subr.bf16.mxu0 %v9362_v25  ;;  %5788 = vmatprep.subr.bf16.mxu1 %v9365_v44  ;;  %v9452_v25 = vld [vmem:[#allocation8 + $0x20] ss:$16 sps:$4 sm:$0xff]   ;;  %v9455_v44 = vld [vmem:[#allocation8 + $0x28] ss:$16 sps:$4 sm:$0xff]  }
 0x348   :  { %5297 = vmatpush1.bf16.msra.mxu0 %v9360_v45  ;;  %5789 = vmatpush1.bf16.msra.mxu1 %v9363_v46  ;;  %v9460_v45 = vld [vmem:[#allocation8 + $0x44] ss:$16 sps:$4 sm:$0xff]   ;;  %v9463_v46 = vld [vmem:[#allocation8 + $0x4c] ss:$16 sps:$4 sm:$0xff]  }
 0x349   :  { %5298 = vmatprep.subr.bf16.mxu0 %v9368_v47  ;;  %5790 = vmatprep.subr.bf16.mxu1 %v9371_v48  ;;  %v9461_v47 = vld [vmem:[#allocation8 + $0x48] ss:$16 sps:$4 sm:$0xff]   ;;  %v9466_v48 = vld [vmem:[#allocation8 + $0x64] ss:$16 sps:$4 sm:$0xff]  }
 0x34c   :  { %5299 = vmatpush1.bf16.msra.mxu0 %v9366_v49  ;;  %5791 = vmatpush1.bf16.msra.mxu1 %v9369_v50  ;;  %v9469_v49 = vld [vmem:[#allocation8 + $0x6c] ss:$16 sps:$4 sm:$0xff]   ;;  %v9464_v50 = vld [vmem:[#allocation8 + $0x60] ss:$16 sps:$4 sm:$0xff]  }
 0x34d   :  { %5300 = vmatprep.subr.bf16.mxu0 %v9374_v51  ;;  %5792 = vmatprep.subr.bf16.mxu1 %v9377_v52  ;;  %v9467_v51 = vld [vmem:[#allocation8 + $0x68] ss:$16 sps:$4 sm:$0xff]   ;;  %v9472_v52 = vld [vmem:[#allocation8 + $0x84] ss:$16 sps:$4 sm:$0xff]  }
 0x350   :  { %5301 = vmatpush1.bf16.msra.mxu0 %v9372_v53  ;;  %5793 = vmatpush1.bf16.msra.mxu1 %v9375_v54  ;;  %v9475_v53 = vld [vmem:[#allocation8 + $0x8c] ss:$16 sps:$4 sm:$0xff]   ;;  %v9470_v54 = vld [vmem:[#allocation8 + $0x80] ss:$16 sps:$4 sm:$0xff]  }
 0x351   :  { %5302 = vmatprep.subr.bf16.mxu0 %v9380_v55  ;;  %5794 = vmatprep.subr.bf16.mxu1 %v9383_v56  ;;  %v9473_v55 = vld [vmem:[#allocation8 + $0x88] ss:$16 sps:$4 sm:$0xff]   ;;  %v9478_v56 = vld [vmem:[#allocation8 + $0xa4] ss:$16 sps:$4 sm:$0xff]  }
 0x354   :  { %5303 = vmatpush1.bf16.msra.mxu0 %v9378_v57  ;;  %5795 = vmatpush1.bf16.msra.mxu1 %v9381_v58  ;;  %v9481_v57 = vld [vmem:[#allocation8 + $0xac] ss:$16 sps:$4 sm:$0xff]   ;;  %v9476_v58 = vld [vmem:[#allocation8 + $0xa0] ss:$16 sps:$4 sm:$0xff]  }
 0x355   :  { %5304 = vmatprep.subr.bf16.mxu0 %v9386_v59  ;;  %5796 = vmatprep.subr.bf16.mxu1 %v9389_v60  ;;  %v9479_v59 = vld [vmem:[#allocation8 + $0xa8] ss:$16 sps:$4 sm:$0xff]   ;;  %v9484_v60 = vld [vmem:[#allocation8 + $0xc4] ss:$16 sps:$4 sm:$0xff]  }
 0x358   :  { %5305 = vmatpush1.bf16.msra.mxu0 %v9384_v61  ;;  %5797 = vmatpush1.bf16.msra.mxu1 %v9387_v62  ;;  %v9487_v61 = vld [vmem:[#allocation8 + $0xcc] ss:$16 sps:$4 sm:$0xff]   ;;  %v9482_v62 = vld [vmem:[#allocation8 + $0xc0] ss:$16 sps:$4 sm:$0xff]  }
 0x359   :  { %5306 = vmatprep.subr.bf16.mxu0 %v9392_v63  ;;  %5798 = vmatprep.subr.bf16.mxu1 %v9395_v0  ;;  %v9485_v63 = vld [vmem:[#allocation8 + $0xc8] ss:$16 sps:$4 sm:$0xff]   ;;  %v9490_v0 = vld [vmem:[#allocation8 + $0xe4] ss:$16 sps:$4 sm:$0xff]  }
 0x35c   :  { %5307 = vmatpush1.bf16.msra.mxu0 %v9390_v1  ;;  %5799 = vmatpush1.bf16.msra.mxu1 %v9393_v2  ;;  %v9493_v1 = vld [vmem:[#allocation8 + $0xec] ss:$16 sps:$4 sm:$0xff]   ;;  %v9488_v2 = vld [vmem:[#allocation8 + $0xe0] ss:$16 sps:$4 sm:$0xff]  }
 0x35d   :  { %5308 = vmatprep.subr.bf16.mxu0 %v9398_v3  ;;  %5800 = vmatprep.subr.bf16.mxu1 %v9401_v4  ;;  %v9491_v3 = vld [vmem:[#allocation8 + $0xe8] ss:$16 sps:$4 sm:$0xff]   ;;  %v9496_v4 = vld [vmem:[#allocation8 + $0x104] ss:$16 sps:$4 sm:$0xff]  }
 0x360   :  { %5309 = vmatpush1.bf16.msra.mxu0 %v9396_v5  ;;  %5801 = vmatpush1.bf16.msra.mxu1 %v9399_v6  ;;  %v9499_v5 = vld [vmem:[#allocation8 + $0x10c] ss:$16 sps:$4 sm:$0xff]   ;;  %v9494_v6 = vld [vmem:[#allocation8 + $0x100] ss:$16 sps:$4 sm:$0xff]  }
 0x361   :  { %5310 = vmatprep.subr.bf16.mxu0 %v9404_v7  ;;  %5802 = vmatprep.subr.bf16.mxu1 %v9407_v8  ;;  %v9497_v7 = vld [vmem:[#allocation8 + $0x108] ss:$16 sps:$4 sm:$0xff]   ;;  %v9502_v8 = vld [vmem:[#allocation8 + $0x124] ss:$16 sps:$4 sm:$0xff]  }
 0x364   :  { %5311 = vmatpush1.bf16.msra.mxu0 %v9402_v9  ;;  %5803 = vmatpush1.bf16.msra.mxu1 %v9405_v10  ;;  %v9505_v9 = vld [vmem:[#allocation8 + $0x12c] ss:$16 sps:$4 sm:$0xff]   ;;  %v9500_v10 = vld [vmem:[#allocation8 + $0x120] ss:$16 sps:$4 sm:$0xff]  }
 0x365   :  { %5312 = vmatprep.subr.bf16.mxu0 %v9410_v12  ;;  %5804 = vmatprep.subr.bf16.mxu1 %v9413_v13  ;;  %v9503_v12 = vld [vmem:[#allocation8 + $0x128] ss:$16 sps:$4 sm:$0xff]   ;;  %v9508_v13 = vld [vmem:[#allocation8 + $0x144] ss:$16 sps:$4 sm:$0xff]  }
 0x368   :  { %5313 = vmatpush1.bf16.msra.mxu0 %v9408_v15  ;;  %5805 = vmatpush1.bf16.msra.mxu1 %v9411_v16  ;;  %v9511_v15 = vld [vmem:[#allocation8 + $0x14c] ss:$16 sps:$4 sm:$0xff]   ;;  %v9506_v16 = vld [vmem:[#allocation8 + $0x140] ss:$16 sps:$4 sm:$0xff]  }
 0x369   :  { %5314 = vmatprep.subr.bf16.mxu0 %v9416_v18  ;;  %5806 = vmatprep.subr.bf16.mxu1 %v9419_v20  ;;  %v9509_v18 = vld [vmem:[#allocation8 + $0x148] ss:$16 sps:$4 sm:$0xff]   ;;  %v9514_v20 = vld [vmem:[#allocation8 + $0x164] ss:$16 sps:$4 sm:$0xff]  }
 0x36c   :  { %5315 = vmatpush1.bf16.msra.mxu0 %v9414_v11  ;;  %5807 = vmatpush1.bf16.msra.mxu1 %v9417_v21  ;;  %v9517_v11 = vld [vmem:[#allocation8 + $0x16c] ss:$16 sps:$4 sm:$0xff]   ;;  %v9512_v21 = vld [vmem:[#allocation8 + $0x160] ss:$16 sps:$4 sm:$0xff]  }
 0x36d   :  { %5316 = vmatprep.subr.bf16.mxu0 %v9422_v14  ;;  %5808 = vmatprep.subr.bf16.mxu1 %v9425_v23  ;;  %v9515_v14 = vld [vmem:[#allocation8 + $0x168] ss:$16 sps:$4 sm:$0xff]   ;;  %v9520_v23 = vld [vmem:[#allocation8 + $0x184] ss:$16 sps:$4 sm:$0xff]  }
 0x370   :  { %5317 = vmatpush1.bf16.msra.mxu0 %v9420_v24  ;;  %5809 = vmatpush1.bf16.msra.mxu1 %v9423_v17  ;;  %v9523_v24 = vld [vmem:[#allocation8 + $0x18c] ss:$16 sps:$4 sm:$0xff]   ;;  %v9518_v17 = vld [vmem:[#allocation8 + $0x180] ss:$16 sps:$4 sm:$0xff]  }
 0x371   :  { %5318 = vmatprep.subr.bf16.mxu0 %v9428_v26  ;;  %5810 = vmatprep.subr.bf16.mxu1 %v9431_v27  ;;  %v9521_v26 = vld [vmem:[#allocation8 + $0x188] ss:$16 sps:$4 sm:$0xff]   ;;  %v9526_v27 = vld [vmem:[#allocation8 + $0x1a4] ss:$16 sps:$4 sm:$0xff]  }
 0x374   :  { %5319 = vmatpush1.bf16.msra.mxu0 %v9426_v19  ;;  %5811 = vmatpush1.bf16.msra.mxu1 %v9429_v29  ;;  %v9529_v19 = vld [vmem:[#allocation8 + $0x1ac] ss:$16 sps:$4 sm:$0xff]   ;;  %v9524_v29 = vld [vmem:[#allocation8 + $0x1a0] ss:$16 sps:$4 sm:$0xff]  }
 0x375   :  { %5320 = vmatprep.subr.bf16.mxu0 %v9434_v30  ;;  %5812 = vmatprep.subr.bf16.mxu1 %v9437_v31  ;;  %v9527_v30 = vld [vmem:[#allocation8 + $0x1a8] ss:$16 sps:$4 sm:$0xff]   ;;  %v9532_v31 = vld [vmem:[#allocation8 + $0x1c4] ss:$16 sps:$4 sm:$0xff]  }
 0x378   :  { %5321 = vmatpush1.bf16.msra.mxu0 %v9432_v32  ;;  %5813 = vmatpush1.bf16.msra.mxu1 %v9435_v33  ;;  %v9535_v32 = vld [vmem:[#allocation8 + $0x1cc] ss:$16 sps:$4 sm:$0xff]   ;;  %v9530_v33 = vld [vmem:[#allocation8 + $0x1c0] ss:$16 sps:$4 sm:$0xff]  }
 0x379   :  { %5322 = vmatprep.subr.bf16.mxu0 %v9440_v34  ;;  %5814 = vmatprep.subr.bf16.mxu1 %v9443_v35  ;;  %v9533_v34 = vld [vmem:[#allocation8 + $0x1c8] ss:$16 sps:$4 sm:$0xff]   ;;  %v9538_v35 = vld [vmem:[#allocation8 + $0x1e4] ss:$16 sps:$4 sm:$0xff]  }
 0x37c   :  { %5323 = vmatpush1.bf16.msra.mxu0 %v9438_v36  ;;  %5815 = vmatpush1.bf16.msra.mxu1 %v9441_v37  ;;  %v9541_v36 = vld [vmem:[#allocation8 + $0x1ec] ss:$16 sps:$4 sm:$0xff]   ;;  %v9536_v37 = vld [vmem:[#allocation8 + $0x1e0] ss:$16 sps:$4 sm:$0xff]  }
 0x37d   :  { %6623 = vmatprep.subr.bf16.mxu0 %v9448_v38  ;;  %6705 = vmatprep.subr.bf16.mxu1 %v9451_v39  ;;  %v9539_v38 = vld [vmem:[#allocation8 + $0x1e8] ss:$16 sps:$4 sm:$0xff]   ;;  %v9544_v39 = vld [vmem:[#allocation8 + $0x204] ss:$16 sps:$4 sm:$0xff]  }
 0x37f   :  { %5325 = vmatmul.mubr.bf16.vlgmr.msra.gmra.mrb[0].mxu0 %v7179_v40  ;;  %5817 = vmatmul.mubr.bf16.vlgmr.msra.gmra.mrb[0].mxu1 %v7179_v40  ;;  %v9547_v40 = vld [vmem:[#allocation8 + $0x20c] ss:$16 sps:$4 sm:$0xff]  }
 0x380   :  { %6624 = vmatpush1.bf16.msra.mxu0 %v9446_v22  ;;  %6706 = vmatpush1.bf16.msra.mxu1 %v9449_v41  ;;  %v897_v22 = vlaneseq }
 0x381   :  { %6625 = vmatprep.subr.bf16.mxu0 %v9454_v42  ;;  %6707 = vmatprep.subr.bf16.mxu1 %v9457_v43  ;;  %v10061_v43 = vld [vmem:[#allocation7] sm:$0xf] }
 0x382   :  { %v10058_v41 = vshrl.u32 %v897_v22, 7  ;;  %v9604_v22 = vld [vmem:[#allocation8 + $0x344] ss:$16 sps:$4 sm:$0xff]  }
 0x384   :  { %6626 = vmatpush1.bf16.msra.mxu0 %v9452_v25  ;;  %6708 = vmatpush1.bf16.msra.mxu1 %v9455_v44  ;;  %v899_v42 = vsub.s32 0, %v10058_v41  ;;  %v903_v25 = vsub.s32 1, %v10058_v41  ;;  %v911_v44 = vsub.s32 3, %v10058_v41 }
 0x385   :  { %6627 = vmatprep.subr.bf16.mxu0 %v9460_v45  ;;  %6709 = vmatprep.subr.bf16.mxu1 %v9463_v46 }
 0x386   :  { %v900_v45 = vrot.slane %v10061_v43, %v899_v42  ;;  %v904_v46 = vrot.slane %v10061_v43, %v903_v25 }
 0x388   :  { %6628 = vmatpush1.bf16.msra.mxu0 %v9458_v28  ;;  %6710 = vmatpush1.bf16.msra.mxu1 %v9461_v47  ;;  %v912_v28 = vrot.slane %v10061_v43, %v911_v44 }
 0x389   :  { %6629 = vmatprep.subr.bf16.mxu0 %v9466_v48  ;;  %6711 = vmatprep.subr.bf16.mxu1 %v9469_v49 }
 0x38c   :  { %6630 = vmatpush1.bf16.msra.mxu0 %v9464_v50  ;;  %6712 = vmatpush1.bf16.msra.mxu1 %v9467_v51 }
 0x38d   :  { %6631 = vmatprep.subr.bf16.mxu0 %v9472_v52  ;;  %6713 = vmatprep.subr.bf16.mxu1 %v9475_v53 }
 0x390   :  { %6632 = vmatpush1.bf16.msra.mxu0 %v9470_v54  ;;  %6714 = vmatpush1.bf16.msra.mxu1 %v9473_v55 }
 0x391   :  { %6633 = vmatprep.subr.bf16.mxu0 %v9478_v56  ;;  %6715 = vmatprep.subr.bf16.mxu1 %v9481_v57 }
 0x394   :  { %6634 = vmatpush1.bf16.msra.mxu0 %v9476_v58  ;;  %6716 = vmatpush1.bf16.msra.mxu1 %v9479_v59 }
 0x395   :  { %6635 = vmatprep.subr.bf16.mxu0 %v9484_v60  ;;  %6717 = vmatprep.subr.bf16.mxu1 %v9487_v61 }
 0x398   :  { %6636 = vmatpush1.bf16.msra.mxu0 %v9482_v62  ;;  %6718 = vmatpush1.bf16.msra.mxu1 %v9485_v63  ;;  %v9542_v62 = vld [vmem:[#allocation8 + $0x200] ss:$16 sps:$4 sm:$0xff]   ;;  %v9545_v63 = vld [vmem:[#allocation8 + $0x208] ss:$16 sps:$4 sm:$0xff]  }
 0x399   :  { %6637 = vmatprep.subr.bf16.mxu0 %v9490_v0  ;;  %6719 = vmatprep.subr.bf16.mxu1 %v9493_v1  ;;  %v9550_v1 = vld [vmem:[#allocation8 + $0x224] ss:$16 sps:$4 sm:$0xff]  }
 0x39c   :  { %6638 = vmatpush1.bf16.msra.mxu0 %v9488_v2  ;;  %6720 = vmatpush1.bf16.msra.mxu1 %v9491_v3  ;;  %v9553_v2 = vld [vmem:[#allocation8 + $0x22c] ss:$16 sps:$4 sm:$0xff]  }
 0x39d   :  { %6639 = vmatprep.subr.bf16.mxu0 %v9496_v4  ;;  %6721 = vmatprep.subr.bf16.mxu1 %v9499_v5  ;;  %v9548_v4 = vld [vmem:[#allocation8 + $0x220] ss:$16 sps:$4 sm:$0xff]   ;;  %v9551_v5 = vld [vmem:[#allocation8 + $0x228] ss:$16 sps:$4 sm:$0xff]  }
 0x3a0   :  { %6640 = vmatpush1.bf16.msra.mxu0 %v9494_v6  ;;  %6722 = vmatpush1.bf16.msra.mxu1 %v9497_v7  ;;  %v9556_v6 = vld [vmem:[#allocation8 + $0x244] ss:$16 sps:$4 sm:$0xff]   ;;  %v9559_v7 = vld [vmem:[#allocation8 + $0x24c] ss:$16 sps:$4 sm:$0xff]  }
 0x3a1   :  { %6641 = vmatprep.subr.bf16.mxu0 %v9502_v8  ;;  %6723 = vmatprep.subr.bf16.mxu1 %v9505_v9  ;;  %v9554_v8 = vld [vmem:[#allocation8 + $0x240] ss:$16 sps:$4 sm:$0xff]   ;;  %v9557_v9 = vld [vmem:[#allocation8 + $0x248] ss:$16 sps:$4 sm:$0xff]  }
 0x3a4   :  { %6642 = vmatpush1.bf16.msra.mxu0 %v9500_v10  ;;  %6724 = vmatpush1.bf16.msra.mxu1 %v9503_v12  ;;  %v9562_v10 = vld [vmem:[#allocation8 + $0x264] ss:$16 sps:$4 sm:$0xff]   ;;  %v9565_v12 = vld [vmem:[#allocation8 + $0x26c] ss:$16 sps:$4 sm:$0xff]  }
 0x3a5   :  { %6643 = vmatprep.subr.bf16.mxu0 %v9508_v13  ;;  %6725 = vmatprep.subr.bf16.mxu1 %v9511_v15  ;;  %v9560_v13 = vld [vmem:[#allocation8 + $0x260] ss:$16 sps:$4 sm:$0xff]   ;;  %v9563_v15 = vld [vmem:[#allocation8 + $0x268] ss:$16 sps:$4 sm:$0xff]  }
 0x3a8   :  { %6644 = vmatpush1.bf16.msra.mxu0 %v9506_v16  ;;  %6726 = vmatpush1.bf16.msra.mxu1 %v9509_v18  ;;  %v9568_v16 = vld [vmem:[#allocation8 + $0x284] ss:$16 sps:$4 sm:$0xff]   ;;  %v9571_v18 = vld [vmem:[#allocation8 + $0x28c] ss:$16 sps:$4 sm:$0xff]  }
 0x3a9   :  { %6645 = vmatprep.subr.bf16.mxu0 %v9514_v20  ;;  %6727 = vmatprep.subr.bf16.mxu1 %v9517_v11  ;;  %v9566_v20 = vld [vmem:[#allocation8 + $0x280] ss:$16 sps:$4 sm:$0xff]   ;;  %v9569_v11 = vld [vmem:[#allocation8 + $0x288] ss:$16 sps:$4 sm:$0xff]  }
 0x3ac   :  { %6646 = vmatpush1.bf16.msra.mxu0 %v9512_v21  ;;  %6728 = vmatpush1.bf16.msra.mxu1 %v9515_v14  ;;  %v9574_v21 = vld [vmem:[#allocation8 + $0x2a4] ss:$16 sps:$4 sm:$0xff]   ;;  %v9577_v14 = vld [vmem:[#allocation8 + $0x2ac] ss:$16 sps:$4 sm:$0xff]  }
 0x3ad   :  { %6647 = vmatprep.subr.bf16.mxu0 %v9520_v23  ;;  %6729 = vmatprep.subr.bf16.mxu1 %v9523_v24  ;;  %v9572_v23 = vld [vmem:[#allocation8 + $0x2a0] ss:$16 sps:$4 sm:$0xff]   ;;  %v9575_v24 = vld [vmem:[#allocation8 + $0x2a8] ss:$16 sps:$4 sm:$0xff]  }
 0x3b0   :  { %6648 = vmatpush1.bf16.msra.mxu0 %v9518_v17  ;;  %6730 = vmatpush1.bf16.msra.mxu1 %v9521_v26  ;;  %v9580_v17 = vld [vmem:[#allocation8 + $0x2c4] ss:$16 sps:$4 sm:$0xff]   ;;  %v9583_v26 = vld [vmem:[#allocation8 + $0x2cc] ss:$16 sps:$4 sm:$0xff]  }
 0x3b1   :  { %6649 = vmatprep.subr.bf16.mxu0 %v9526_v27  ;;  %6731 = vmatprep.subr.bf16.mxu1 %v9529_v19  ;;  %v9578_v27 = vld [vmem:[#allocation8 + $0x2c0] ss:$16 sps:$4 sm:$0xff]   ;;  %v9581_v19 = vld [vmem:[#allocation8 + $0x2c8] ss:$16 sps:$4 sm:$0xff]  }
 0x3b4   :  { %6650 = vmatpush1.bf16.msra.mxu0 %v9524_v29  ;;  %6732 = vmatpush1.bf16.msra.mxu1 %v9527_v30  ;;  %v9586_v29 = vld [vmem:[#allocation8 + $0x2e4] ss:$16 sps:$4 sm:$0xff]   ;;  %v9589_v30 = vld [vmem:[#allocation8 + $0x2ec] ss:$16 sps:$4 sm:$0xff]  }
 0x3b5   :  { %6651 = vmatprep.subr.bf16.mxu0 %v9532_v31  ;;  %6733 = vmatprep.subr.bf16.mxu1 %v9535_v32  ;;  %v9584_v31 = vld [vmem:[#allocation8 + $0x2e0] ss:$16 sps:$4 sm:$0xff]   ;;  %v9587_v32 = vld [vmem:[#allocation8 + $0x2e8] ss:$16 sps:$4 sm:$0xff]  }
 0x3b8   :  { %6652 = vmatpush1.bf16.msra.mxu0 %v9530_v33  ;;  %6734 = vmatpush1.bf16.msra.mxu1 %v9533_v34  ;;  %v9592_v33 = vld [vmem:[#allocation8 + $0x304] ss:$16 sps:$4 sm:$0xff]   ;;  %v9595_v34 = vld [vmem:[#allocation8 + $0x30c] ss:$16 sps:$4 sm:$0xff]  }
 0x3b9   :  { %6653 = vmatprep.subr.bf16.mxu0 %v9538_v35  ;;  %6735 = vmatprep.subr.bf16.mxu1 %v9541_v36  ;;  %v9590_v35 = vld [vmem:[#allocation8 + $0x300] ss:$16 sps:$4 sm:$0xff]   ;;  %v9593_v36 = vld [vmem:[#allocation8 + $0x308] ss:$16 sps:$4 sm:$0xff]  }
 0x3bc   :  { %6654 = vmatpush1.bf16.msra.mxu0 %v9536_v37  ;;  %6736 = vmatpush1.bf16.msra.mxu1 %v9539_v38  ;;  %v9598_v37 = vld [vmem:[#allocation8 + $0x324] ss:$16 sps:$4 sm:$0xff]   ;;  %v9601_v38 = vld [vmem:[#allocation8 + $0x32c] ss:$16 sps:$4 sm:$0xff]  }
 0x3bd   :  { %6664 = vmatprep.subr.bf16.mxu0 %v9544_v39  ;;  %6746 = vmatprep.subr.bf16.mxu1 %v9547_v40  ;;  %v9596_v39 = vld [vmem:[#allocation8 + $0x320] ss:$16 sps:$4 sm:$0xff]   ;;  %v9599_v40 = vld [vmem:[#allocation8 + $0x328] ss:$16 sps:$4 sm:$0xff]  }
 0x452   :  { %v5326_v47 = vpop.f32.mrb[0].mxu0  ;;  %v10074_v48 = vpop.f32.mrb[0].mxu1 }
 0x453   :  { %v8154_v49 = vadd.f32 %v5326_v47, %v900_v45  ;;  %v5328_v50 = vpop.f32.mrb[1].mxu0  ;;  %v5820_v51 = vpop.f32.mrb[1].mxu1  ;;  %v9607_v45 = vld [vmem:[#allocation8 + $0x34c] ss:$16 sps:$4 sm:$0xff]   ;;  %v9610_v47 = vld [vmem:[#allocation8 + $0x364] ss:$16 sps:$4 sm:$0xff]  }
 0x454   :  { %v8155_v52 = vadd.f32 %v5328_v50, %v904_v46  ;;  %v8157_v53 = vadd.f32 %v5820_v51, %v912_v28  ;;  %v5330_v54 = vpop.f32.mrb[2].mxu0  ;;  %v5822_v55 = vpop.f32.mrb[2].mxu1  ;;  %v9602_v46 = vld [vmem:[#allocation8 + $0x340] ss:$16 sps:$4 sm:$0xff]   ;;  %v9605_v28 = vld [vmem:[#allocation8 + $0x348] ss:$16 sps:$4 sm:$0xff]  }
 0x455   :  { %v5825_v56 = vmax.f32 %v8154_v49, 0.0  ;;  %v5331_v57 = vpop.f32.mrb[3].mxu0  ;;  %v5823_v58 = vpop.f32.mrb[3].mxu1  ;;  %v9613_v49 = vld [vmem:[#allocation8 + $0x36c] ss:$16 sps:$4 sm:$0xff]  }
 0x456   :  { %v5826_v59 = vmax.f32 %v8155_v52, 0.0  ;;  %v5828_v60 = vmax.f32 %v8157_v53, 0.0  ;;  %v9608_v50 = vld [vmem:[#allocation8 + $0x360] ss:$16 sps:$4 sm:$0xff]   ;;  %v9611_v51 = vld [vmem:[#allocation8 + $0x368] ss:$16 sps:$4 sm:$0xff]  }
 0x457   :  { %v5829_v0 = vpack.c.bf16 %v5825_v56, %v5825_v56  ;;  %v9616_v52 = vld [vmem:[#allocation8 + $0x384] ss:$16 sps:$4 sm:$0xff]   ;;  %v9619_v53 = vld [vmem:[#allocation8 + $0x38c] ss:$16 sps:$4 sm:$0xff]   ;;  %v9614_v54 = vld [vmem:[#allocation8 + $0x380] ss:$16 sps:$4 sm:$0xff]  }
 0x458   :  { %v5830_v61 = vpack.c.bf16 %v5826_v59, %v5826_v59  ;;  %v5832_v3 = vpack.c.bf16 %v5828_v60, %v5828_v60  ;;  %v9617_v55 = vld [vmem:[#allocation8 + $0x388] ss:$16 sps:$4 sm:$0xff]   ;;  %v907_v56 = vsub.s32 2, %v10058_v41  ;;  %v9622_v57 = vld [vmem:[#allocation8 + $0x3a4] ss:$16 sps:$4 sm:$0xff]  }
 0x459   :  { %v9625_v58 = vld [vmem:[#allocation8 + $0x3ac] ss:$16 sps:$4 sm:$0xff]   ;;  %v9620_v59 = vld [vmem:[#allocation8 + $0x3a0] ss:$16 sps:$4 sm:$0xff]   ;;  %v9623_v60 = vld [vmem:[#allocation8 + $0x3a8] ss:$16 sps:$4 sm:$0xff]  }
 0x45a   :  { %6655 = vmatprep.mubr.bf16.mxu0 %v5830_v61  ;;  %6737 = vmatprep.mubr.bf16.mxu1 %v5830_v61  ;;  %v908_v61 = vrot.slane %v10061_v43, %v907_v56  ;;  %v9638_v43 = vld [vmem:[#allocation11 + $0x40] sm:$0xff]  }
 0x45b   :  { %6656 = vmatmul.mubr.bf16.vlgmr.msra.gmra.mrb[4].mxu0 %v5829_v0  ;;  %6738 = vmatmul.mubr.bf16.vlgmr.msra.gmra.mrb[4].mxu1 %v5829_v0  ;;  %v9626_v0 = vld [vmem:[#allocation8 + $0x3c0] ss:$16 sps:$4 sm:$0xff]  }
 0x45c   :  { %6665 = vmatpush1.bf16.msra.mxu0 %v9542_v62  ;;  %6747 = vmatpush1.bf16.msra.mxu1 %v9545_v63  ;;  %v9628_v62 = vld [vmem:[#allocation8 + $0x3c4] ss:$16 sps:$4 sm:$0xff]   ;;  %v9631_v63 = vld [vmem:[#allocation8 + $0x3cc] ss:$16 sps:$4 sm:$0xff]  }
 0x45d   :  { %6696 = vmatprep.mubr.bf16.mxu0 %v5832_v3  ;;  %6778 = vmatprep.mubr.bf16.mxu1 %v5832_v3  ;;  %v9634_v3 = vld [vmem:[#allocation8 + $0x3e4] ss:$16 sps:$4 sm:$0xff]  }
 0x45e   :  { %6666 = vmatprep.subr.bf16.mxu0 %v9550_v1  ;;  %6748 = vmatprep.subr.bf16.mxu1 %v9553_v2  ;;  %v9629_v1 = vld [vmem:[#allocation8 + $0x3c8] ss:$16 sps:$4 sm:$0xff]   ;;  %v8156_v2 = vadd.f32 %v10074_v48, %v908_v61  ;;  %v9642_v48 = vld [vmem:[#allocation11 + $0x48] sm:$0xff]  }
 0x460   :  { %6667 = vmatpush1.bf16.msra.mxu0 %v9548_v4  ;;  %6749 = vmatpush1.bf16.msra.mxu1 %v9551_v5  ;;  %v9637_v4 = vld [vmem:[#allocation8 + $0x3ec] ss:$16 sps:$4 sm:$0xff]   ;;  %v9632_v5 = vld [vmem:[#allocation8 + $0x3e0] ss:$16 sps:$4 sm:$0xff]  }
 0x461   :  { %6668 = vmatprep.subr.bf16.mxu0 %v9556_v6  ;;  %6750 = vmatprep.subr.bf16.mxu1 %v9559_v7  ;;  %v9635_v6 = vld [vmem:[#allocation8 + $0x3e8] ss:$16 sps:$4 sm:$0xff]   ;;  %v5827_v7 = vmax.f32 %v8156_v2, 0.0 }
 0x464   :  { %6669 = vmatpush1.bf16.msra.mxu0 %v9554_v8  ;;  %6751 = vmatpush1.bf16.msra.mxu1 %v9557_v9  ;;  %v9639_v8 = vld [vmem:[#allocation11 + $0xc0] sm:$0xff]  }
 0x465   :  { %6670 = vmatprep.subr.bf16.mxu0 %v9562_v10  ;;  %6752 = vmatprep.subr.bf16.mxu1 %v9565_v12  ;;  %v9640_v9 = vld [vmem:[#allocation11] sm:$0xff]   ;;  %v5831_v12 = vpack.c.bf16 %v5827_v7, %v5827_v7 }
 0x466   :  { %v9641_v10 = vld [vmem:[#allocation11 + $0x80] sm:$0xff]  }
 0x468   :  { %6671 = vmatpush1.bf16.msra.mxu0 %v9560_v13  ;;  %6753 = vmatpush1.bf16.msra.mxu1 %v9563_v15  ;;  %v9643_v13 = vld [vmem:[#allocation11 + $0xc8] sm:$0xff]  }
 0x469   :  { %6672 = vmatprep.subr.bf16.mxu0 %v9568_v16  ;;  %6754 = vmatprep.subr.bf16.mxu1 %v9571_v18  ;;  %v9644_v15 = vld [vmem:[#allocation11 + $0x8] sm:$0xff]   ;;  %v9646_v18 = vld [vmem:[#allocation11 + $0x50] sm:$0xff]  }
 0x46a   :  { %v9645_v16 = vld [vmem:[#allocation11 + $0x88] sm:$0xff]  }
 0x46c   :  { %6673 = vmatpush1.bf16.msra.mxu0 %v9566_v20  ;;  %6755 = vmatpush1.bf16.msra.mxu1 %v9569_v11  ;;  %v9647_v20 = vld [vmem:[#allocation11 + $0xd0] sm:$0xff]  }
 0x46d   :  { %6674 = vmatprep.subr.bf16.mxu0 %v9574_v21  ;;  %6756 = vmatprep.subr.bf16.mxu1 %v9577_v14  ;;  %v9648_v11 = vld [vmem:[#allocation11 + $0x10] sm:$0xff]   ;;  %v9650_v14 = vld [vmem:[#allocation11 + $0x58] sm:$0xff]  }
 0x46e   :  { %v9649_v21 = vld [vmem:[#allocation11 + $0x90] sm:$0xff]  }
 0x470   :  { %6675 = vmatpush1.bf16.msra.mxu0 %v9572_v23  ;;  %6757 = vmatpush1.bf16.msra.mxu1 %v9575_v24  ;;  %v9651_v23 = vld [vmem:[#allocation11 + $0xd8] sm:$0xff]  }
 0x471   :  { %6676 = vmatprep.subr.bf16.mxu0 %v9580_v17  ;;  %6758 = vmatprep.subr.bf16.mxu1 %v9583_v26  ;;  %v9652_v24 = vld [vmem:[#allocation11 + $0x18] sm:$0xff]   ;;  %v9654_v26 = vld [vmem:[#allocation11 + $0x60] sm:$0xff]  }
 0x472   :  { %v9653_v17 = vld [vmem:[#allocation11 + $0x98] sm:$0xff]  }
 0x474   :  { %6677 = vmatpush1.bf16.msra.mxu0 %v9578_v27  ;;  %6759 = vmatpush1.bf16.msra.mxu1 %v9581_v19  ;;  %v9655_v27 = vld [vmem:[#allocation11 + $0xe0] sm:$0xff]  }
 0x475   :  { %6678 = vmatprep.subr.bf16.mxu0 %v9586_v29  ;;  %6760 = vmatprep.subr.bf16.mxu1 %v9589_v30  ;;  %v9656_v19 = vld [vmem:[#allocation11 + $0x20] sm:$0xff]   ;;  %v9658_v30 = vld [vmem:[#allocation11 + $0x68] sm:$0xff]  }
 0x476   :  { %v9657_v29 = vld [vmem:[#allocation11 + $0xa0] sm:$0xff]  }
 0x478   :  { %6679 = vmatpush1.bf16.msra.mxu0 %v9584_v31  ;;  %6761 = vmatpush1.bf16.msra.mxu1 %v9587_v32  ;;  %v9659_v31 = vld [vmem:[#allocation11 + $0xe8] sm:$0xff]  }
 0x479   :  { %6680 = vmatprep.subr.bf16.mxu0 %v9592_v33  ;;  %6762 = vmatprep.subr.bf16.mxu1 %v9595_v34  ;;  %v9660_v32 = vld [vmem:[#allocation11 + $0x28] sm:$0xff]   ;;  %v9662_v34 = vld [vmem:[#allocation11 + $0x70] sm:$0xff]  }
 0x47a   :  { %v9661_v33 = vld [vmem:[#allocation11 + $0xa8] sm:$0xff]  }
 0x47c   :  { %6681 = vmatpush1.bf16.msra.mxu0 %v9590_v35  ;;  %6763 = vmatpush1.bf16.msra.mxu1 %v9593_v36  ;;  %v9663_v35 = vld [vmem:[#allocation11 + $0xf0] sm:$0xff]  }
 0x47d   :  { %6682 = vmatprep.subr.bf16.mxu0 %v9598_v37  ;;  %6764 = vmatprep.subr.bf16.mxu1 %v9601_v38  ;;  %v9664_v36 = vld [vmem:[#allocation11 + $0x30] sm:$0xff]   ;;  %v9666_v38 = vld [vmem:[#allocation11 + $0x78] sm:$0xff]  }
 0x47e   :  { %v9665_v37 = vld [vmem:[#allocation11 + $0xb0] sm:$0xff]  }
 0x480   :  { %6683 = vmatpush1.bf16.msra.mxu0 %v9596_v39  ;;  %6765 = vmatpush1.bf16.msra.mxu1 %v9599_v40  ;;  %v9667_v39 = vld [vmem:[#allocation11 + $0xf8] sm:$0xff]  }
 0x481   :  { %6684 = vmatprep.subr.bf16.mxu0 %v9604_v22  ;;  %6766 = vmatprep.subr.bf16.mxu1 %v9607_v45  ;;  %v9668_v40 = vld [vmem:[#allocation11 + $0x38] sm:$0xff]  }
 0x482   :  { %v9669_v22 = vld [vmem:[#allocation11 + $0xb8] sm:$0xff]  }
 0x483   :  { %v5961_v45 = vld [vmem:[#allocation10] sm:$0xf] }
 0x484   :  { %6685 = vmatpush1.bf16.msra.mxu0 %v9602_v46  ;;  %6767 = vmatpush1.bf16.msra.mxu1 %v9605_v28  ;;  %v5966_v46 = vrot.slane %v5961_v45, %v899_v42  ;;  %v5974_v28 = vrot.slane %v5961_v45, %v907_v56 }
 0x485   :  { %6686 = vmatprep.subr.bf16.mxu0 %v9610_v47  ;;  %6768 = vmatprep.subr.bf16.mxu1 %v9613_v49  ;;  %v5970_v47 = vrot.slane %v5961_v45, %v903_v25  ;;  %v5978_v49 = vrot.slane %v5961_v45, %v911_v44 }
 0x488   :  { %6687 = vmatpush1.bf16.msra.mxu0 %v9608_v50  ;;  %6769 = vmatpush1.bf16.msra.mxu1 %v9611_v51 }
 0x489   :  { %6688 = vmatprep.subr.bf16.mxu0 %v9616_v52  ;;  %6770 = vmatprep.subr.bf16.mxu1 %v9619_v53 }
 0x48c   :  { %6689 = vmatpush1.bf16.msra.mxu0 %v9614_v54  ;;  %6771 = vmatpush1.bf16.msra.mxu1 %v9617_v55 }
 0x48d   :  { %6690 = vmatprep.subr.bf16.mxu0 %v9622_v57  ;;  %6772 = vmatprep.subr.bf16.mxu1 %v9625_v58 }
 0x490   :  { %6691 = vmatpush1.bf16.msra.mxu0 %v9620_v59  ;;  %6773 = vmatpush1.bf16.msra.mxu1 %v9623_v60 }
 0x491   :  { %6692 = vmatprep.subr.bf16.mxu0 %v9628_v62  ;;  %6774 = vmatprep.subr.bf16.mxu1 %v9631_v63 }
 0x494   :  { %6693 = vmatpush1.bf16.msra.mxu0 %v9626_v0  ;;  %6775 = vmatpush1.bf16.msra.mxu1 %v9629_v1 }
 0x495   :  { %6694 = vmatprep.subr.bf16.mxu0 %v9634_v3  ;;  %6776 = vmatprep.subr.bf16.mxu1 %v9637_v4  ;;  %v8077_v4 = vld [vmem:[#allocation13] ss:$0 sm:$0xff] }
 0x498   :  { %6695 = vmatpush1.bf16.msra.mxu0 %v9632_v5  ;;  %6777 = vmatpush1.bf16.msra.mxu1 %v9635_v6 }
 0x499   :  { %8110 = vmatprep.subr.bf16.mxu0 %v9638_v43  ;;  %8132 = vmatprep.subr.bf16.mxu1 %v9639_v8 }
 0x49b   :  { %6697 = vmatmul.mubr.bf16.vlgmr.msra.gmra.mrb[4].mxu0 %v5831_v12  ;;  %6779 = vmatmul.mubr.bf16.vlgmr.msra.gmra.mrb[4].mxu1 %v5831_v12 }
 0x49c   :  { %8111 = vmatpush3.bf16.msra.mxu0 %v9640_v9  ;;  %8133 = vmatpush3.bf16.msra.mxu1 %v9641_v10 }
 0x49d   :  { %8112 = vmatprep.subr.bf16.mxu0 %v9642_v48  ;;  %8134 = vmatprep.subr.bf16.mxu1 %v9643_v13 }
 0x4a0   :  { %8113 = vmatpush3.bf16.msra.mxu0 %v9644_v15  ;;  %8135 = vmatpush3.bf16.msra.mxu1 %v9645_v16 }
 0x4a1   :  { %8114 = vmatprep.subr.bf16.mxu0 %v9646_v18  ;;  %8136 = vmatprep.subr.bf16.mxu1 %v9647_v20 }
 0x4a4   :  { %8115 = vmatpush3.bf16.msra.mxu0 %v9648_v11  ;;  %8137 = vmatpush3.bf16.msra.mxu1 %v9649_v21 }
 0x4a5   :  { %8116 = vmatprep.subr.bf16.mxu0 %v9650_v14  ;;  %8138 = vmatprep.subr.bf16.mxu1 %v9651_v23 }
 0x4a8   :  { %8117 = vmatpush3.bf16.msra.mxu0 %v9652_v24  ;;  %8139 = vmatpush3.bf16.msra.mxu1 %v9653_v17 }
 0x4a9   :  { %8118 = vmatprep.subr.bf16.mxu0 %v9654_v26  ;;  %8140 = vmatprep.subr.bf16.mxu1 %v9655_v27 }
 0x4ac   :  { %8119 = vmatpush3.bf16.msra.mxu0 %v9656_v19  ;;  %8141 = vmatpush3.bf16.msra.mxu1 %v9657_v29 }
 0x4ad   :  { %8120 = vmatprep.subr.bf16.mxu0 %v9658_v30  ;;  %8142 = vmatprep.subr.bf16.mxu1 %v9659_v31 }
 0x4b0   :  { %8121 = vmatpush3.bf16.msra.mxu0 %v9660_v32  ;;  %8143 = vmatpush3.bf16.msra.mxu1 %v9661_v33 }
 0x4b1   :  { %8122 = vmatprep.subr.bf16.mxu0 %v9662_v34  ;;  %8144 = vmatprep.subr.bf16.mxu1 %v9663_v35 }
 0x4b4   :  { %8123 = vmatpush3.bf16.msra.mxu0 %v9664_v36  ;;  %8145 = vmatpush3.bf16.msra.mxu1 %v9665_v37 }
 0x4b5   :  { %8124 = vmatprep.subr.bf16.mxu0 %v9666_v38  ;;  %8146 = vmatprep.subr.bf16.mxu1 %v9667_v39 }
 0x4b8   :  { %8125 = vmatpush3.bf16.msra.mxu0 %v9668_v40  ;;  %8147 = vmatpush3.bf16.msra.mxu1 %v9669_v22 }
 0x56e   :  { %v6698_v50 = vpop.f32.mrb[4].mxu0  ;;  %v6780_v51 = vpop.f32.mrb[4].mxu1 }
 0x56f   :  { %v8158_v52 = vadd.f32 %v6698_v50, %v5966_v46  ;;  %v8160_v53 = vadd.f32 %v6780_v51, %v5974_v28  ;;  %v6700_v54 = vpop.f32.mrb[5].mxu0  ;;  %v6782_v55 = vpop.f32.mrb[5].mxu1 }
 0x570   :  { %v8159_v57 = vadd.f32 %v6700_v54, %v5970_v47  ;;  %v8161_v58 = vadd.f32 %v6782_v55, %v5978_v49  ;;  %v6702_v59 = vpop.f32.mrb[6].mxu0  ;;  %v6784_v60 = vpop.f32.mrb[6].mxu1 }
 0x571   :  { %v6787_v42 = vmax.f32 %v8158_v52, 0.0  ;;  %v6789_v61 = vmax.f32 %v8160_v53, 0.0  ;;  %v6703_v62 = vpop.f32.mrb[7].mxu0  ;;  %v6785_v56 = vpop.f32.mrb[7].mxu1 }
 0x572   :  { %v6788_v63 = vmax.f32 %v8159_v57, 0.0  ;;  %v6790_v0 = vmax.f32 %v8161_v58, 0.0 }
 0x573   :  { %v6791_v41 = vpack.c.bf16 %v6787_v42, %v6787_v42  ;;  %v6793_v44 = vpack.c.bf16 %v6789_v61, %v6789_v61 }
 0x574   :  { %v6792_v25 = vpack.c.bf16 %v6788_v63, %v6788_v63  ;;  %v6794_v1 = vpack.c.bf16 %v6790_v0, %v6790_v0 }
 0x576   :  { %7090 = vmatprep.mubr.bf16.mxu0 %v6792_v25  ;;  %7130 = vmatprep.mubr.bf16.mxu1 %v6794_v1 }
 0x577   :  { %7091 = vmatmul.mubr.bf16.vlgmr.msra.gmra.mrb[8].mxu0 %v6791_v41  ;;  %7131 = vmatmul.mubr.bf16.vlgmr.msra.gmra.mrb[8].mxu1 %v6793_v44 }
 0x64a   :  { %v8126_v2 = vpop.f32.mrb[8].mxu0  ;;  %v8148_v3 = vpop.f32.mrb[8].mxu1 }
 0x64b   :  { %v8127_v5 = vpop.f32.mrb[9].mxu0  ;;  %v8149_v6 = vpop.f32.mrb[9].mxu1 }
 0x64c   :  { %v8128_v7 = vadd.f32 %v8127_v5, %v8126_v2  ;;  %v8150_v43 = vadd.f32 %v8149_v6, %v8148_v3  ;;  %v8129_v8 = vpop.f32.mrb[10].mxu0  ;;  %v8151_v9 = vpop.f32.mrb[10].mxu1 }
 0x64d   :  { %v8130_v10 = vpop.f32.mrb[11].mxu0  ;;  %v8152_v12 = vpop.f32.mrb[11].mxu1 }
 0x64e   :  { %v7093_v48 = vadd.f32 %v8128_v7, %v8077_v4 }
 0x650   :  { %v7133_v13 = vadd.f32 %v8150_v43, %v7093_v48 }
 0x652   :  { %7138 = vst [vmem:[#allocation14] sm:$0xff] %v7133_v13 }
 0x653   :  { %9835 = shalt.err (!%p9832_p4)
}
 0x654   :  { %s9836_s11 = scalar_lea.hbm %s10108_s7, 128 }
 0x655   :  { %p9837_p5 = scmp.ne.s32.totalorder %s10108_s7, %s9836_s11  ;;  %p9840_p6 = scmp.lt.u32.totalorder %s9836_s11, %s10108_s7 }
 0x657   :  { %p9842_p7 = pnand %p9840_p6, %p9837_p5 }
 0x659   :  { %9845 = shalt.err (!%p9842_p7)
}
 0x65a   :  { %7148 = dma.vmem_to_hbm [thread:$0]  %s7146_s13, 128, %s10108_s7, [#allocation4]  }
 0x65b   :  { %9854 = dma.done.wait [#allocation4], 128  }
 0x65c   :  { %9855 = vsyncadd [#allocation4], 4294967168 }
 0x65d   :  { %7152 = vsyncpa [#allocation3], 1 }
 0x65e   :  { %7153 = vsyncpa [#allocation6], 1 }
 0x65f   :  { %7154 = vsyncpa [#allocation9], 1 }
 0x660   :  { %7155 = vsyncpa [#allocation12], 1 }
 0x661   :  { %7156 = vsyncpa [#allocation4], 1 }

</bundles_post_ra>
